<compile_context>
chip_gen: v7x
topology: tpu7x:2x2x1
jax: 0.10.0
libtpu: 0.0.40
codegen_flags: <defaults>
</compile_context>

<pallas_src>
import functools
import math

import jax
import jax.numpy as jnp
from jax import lax
from jax.experimental import pallas as pl
from jax.experimental.pallas import tpu as pltpu

# ---- model hyper-parameters (consistent with the module __init__) ----------
NUM_USERS = 16            # unused in forward (kept for fidelity)
NUM_ITEMS = 512           # logits over 512 items (lane-dense multiple of 128)
MAX_SEQ_LEN = 8
EMBED_DIM = 32
NUM_HEADS = 2
NUM_LAYERS = 2
FF_DIM = 2048             # nn.TransformerEncoderLayer default dim_feedforward
DROPOUT_RATE = 0.1        # eval mode -> dropout is identity
NEG_INF = -1e30           # additive mask value
LN_EPS = 1e-5             # nn.TransformerEncoderLayer default layer_norm_eps
HEAD_DIM = EMBED_DIM // NUM_HEADS


def _layer_norm(x, w, b, eps=LN_EPS):
    mu = jnp.mean(x, axis=-1, keepdims=True)
    var = jnp.mean(jnp.square(x - mu), axis=-1, keepdims=True)
    return (x - mu) * lax.rsqrt(var + eps) * w + b


# --------------------------- fused Pallas kernel -----------------------------
def fused_sasrec_kernel(x_ref, kmask_ref,
                        wq_ref, wk_ref, wv_ref, bq_ref, bk_ref, bv_ref,
                        wo_ref, bo_ref,
                        w1_ref, b1_ref, w2_ref, b2_ref,
                        ln1w_ref, ln1b_ref, ln2w_ref, ln2b_ref,
                        itemw_ref, out_ref,
                        *, num_layers, num_heads, block_b, seq_len):
    BB, S = block_b, seq_len
    D = x_ref.shape[-1]
    dh = D // num_heads
    scale = 1.0 / math.sqrt(dh)

    x3 = x_ref[...]                     # (BB, S, D) f32 activations for this tile
    kmask = kmask_ref[...]              # (BB, 1, S) additive key-padding mask
    x = x3.reshape(BB * S, D)           # flattened rows for projections / FF

    for l in range(num_layers):         # static unroll over layers
        # ---- multi-head self-attention (per-head, pre-split weights) ----
        attn = jnp.zeros((BB * S, D), jnp.float32)
        for h in range(num_heads):
            q = jnp.dot(x, wq_ref[l, h], preferred_element_type=jnp.float32) + bq_ref[l, h]
            k = jnp.dot(x, wk_ref[l, h], preferred_element_type=jnp.float32) + bk_ref[l, h]
            v = jnp.dot(x, wv_ref[l, h], preferred_element_type=jnp.float32) + bv_ref[l, h]
            q3 = q.reshape(BB, S, dh)
            k3 = k.reshape(BB, S, dh)
            v3 = v.reshape(BB, S, dh)
            # per-batch-row S x S scores only (no cross-batch block-diag work)
            sc = jnp.einsum('bqe,bke->bqk', q3, k3,
                            preferred_element_type=jnp.float32) * scale
            sc = sc + kmask                                   # broadcast over queries
            m = jnp.max(sc, axis=-1, keepdims=True)
            p = jnp.exp(sc - m)
            p = p / jnp.sum(p, axis=-1, keepdims=True)        # exact softmax
            ctx = jnp.einsum('bqk,bke->bqe', p, v3,
                             preferred_element_type=jnp.float32).reshape(BB * S, dh)
            # accumulate straight into the output projection (no head concat)
            attn = attn + jnp.dot(ctx, wo_ref[l, h],
                                  preferred_element_type=jnp.float32)
        attn = attn + bo_ref[l]

        # residual + LayerNorm 1 (post-norm, PyTorch default norm_first=False)
        h1 = _layer_norm(x + attn, ln1w_ref[l], ln1b_ref[l])

        # feed-forward: Linear -> ReLU -> Linear (bf16 weights, f32 accumulate)
        ff = jnp.dot(h1.astype(jnp.bfloat16), w1_ref[l],
                     preferred_element_type=jnp.float32) + b1_ref[l]
        ff = jnp.maximum(ff, 0.0)
        ff = jnp.dot(ff.astype(jnp.bfloat16), w2_ref[l],
                     preferred_element_type=jnp.float32) + b2_ref[l]

        # residual + LayerNorm 2
        x = _layer_norm(h1 + ff, ln2w_ref[l], ln2b_ref[l])

    # last sequence position of each row in the tile: single reshape + slice
    last = x.reshape(BB, S, D)[:, S - 1, :]                   # (BB, D)

    # logits against the (pre-transposed, bf16) item table: lane-dense store
    logits = jnp.dot(last.astype(jnp.bfloat16), itemw_ref[...],
                     preferred_element_type=jnp.float32)      # (BB, NUM_ITEMS)
    out_ref[...] = logits.reshape(out_ref.shape).astype(out_ref.dtype)


# --------------------------- wrapper ------------------------------------------
def _resident_spec(arr):
    # Whole-array block with a constant block index -> fetched once, resident
    # in VMEM across all grid steps (weights).
    nd = arr.ndim
    return pl.BlockSpec(arr.shape, lambda i, nd=nd: (0,) * nd)


def sasrec_forward(input_seq, params, *, block_b=1):
    """block_b: batch rows per grid step.  Keep 1 for tiny batches (lets v7x
    split rows across its two TensorCores); raise to ~32 (v6e/v7x) / 16 (v5e)
    for large serving batches so M = block_b*S fills the MXU."""
    B, S = input_seq.shape
    D = EMBED_DIM
    assert S == MAX_SEQ_LEN
    assert B % block_b == 0
    grid_b = B // block_b

    # Embedding lookups (plain-JAX glue).
    x = (params['item_emb'][input_seq] + params['pos_emb'][None, :, :]).astype(jnp.float32)
    # TODO(synk): dropout omitted (eval-mode identity).

    # O(B*S) additive key-padding mask (0 for real keys, -1e30 for padded item 0);
    # the SxS attention mask is built in-kernel by broadcast.
    kmask = jnp.where(input_seq == 0, NEG_INF, 0.0).astype(jnp.float32)[:, None, :]  # (B,1,S)

    args = (x, kmask,
            params['wq'], params['wk'], params['wv'],
            params['bq'], params['bk'], params['bv'],
            params['wo'], params['bo'],
            params['w1'], params['b1'], params['w2'], params['b2'],
            params['ln1_w'], params['ln1_b'], params['ln2_w'], params['ln2_b'],
            params['item_emb_t'])

    in_specs = [
        pl.BlockSpec((block_b, S, D), lambda i: (i, 0, 0)),            # activations
        pl.BlockSpec((block_b, 1, S), lambda i: (i, 0, 0)),            # key-pad mask
    ] + [_resident_spec(a) for a in args[2:]]                          # weights

    kernel = functools.partial(fused_sasrec_kernel,
                               num_layers=NUM_LAYERS, num_heads=NUM_HEADS,
                               block_b=block_b, seq_len=S)
    out = pl.pallas_call(
        kernel,
        out_shape=jax.ShapeDtypeStruct((B, 1, NUM_ITEMS), jnp.float32),
        grid=(grid_b,),
        in_specs=in_specs,
        out_specs=pl.BlockSpec((block_b, 1, NUM_ITEMS), lambda i: (i, 0, 0)),
        compiler_params=pltpu.CompilerParams(
            dimension_semantics=("parallel",),   # v7x: batch tiles across both TCs
        ),
    )(*args)
    return out.reshape(B, NUM_ITEMS)


# --------------------------- parameter init ----------------------------------
def init_params(key):
    def nrm(k, shape, scale=0.02):
        return scale * jax.random.normal(k, shape, jnp.float32)

    k_item, k_pos, k_layers = jax.random.split(key, 3)
    item_emb = nrm(k_item, (NUM_ITEMS + 1, EMBED_DIM))
    item_emb = item_emb.at[0].set(0.0)                    # padding_idx=0
    pos_emb = nrm(k_pos, (MAX_SEQ_LEN, EMBED_DIM))

    L, H, D, dh = NUM_LAYERS, NUM_HEADS, EMBED_DIM, HEAD_DIM
    wq, wk, wv, bq, bk, bv = [], [], [], [], [], []
    wo, bo = [], []
    w1, b1, w2, b2 = [], [], [], []
    ln1w, ln1b, ln2w, ln2b = [], [], [], []
    for lk in jax.random.split(k_layers, L):
        ks = jax.random.split(lk, 12)
        # Per-head pre-split projections: wq[h] ~ in_proj_weight[h*dh:(h+1)*dh,:].T
        wq.append(nrm(ks[0], (H, D, dh), 0.05))
        wk.append(nrm(ks[1], (H, D, dh), 0.05))
        wv.append(nrm(ks[2], (H, D, dh), 0.05))
        bq.append(nrm(ks[3], (H, 1, dh), 0.05))
        bk.append(nrm(ks[4], (H, 1, dh), 0.05))
        bv.append(nrm(ks[5], (H, 1, dh), 0.05))
        # Per-head output projection blocks: wo[h] ~ out_proj.weight.T[h*dh:(h+1)*dh,:]
        wo.append(nrm(ks[6], (H, dh, D), 0.05))
        bo.append(nrm(ks[7], (1, D), 0.05))
        w1.append(nrm(ks[8], (D, FF_DIM), 0.05))
        b1.append(nrm(ks[9], (1, FF_DIM), 0.05))
        w2.append(nrm(ks[10], (FF_DIM, D), 0.05))
        b2.append(nrm(ks[11], (1, D), 0.05))
        ln1w.append(jnp.ones((1, D), jnp.float32)); ln1b.append(jnp.zeros((1, D), jnp.float32))
        ln2w.append(jnp.ones((1, D), jnp.float32)); ln2b.append(jnp.zeros((1, D), jnp.float32))

    return dict(
        item_emb=item_emb,
        # logits weight = item_embedding.weight[1:].T, transposed ONCE, stored bf16
        item_emb_t=item_emb[1:].T.astype(jnp.bfloat16),
        pos_emb=pos_emb,
        wq=jnp.stack(wq), wk=jnp.stack(wk), wv=jnp.stack(wv),
        bq=jnp.stack(bq), bk=jnp.stack(bk), bv=jnp.stack(bv),
        wo=jnp.stack(wo), bo=jnp.stack(bo),
        w1=jnp.stack(w1).astype(jnp.bfloat16), b1=jnp.stack(b1),
        w2=jnp.stack(w2).astype(jnp.bfloat16), b2=jnp.stack(b2),
        ln1_w=jnp.stack(ln1w), ln1_b=jnp.stack(ln1b),
        ln2_w=jnp.stack(ln2w), ln2_b=jnp.stack(ln2b),
    )


# --------------------------- main ---------------------------------------------
if __name__ == "__main__":
    key = jax.random.PRNGKey(0)
    k_params, k_seq = jax.random.split(key)
    params = init_params(k_params)

    B = 2
    items = jax.random.randint(k_seq, (B, MAX_SEQ_LEN), 1, NUM_ITEMS + 1)
    # left-pad first batch row with two zeros (padding items)
    pad_counts = jnp.array([[2], [0]])
    pad_mask = jnp.arange(MAX_SEQ_LEN)[None, :] < pad_counts
    input_seq = jnp.where(pad_mask, 0, items).astype(jnp.int32)   # (B, S)

    logits = sasrec_forward(input_seq, params, block_b=1)
    logits = jax.block_until_ready(logits)
    assert logits.shape == (B, NUM_ITEMS)
    assert bool(jnp.all(jnp.isfinite(logits)))
    print("KERNEL_OK")
</pallas_src>

<mosaic_0001>
module attributes {stable_mosaic.version = 11 : i64} {
  func.func @fused_sasrec_kernel(%arg0: i32, %arg1: memref<1x8x32xf32, #tpu.memory_space<vmem>>, %arg2: memref<1x1x8xf32, #tpu.memory_space<vmem>>, %arg3: memref<2x2x32x16xf32, #tpu.memory_space<vmem>>, %arg4: memref<2x2x32x16xf32, #tpu.memory_space<vmem>>, %arg5: memref<2x2x32x16xf32, #tpu.memory_space<vmem>>, %arg6: memref<2x2x1x16xf32, #tpu.memory_space<vmem>>, %arg7: memref<2x2x1x16xf32, #tpu.memory_space<vmem>>, %arg8: memref<2x2x1x16xf32, #tpu.memory_space<vmem>>, %arg9: memref<2x2x16x32xf32, #tpu.memory_space<vmem>>, %arg10: memref<2x1x32xf32, #tpu.memory_space<vmem>>, %arg11: memref<2x32x2048xbf16, #tpu.memory_space<vmem>>, %arg12: memref<2x1x2048xf32, #tpu.memory_space<vmem>>, %arg13: memref<2x2048x32xbf16, #tpu.memory_space<vmem>>, %arg14: memref<2x1x32xf32, #tpu.memory_space<vmem>>, %arg15: memref<2x1x32xf32, #tpu.memory_space<vmem>>, %arg16: memref<2x1x32xf32, #tpu.memory_space<vmem>>, %arg17: memref<2x1x32xf32, #tpu.memory_space<vmem>>, %arg18: memref<2x1x32xf32, #tpu.memory_space<vmem>>, %arg19: memref<32x512xbf16, #tpu.memory_space<vmem>>, %arg20: memref<1x1x512xf32, #tpu.memory_space<vmem>>) attributes {dimension_semantics = [#tpu.dimension_semantics<parallel>], iteration_bounds = array<i64: 2>, scalar_prefetch = 0 : i64, scratch_operands = 0 : i64, tpu.core_type = #tpu.core_type<tc>, window_params = [{transform_indices = @transform_0, window_bounds = array<i64: 1, 8, 32>}, {transform_indices = @transform_1, window_bounds = array<i64: 1, 1, 8>}, {pipeline_mode = #tpu.pipeline_mode<synchronous>, transform_indices = @transform_2, window_bounds = array<i64: 2, 2, 32, 16>}, {pipeline_mode = #tpu.pipeline_mode<synchronous>, transform_indices = @transform_3, window_bounds = array<i64: 2, 2, 32, 16>}, {pipeline_mode = #tpu.pipeline_mode<synchronous>, transform_indices = @transform_4, window_bounds = array<i64: 2, 2, 32, 16>}, {pipeline_mode = #tpu.pipeline_mode<synchronous>, transform_indices = @transform_5, window_bounds = array<i64: 2, 2, 1, 16>}, {pipeline_mode = #tpu.pipeline_mode<synchronous>, transform_indices = @transform_6, window_bounds = array<i64: 2, 2, 1, 16>}, {pipeline_mode = #tpu.pipeline_mode<synchronous>, transform_indices = @transform_7, window_bounds = array<i64: 2, 2, 1, 16>}, {pipeline_mode = #tpu.pipeline_mode<synchronous>, transform_indices = @transform_8, window_bounds = array<i64: 2, 2, 16, 32>}, {pipeline_mode = #tpu.pipeline_mode<synchronous>, transform_indices = @transform_9, window_bounds = array<i64: 2, 1, 32>}, {pipeline_mode = #tpu.pipeline_mode<synchronous>, transform_indices = @transform_10, window_bounds = array<i64: 2, 32, 2048>}, {pipeline_mode = #tpu.pipeline_mode<synchronous>, transform_indices = @transform_11, window_bounds = array<i64: 2, 1, 2048>}, {pipeline_mode = #tpu.pipeline_mode<synchronous>, transform_indices = @transform_12, window_bounds = array<i64: 2, 2048, 32>}, {pipeline_mode = #tpu.pipeline_mode<synchronous>, transform_indices = @transform_13, window_bounds = array<i64: 2, 1, 32>}, {pipeline_mode = #tpu.pipeline_mode<synchronous>, transform_indices = @transform_14, window_bounds = array<i64: 2, 1, 32>}, {pipeline_mode = #tpu.pipeline_mode<synchronous>, transform_indices = @transform_15, window_bounds = array<i64: 2, 1, 32>}, {pipeline_mode = #tpu.pipeline_mode<synchronous>, transform_indices = @transform_16, window_bounds = array<i64: 2, 1, 32>}, {pipeline_mode = #tpu.pipeline_mode<synchronous>, transform_indices = @transform_17, window_bounds = array<i64: 2, 1, 32>}, {pipeline_mode = #tpu.pipeline_mode<synchronous>, transform_indices = @transform_18, window_bounds = array<i64: 32, 512>}, {transform_indices = @transform_19, window_bounds = array<i64: 1, 1, 512>}]} {
    %c0 = arith.constant 0 : index
    %c0_0 = arith.constant 0 : index
    %c0_1 = arith.constant 0 : index
    %0 = vector.load %arg1[%c0, %c0_0, %c0_1] : memref<1x8x32xf32, #tpu.memory_space<vmem>>, vector<1x8x32xf32>
    %c0_2 = arith.constant 0 : index
    %c0_3 = arith.constant 0 : index
    %c0_4 = arith.constant 0 : index
    %1 = vector.load %arg2[%c0_2, %c0_3, %c0_4] : memref<1x1x8xf32, #tpu.memory_space<vmem>>, vector<1x1x8xf32>
    %2 = vector.shape_cast %0 : vector<1x8x32xf32> to vector<8x32xf32>
    %cst = arith.constant 0.000000e+00 : f32
    %3 = vector.broadcast %cst : f32 to vector<8x32xf32>
    %c0_5 = arith.constant 0 : index
    %c0_6 = arith.constant 0 : index
    %c0_7 = arith.constant 0 : index
    %c0_8 = arith.constant 0 : index
    %4 = vector.load %arg3[%c0_5, %c0_6, %c0_7, %c0_8] : memref<2x2x32x16xf32, #tpu.memory_space<vmem>>, vector<1x1x32x16xf32>
    %5 = vector.shape_cast %4 : vector<1x1x32x16xf32> to vector<32x16xf32>
    %cst_9 = arith.constant dense<0.000000e+00> : vector<8x16xf32>
    %6 = tpu.matmul %2, %5, %cst_9 {dimension_numbers = #tpu.dot_dimension_numbers<[1], [0], [0], [1], [0, 0, 1, 1], [], []>} : vector<8x32xf32>, vector<32x16xf32>, vector<8x16xf32> -> vector<8x16xf32>
    %c0_10 = arith.constant 0 : index
    %c0_11 = arith.constant 0 : index
    %c0_12 = arith.constant 0 : index
    %c0_13 = arith.constant 0 : index
    %7 = vector.load %arg6[%c0_10, %c0_11, %c0_12, %c0_13] : memref<2x2x1x16xf32, #tpu.memory_space<vmem>>, vector<1x1x1x16xf32>
    %8 = vector.shape_cast %7 : vector<1x1x1x16xf32> to vector<1x16xf32>
    %9 = vector.broadcast %8 : vector<1x16xf32> to vector<8x16xf32>
    %10 = arith.addf %6, %9 : vector<8x16xf32>
    %c0_14 = arith.constant 0 : index
    %c0_15 = arith.constant 0 : index
    %c0_16 = arith.constant 0 : index
    %c0_17 = arith.constant 0 : index
    %11 = vector.load %arg4[%c0_14, %c0_15, %c0_16, %c0_17] : memref<2x2x32x16xf32, #tpu.memory_space<vmem>>, vector<1x1x32x16xf32>
    %12 = vector.shape_cast %11 : vector<1x1x32x16xf32> to vector<32x16xf32>
    %cst_18 = arith.constant dense<0.000000e+00> : vector<8x16xf32>
    %13 = tpu.matmul %2, %12, %cst_18 {dimension_numbers = #tpu.dot_dimension_numbers<[1], [0], [0], [1], [0, 0, 1, 1], [], []>} : vector<8x32xf32>, vector<32x16xf32>, vector<8x16xf32> -> vector<8x16xf32>
    %c0_19 = arith.constant 0 : index
    %c0_20 = arith.constant 0 : index
    %c0_21 = arith.constant 0 : index
    %c0_22 = arith.constant 0 : index
    %14 = vector.load %arg7[%c0_19, %c0_20, %c0_21, %c0_22] : memref<2x2x1x16xf32, #tpu.memory_space<vmem>>, vector<1x1x1x16xf32>
    %15 = vector.shape_cast %14 : vector<1x1x1x16xf32> to vector<1x16xf32>
    %16 = vector.broadcast %15 : vector<1x16xf32> to vector<8x16xf32>
    %17 = arith.addf %13, %16 : vector<8x16xf32>
    %c0_23 = arith.constant 0 : index
    %c0_24 = arith.constant 0 : index
    %c0_25 = arith.constant 0 : index
    %c0_26 = arith.constant 0 : index
    %18 = vector.load %arg5[%c0_23, %c0_24, %c0_25, %c0_26] : memref<2x2x32x16xf32, #tpu.memory_space<vmem>>, vector<1x1x32x16xf32>
    %19 = vector.shape_cast %18 : vector<1x1x32x16xf32> to vector<32x16xf32>
    %cst_27 = arith.constant dense<0.000000e+00> : vector<8x16xf32>
    %20 = tpu.matmul %2, %19, %cst_27 {dimension_numbers = #tpu.dot_dimension_numbers<[1], [0], [0], [1], [0, 0, 1, 1], [], []>} : vector<8x32xf32>, vector<32x16xf32>, vector<8x16xf32> -> vector<8x16xf32>
    %c0_28 = arith.constant 0 : index
    %c0_29 = arith.constant 0 : index
    %c0_30 = arith.constant 0 : index
    %c0_31 = arith.constant 0 : index
    %21 = vector.load %arg8[%c0_28, %c0_29, %c0_30, %c0_31] : memref<2x2x1x16xf32, #tpu.memory_space<vmem>>, vector<1x1x1x16xf32>
    %22 = vector.shape_cast %21 : vector<1x1x1x16xf32> to vector<1x16xf32>
    %23 = vector.broadcast %22 : vector<1x16xf32> to vector<8x16xf32>
    %24 = arith.addf %20, %23 : vector<8x16xf32>
    %25 = vector.shape_cast %10 : vector<8x16xf32> to vector<1x8x16xf32>
    %26 = vector.shape_cast %17 : vector<8x16xf32> to vector<1x8x16xf32>
    %27 = vector.shape_cast %24 : vector<8x16xf32> to vector<1x8x16xf32>
    "tpu.trace_start"() <{level = 10 : i32, message = "bqe,bke->bqk"}> : () -> ()
    %cst_32 = arith.constant dense<0.000000e+00> : vector<1x8x8xf32>
    %28 = tpu.matmul %25, %26, %cst_32 {dimension_numbers = #tpu.dot_dimension_numbers<[2], [2], [1], [1], [0, 0, 0, 1, 1, 1], [0], [0]>} : vector<1x8x16xf32>, vector<1x8x16xf32>, vector<1x8x8xf32> -> vector<1x8x8xf32>
    "tpu.trace_stop"() : () -> ()
    %cst_33 = arith.constant 2.500000e-01 : f32
    %29 = vector.broadcast %cst_33 : f32 to vector<1x8x8xf32>
    %30 = arith.mulf %28, %29 : vector<1x8x8xf32>
    %31 = vector.broadcast %1 : vector<1x1x8xf32> to vector<1x8x8xf32>
    %32 = arith.addf %30, %31 : vector<1x8x8xf32>
    %cst_34 = arith.constant dense<0xFF800000> : vector<1x8xf32>
    %33 = vector.multi_reduction <maximumf>, %32, %cst_34 [2] : vector<1x8x8xf32> to vector<1x8xf32>
    %34 = vector.shape_cast %33 : vector<1x8xf32> to vector<1x8x1xf32>
    %35 = vector.broadcast %34 : vector<1x8x1xf32> to vector<1x8x8xf32>
    %36 = arith.subf %32, %35 : vector<1x8x8xf32>
    %37 = math.exp %36 : vector<1x8x8xf32>
    %cst_35 = arith.constant dense<0.000000e+00> : vector<1x8xf32>
    %38 = vector.multi_reduction <add>, %37, %cst_35 [2] : vector<1x8x8xf32> to vector<1x8xf32>
    %39 = vector.shape_cast %38 : vector<1x8xf32> to vector<1x8x1xf32>
    %40 = vector.broadcast %39 : vector<1x8x1xf32> to vector<1x8x8xf32>
    %41 = arith.divf %37, %40 : vector<1x8x8xf32>
    "tpu.trace_start"() <{level = 10 : i32, message = "bqk,bke->bqe"}> : () -> ()
    %cst_36 = arith.constant dense<0.000000e+00> : vector<1x8x16xf32>
    %42 = tpu.matmul %41, %27, %cst_36 {dimension_numbers = #tpu.dot_dimension_numbers<[2], [1], [1], [2], [0, 0, 0, 1, 1, 2], [0], [0]>} : vector<1x8x8xf32>, vector<1x8x16xf32>, vector<1x8x16xf32> -> vector<1x8x16xf32>
    "tpu.trace_stop"() : () -> ()
    %43 = vector.shape_cast %42 : vector<1x8x16xf32> to vector<8x16xf32>
    %c0_37 = arith.constant 0 : index
    %c0_38 = arith.constant 0 : index
    %c0_39 = arith.constant 0 : index
    %c0_40 = arith.constant 0 : index
    %44 = vector.load %arg9[%c0_37, %c0_38, %c0_39, %c0_40] : memref<2x2x16x32xf32, #tpu.memory_space<vmem>>, vector<1x1x16x32xf32>
    %45 = vector.shape_cast %44 : vector<1x1x16x32xf32> to vector<16x32xf32>
    %cst_41 = arith.constant dense<0.000000e+00> : vector<8x32xf32>
    %46 = tpu.matmul %43, %45, %cst_41 {dimension_numbers = #tpu.dot_dimension_numbers<[1], [0], [0], [1], [0, 0, 1, 1], [], []>} : vector<8x16xf32>, vector<16x32xf32>, vector<8x32xf32> -> vector<8x32xf32>
    %47 = arith.addf %3, %46 : vector<8x32xf32>
    %c0_42 = arith.constant 0 : index
    %c1 = arith.constant 1 : index
    %c0_43 = arith.constant 0 : index
    %c0_44 = arith.constant 0 : index
    %48 = vector.load %arg3[%c0_42, %c1, %c0_43, %c0_44] : memref<2x2x32x16xf32, #tpu.memory_space<vmem>>, vector<1x1x32x16xf32>
    %49 = vector.shape_cast %48 : vector<1x1x32x16xf32> to vector<32x16xf32>
    %cst_45 = arith.constant dense<0.000000e+00> : vector<8x16xf32>
    %50 = tpu.matmul %2, %49, %cst_45 {dimension_numbers = #tpu.dot_dimension_numbers<[1], [0], [0], [1], [0, 0, 1, 1], [], []>} : vector<8x32xf32>, vector<32x16xf32>, vector<8x16xf32> -> vector<8x16xf32>
    %c0_46 = arith.constant 0 : index
    %c1_47 = arith.constant 1 : index
    %c0_48 = arith.constant 0 : index
    %c0_49 = arith.constant 0 : index
    %51 = vector.load %arg6[%c0_46, %c1_47, %c0_48, %c0_49] : memref<2x2x1x16xf32, #tpu.memory_space<vmem>>, vector<1x1x1x16xf32>
    %52 = vector.shape_cast %51 : vector<1x1x1x16xf32> to vector<1x16xf32>
    %53 = vector.broadcast %52 : vector<1x16xf32> to vector<8x16xf32>
    %54 = arith.addf %50, %53 : vector<8x16xf32>
    %c0_50 = arith.constant 0 : index
    %c1_51 = arith.constant 1 : index
    %c0_52 = arith.constant 0 : index
    %c0_53 = arith.constant 0 : index
    %55 = vector.load %arg4[%c0_50, %c1_51, %c0_52, %c0_53] : memref<2x2x32x16xf32, #tpu.memory_space<vmem>>, vector<1x1x32x16xf32>
    %56 = vector.shape_cast %55 : vector<1x1x32x16xf32> to vector<32x16xf32>
    %cst_54 = arith.constant dense<0.000000e+00> : vector<8x16xf32>
    %57 = tpu.matmul %2, %56, %cst_54 {dimension_numbers = #tpu.dot_dimension_numbers<[1], [0], [0], [1], [0, 0, 1, 1], [], []>} : vector<8x32xf32>, vector<32x16xf32>, vector<8x16xf32> -> vector<8x16xf32>
    %c0_55 = arith.constant 0 : index
    %c1_56 = arith.constant 1 : index
    %c0_57 = arith.constant 0 : index
    %c0_58 = arith.constant 0 : index
    %58 = vector.load %arg7[%c0_55, %c1_56, %c0_57, %c0_58] : memref<2x2x1x16xf32, #tpu.memory_space<vmem>>, vector<1x1x1x16xf32>
    %59 = vector.shape_cast %58 : vector<1x1x1x16xf32> to vector<1x16xf32>
    %60 = vector.broadcast %59 : vector<1x16xf32> to vector<8x16xf32>
    %61 = arith.addf %57, %60 : vector<8x16xf32>
    %c0_59 = arith.constant 0 : index
    %c1_60 = arith.constant 1 : index
    %c0_61 = arith.constant 0 : index
    %c0_62 = arith.constant 0 : index
    %62 = vector.load %arg5[%c0_59, %c1_60, %c0_61, %c0_62] : memref<2x2x32x16xf32, #tpu.memory_space<vmem>>, vector<1x1x32x16xf32>
    %63 = vector.shape_cast %62 : vector<1x1x32x16xf32> to vector<32x16xf32>
    %cst_63 = arith.constant dense<0.000000e+00> : vector<8x16xf32>
    %64 = tpu.matmul %2, %63, %cst_63 {dimension_numbers = #tpu.dot_dimension_numbers<[1], [0], [0], [1], [0, 0, 1, 1], [], []>} : vector<8x32xf32>, vector<32x16xf32>, vector<8x16xf32> -> vector<8x16xf32>
    %c0_64 = arith.constant 0 : index
    %c1_65 = arith.constant 1 : index
    %c0_66 = arith.constant 0 : index
    %c0_67 = arith.constant 0 : index
    %65 = vector.load %arg8[%c0_64, %c1_65, %c0_66, %c0_67] : memref<2x2x1x16xf32, #tpu.memory_space<vmem>>, vector<1x1x1x16xf32>
    %66 = vector.shape_cast %65 : vector<1x1x1x16xf32> to vector<1x16xf32>
    %67 = vector.broadcast %66 : vector<1x16xf32> to vector<8x16xf32>
    %68 = arith.addf %64, %67 : vector<8x16xf32>
    %69 = vector.shape_cast %54 : vector<8x16xf32> to vector<1x8x16xf32>
    %70 = vector.shape_cast %61 : vector<8x16xf32> to vector<1x8x16xf32>
    %71 = vector.shape_cast %68 : vector<8x16xf32> to vector<1x8x16xf32>
    "tpu.trace_start"() <{level = 10 : i32, message = "bqe,bke->bqk"}> : () -> ()
    %cst_68 = arith.constant dense<0.000000e+00> : vector<1x8x8xf32>
    %72 = tpu.matmul %69, %70, %cst_68 {dimension_numbers = #tpu.dot_dimension_numbers<[2], [2], [1], [1], [0, 0, 0, 1, 1, 1], [0], [0]>} : vector<1x8x16xf32>, vector<1x8x16xf32>, vector<1x8x8xf32> -> vector<1x8x8xf32>
    "tpu.trace_stop"() : () -> ()
    %cst_69 = arith.constant 2.500000e-01 : f32
    %73 = vector.broadcast %cst_69 : f32 to vector<1x8x8xf32>
    %74 = arith.mulf %72, %73 : vector<1x8x8xf32>
    %75 = vector.broadcast %1 : vector<1x1x8xf32> to vector<1x8x8xf32>
    %76 = arith.addf %74, %75 : vector<1x8x8xf32>
    %cst_70 = arith.constant dense<0xFF800000> : vector<1x8xf32>
    %77 = vector.multi_reduction <maximumf>, %76, %cst_70 [2] : vector<1x8x8xf32> to vector<1x8xf32>
    %78 = vector.shape_cast %77 : vector<1x8xf32> to vector<1x8x1xf32>
    %79 = vector.broadcast %78 : vector<1x8x1xf32> to vector<1x8x8xf32>
    %80 = arith.subf %76, %79 : vector<1x8x8xf32>
    %81 = math.exp %80 : vector<1x8x8xf32>
    %cst_71 = arith.constant dense<0.000000e+00> : vector<1x8xf32>
    %82 = vector.multi_reduction <add>, %81, %cst_71 [2] : vector<1x8x8xf32> to vector<1x8xf32>
    %83 = vector.shape_cast %82 : vector<1x8xf32> to vector<1x8x1xf32>
    %84 = vector.broadcast %83 : vector<1x8x1xf32> to vector<1x8x8xf32>
    %85 = arith.divf %81, %84 : vector<1x8x8xf32>
    "tpu.trace_start"() <{level = 10 : i32, message = "bqk,bke->bqe"}> : () -> ()
    %cst_72 = arith.constant dense<0.000000e+00> : vector<1x8x16xf32>
    %86 = tpu.matmul %85, %71, %cst_72 {dimension_numbers = #tpu.dot_dimension_numbers<[2], [1], [1], [2], [0, 0, 0, 1, 1, 2], [0], [0]>} : vector<1x8x8xf32>, vector<1x8x16xf32>, vector<1x8x16xf32> -> vector<1x8x16xf32>
    "tpu.trace_stop"() : () -> ()
    %87 = vector.shape_cast %86 : vector<1x8x16xf32> to vector<8x16xf32>
    %c0_73 = arith.constant 0 : index
    %c1_74 = arith.constant 1 : index
    %c0_75 = arith.constant 0 : index
    %c0_76 = arith.constant 0 : index
    %88 = vector.load %arg9[%c0_73, %c1_74, %c0_75, %c0_76] : memref<2x2x16x32xf32, #tpu.memory_space<vmem>>, vector<1x1x16x32xf32>
    %89 = vector.shape_cast %88 : vector<1x1x16x32xf32> to vector<16x32xf32>
    %cst_77 = arith.constant dense<0.000000e+00> : vector<8x32xf32>
    %90 = tpu.matmul %87, %89, %cst_77 {dimension_numbers = #tpu.dot_dimension_numbers<[1], [0], [0], [1], [0, 0, 1, 1], [], []>} : vector<8x16xf32>, vector<16x32xf32>, vector<8x32xf32> -> vector<8x32xf32>
    %91 = arith.addf %47, %90 : vector<8x32xf32>
    %c0_78 = arith.constant 0 : index
    %c0_79 = arith.constant 0 : index
    %c0_80 = arith.constant 0 : index
    %92 = vector.load %arg10[%c0_78, %c0_79, %c0_80] : memref<2x1x32xf32, #tpu.memory_space<vmem>>, vector<1x1x32xf32>
    %93 = vector.shape_cast %92 : vector<1x1x32xf32> to vector<1x32xf32>
    %94 = vector.broadcast %93 : vector<1x32xf32> to vector<8x32xf32>
    %95 = arith.addf %91, %94 : vector<8x32xf32>
    %96 = arith.addf %2, %95 : vector<8x32xf32>
    %c0_81 = arith.constant 0 : index
    %c0_82 = arith.constant 0 : index
    %c0_83 = arith.constant 0 : index
    %97 = vector.load %arg15[%c0_81, %c0_82, %c0_83] : memref<2x1x32xf32, #tpu.memory_space<vmem>>, vector<1x1x32xf32>
    %98 = vector.shape_cast %97 : vector<1x1x32xf32> to vector<1x32xf32>
    %c0_84 = arith.constant 0 : index
    %c0_85 = arith.constant 0 : index
    %c0_86 = arith.constant 0 : index
    %99 = vector.load %arg16[%c0_84, %c0_85, %c0_86] : memref<2x1x32xf32, #tpu.memory_space<vmem>>, vector<1x1x32xf32>
    %100 = vector.shape_cast %99 : vector<1x1x32xf32> to vector<1x32xf32>
    %cst_87 = arith.constant dense<0.000000e+00> : vector<8xf32>
    %101 = vector.multi_reduction <add>, %96, %cst_87 [1] : vector<8x32xf32> to vector<8xf32>
    %102 = vector.shape_cast %101 : vector<8xf32> to vector<8x1xf32>
    %cst_88 = arith.constant 3.200000e+01 : f32
    %103 = vector.broadcast %cst_88 : f32 to vector<8x1xf32>
    %104 = arith.divf %102, %103 : vector<8x1xf32>
    %105 = vector.broadcast %104 : vector<8x1xf32> to vector<8x32xf32>
    %106 = arith.subf %96, %105 : vector<8x32xf32>
    %107 = arith.mulf %106, %106 : vector<8x32xf32>
    %cst_89 = arith.constant dense<0.000000e+00> : vector<8xf32>
    %108 = vector.multi_reduction <add>, %107, %cst_89 [1] : vector<8x32xf32> to vector<8xf32>
    %109 = vector.shape_cast %108 : vector<8xf32> to vector<8x1xf32>
    %cst_90 = arith.constant 3.200000e+01 : f32
    %110 = vector.broadcast %cst_90 : f32 to vector<8x1xf32>
    %111 = arith.divf %109, %110 : vector<8x1xf32>
    %112 = vector.broadcast %104 : vector<8x1xf32> to vector<8x32xf32>
    %113 = arith.subf %96, %112 : vector<8x32xf32>
    %cst_91 = arith.constant 9.99999974E-6 : f32
    %114 = vector.broadcast %cst_91 : f32 to vector<8x1xf32>
    %115 = arith.addf %111, %114 : vector<8x1xf32>
    %116 = math.rsqrt %115 : vector<8x1xf32>
    %117 = vector.broadcast %116 : vector<8x1xf32> to vector<8x32xf32>
    %118 = arith.mulf %113, %117 : vector<8x32xf32>
    %119 = vector.broadcast %98 : vector<1x32xf32> to vector<8x32xf32>
    %120 = arith.mulf %118, %119 : vector<8x32xf32>
    %121 = vector.broadcast %100 : vector<1x32xf32> to vector<8x32xf32>
    %122 = arith.addf %120, %121 : vector<8x32xf32>
    %123 = arith.truncf %122 : vector<8x32xf32> to vector<8x32xbf16>
    %c0_92 = arith.constant 0 : index
    %c0_93 = arith.constant 0 : index
    %c0_94 = arith.constant 0 : index
    %124 = vector.load %arg11[%c0_92, %c0_93, %c0_94] : memref<2x32x2048xbf16, #tpu.memory_space<vmem>>, vector<1x32x2048xbf16>
    %125 = vector.shape_cast %124 : vector<1x32x2048xbf16> to vector<32x2048xbf16>
    %cst_95 = arith.constant dense<0.000000e+00> : vector<8x2048xf32>
    %126 = tpu.matmul %123, %125, %cst_95 {dimension_numbers = #tpu.dot_dimension_numbers<[1], [0], [0], [1], [0, 0, 1, 1], [], []>} : vector<8x32xbf16>, vector<32x2048xbf16>, vector<8x2048xf32> -> vector<8x2048xf32>
    %c0_96 = arith.constant 0 : index
    %c0_97 = arith.constant 0 : index
    %c0_98 = arith.constant 0 : index
    %127 = vector.load %arg12[%c0_96, %c0_97, %c0_98] : memref<2x1x2048xf32, #tpu.memory_space<vmem>>, vector<1x1x2048xf32>
    %128 = vector.shape_cast %127 : vector<1x1x2048xf32> to vector<1x2048xf32>
    %129 = vector.broadcast %128 : vector<1x2048xf32> to vector<8x2048xf32>
    %130 = arith.addf %126, %129 : vector<8x2048xf32>
    %cst_99 = arith.constant 0.000000e+00 : f32
    %131 = vector.broadcast %cst_99 : f32 to vector<8x2048xf32>
    %132 = arith.maximumf %130, %131 : vector<8x2048xf32>
    %133 = arith.truncf %132 : vector<8x2048xf32> to vector<8x2048xbf16>
    %c0_100 = arith.constant 0 : index
    %c0_101 = arith.constant 0 : index
    %c0_102 = arith.constant 0 : index
    %134 = vector.load %arg13[%c0_100, %c0_101, %c0_102] : memref<2x2048x32xbf16, #tpu.memory_space<vmem>>, vector<1x2048x32xbf16>
    %135 = vector.shape_cast %134 : vector<1x2048x32xbf16> to vector<2048x32xbf16>
    %cst_103 = arith.constant dense<0.000000e+00> : vector<8x32xf32>
    %136 = tpu.matmul %133, %135, %cst_103 {dimension_numbers = #tpu.dot_dimension_numbers<[1], [0], [0], [1], [0, 0, 1, 1], [], []>} : vector<8x2048xbf16>, vector<2048x32xbf16>, vector<8x32xf32> -> vector<8x32xf32>
    %c0_104 = arith.constant 0 : index
    %c0_105 = arith.constant 0 : index
    %c0_106 = arith.constant 0 : index
    %137 = vector.load %arg14[%c0_104, %c0_105, %c0_106] : memref<2x1x32xf32, #tpu.memory_space<vmem>>, vector<1x1x32xf32>
    %138 = vector.shape_cast %137 : vector<1x1x32xf32> to vector<1x32xf32>
    %139 = vector.broadcast %138 : vector<1x32xf32> to vector<8x32xf32>
    %140 = arith.addf %136, %139 : vector<8x32xf32>
    %141 = arith.addf %122, %140 : vector<8x32xf32>
    %c0_107 = arith.constant 0 : index
    %c0_108 = arith.constant 0 : index
    %c0_109 = arith.constant 0 : index
    %142 = vector.load %arg17[%c0_107, %c0_108, %c0_109] : memref<2x1x32xf32, #tpu.memory_space<vmem>>, vector<1x1x32xf32>
    %143 = vector.shape_cast %142 : vector<1x1x32xf32> to vector<1x32xf32>
    %c0_110 = arith.constant 0 : index
    %c0_111 = arith.constant 0 : index
    %c0_112 = arith.constant 0 : index
    %144 = vector.load %arg18[%c0_110, %c0_111, %c0_112] : memref<2x1x32xf32, #tpu.memory_space<vmem>>, vector<1x1x32xf32>
    %145 = vector.shape_cast %144 : vector<1x1x32xf32> to vector<1x32xf32>
    %cst_113 = arith.constant dense<0.000000e+00> : vector<8xf32>
    %146 = vector.multi_reduction <add>, %141, %cst_113 [1] : vector<8x32xf32> to vector<8xf32>
    %147 = vector.shape_cast %146 : vector<8xf32> to vector<8x1xf32>
    %cst_114 = arith.constant 3.200000e+01 : f32
    %148 = vector.broadcast %cst_114 : f32 to vector<8x1xf32>
    %149 = arith.divf %147, %148 : vector<8x1xf32>
    %150 = vector.broadcast %149 : vector<8x1xf32> to vector<8x32xf32>
    %151 = arith.subf %141, %150 : vector<8x32xf32>
    %152 = arith.mulf %151, %151 : vector<8x32xf32>
    %cst_115 = arith.constant dense<0.000000e+00> : vector<8xf32>
    %153 = vector.multi_reduction <add>, %152, %cst_115 [1] : vector<8x32xf32> to vector<8xf32>
    %154 = vector.shape_cast %153 : vector<8xf32> to vector<8x1xf32>
    %cst_116 = arith.constant 3.200000e+01 : f32
    %155 = vector.broadcast %cst_116 : f32 to vector<8x1xf32>
    %156 = arith.divf %154, %155 : vector<8x1xf32>
    %157 = vector.broadcast %149 : vector<8x1xf32> to vector<8x32xf32>
    %158 = arith.subf %141, %157 : vector<8x32xf32>
    %cst_117 = arith.constant 9.99999974E-6 : f32
    %159 = vector.broadcast %cst_117 : f32 to vector<8x1xf32>
    %160 = arith.addf %156, %159 : vector<8x1xf32>
    %161 = math.rsqrt %160 : vector<8x1xf32>
    %162 = vector.broadcast %161 : vector<8x1xf32> to vector<8x32xf32>
    %163 = arith.mulf %158, %162 : vector<8x32xf32>
    %164 = vector.broadcast %143 : vector<1x32xf32> to vector<8x32xf32>
    %165 = arith.mulf %163, %164 : vector<8x32xf32>
    %166 = vector.broadcast %145 : vector<1x32xf32> to vector<8x32xf32>
    %167 = arith.addf %165, %166 : vector<8x32xf32>
    %cst_118 = arith.constant 0.000000e+00 : f32
    %168 = vector.broadcast %cst_118 : f32 to vector<8x32xf32>
    %c1_119 = arith.constant 1 : index
    %c0_120 = arith.constant 0 : index
    %c0_121 = arith.constant 0 : index
    %c0_122 = arith.constant 0 : index
    %169 = vector.load %arg3[%c1_119, %c0_120, %c0_121, %c0_122] : memref<2x2x32x16xf32, #tpu.memory_space<vmem>>, vector<1x1x32x16xf32>
    %170 = vector.shape_cast %169 : vector<1x1x32x16xf32> to vector<32x16xf32>
    %cst_123 = arith.constant dense<0.000000e+00> : vector<8x16xf32>
    %171 = tpu.matmul %167, %170, %cst_123 {dimension_numbers = #tpu.dot_dimension_numbers<[1], [0], [0], [1], [0, 0, 1, 1], [], []>} : vector<8x32xf32>, vector<32x16xf32>, vector<8x16xf32> -> vector<8x16xf32>
    %c1_124 = arith.constant 1 : index
    %c0_125 = arith.constant 0 : index
    %c0_126 = arith.constant 0 : index
    %c0_127 = arith.constant 0 : index
    %172 = vector.load %arg6[%c1_124, %c0_125, %c0_126, %c0_127] : memref<2x2x1x16xf32, #tpu.memory_space<vmem>>, vector<1x1x1x16xf32>
    %173 = vector.shape_cast %172 : vector<1x1x1x16xf32> to vector<1x16xf32>
    %174 = vector.broadcast %173 : vector<1x16xf32> to vector<8x16xf32>
    %175 = arith.addf %171, %174 : vector<8x16xf32>
    %c1_128 = arith.constant 1 : index
    %c0_129 = arith.constant 0 : index
    %c0_130 = arith.constant 0 : index
    %c0_131 = arith.constant 0 : index
    %176 = vector.load %arg4[%c1_128, %c0_129, %c0_130, %c0_131] : memref<2x2x32x16xf32, #tpu.memory_space<vmem>>, vector<1x1x32x16xf32>
    %177 = vector.shape_cast %176 : vector<1x1x32x16xf32> to vector<32x16xf32>
    %cst_132 = arith.constant dense<0.000000e+00> : vector<8x16xf32>
    %178 = tpu.matmul %167, %177, %cst_132 {dimension_numbers = #tpu.dot_dimension_numbers<[1], [0], [0], [1], [0, 0, 1, 1], [], []>} : vector<8x32xf32>, vector<32x16xf32>, vector<8x16xf32> -> vector<8x16xf32>
    %c1_133 = arith.constant 1 : index
    %c0_134 = arith.constant 0 : index
    %c0_135 = arith.constant 0 : index
    %c0_136 = arith.constant 0 : index
    %179 = vector.load %arg7[%c1_133, %c0_134, %c0_135, %c0_136] : memref<2x2x1x16xf32, #tpu.memory_space<vmem>>, vector<1x1x1x16xf32>
    %180 = vector.shape_cast %179 : vector<1x1x1x16xf32> to vector<1x16xf32>
    %181 = vector.broadcast %180 : vector<1x16xf32> to vector<8x16xf32>
    %182 = arith.addf %178, %181 : vector<8x16xf32>
    %c1_137 = arith.constant 1 : index
    %c0_138 = arith.constant 0 : index
    %c0_139 = arith.constant 0 : index
    %c0_140 = arith.constant 0 : index
    %183 = vector.load %arg5[%c1_137, %c0_138, %c0_139, %c0_140] : memref<2x2x32x16xf32, #tpu.memory_space<vmem>>, vector<1x1x32x16xf32>
    %184 = vector.shape_cast %183 : vector<1x1x32x16xf32> to vector<32x16xf32>
    %cst_141 = arith.constant dense<0.000000e+00> : vector<8x16xf32>
    %185 = tpu.matmul %167, %184, %cst_141 {dimension_numbers = #tpu.dot_dimension_numbers<[1], [0], [0], [1], [0, 0, 1, 1], [], []>} : vector<8x32xf32>, vector<32x16xf32>, vector<8x16xf32> -> vector<8x16xf32>
    %c1_142 = arith.constant 1 : index
    %c0_143 = arith.constant 0 : index
    %c0_144 = arith.constant 0 : index
    %c0_145 = arith.constant 0 : index
    %186 = vector.load %arg8[%c1_142, %c0_143, %c0_144, %c0_145] : memref<2x2x1x16xf32, #tpu.memory_space<vmem>>, vector<1x1x1x16xf32>
    %187 = vector.shape_cast %186 : vector<1x1x1x16xf32> to vector<1x16xf32>
    %188 = vector.broadcast %187 : vector<1x16xf32> to vector<8x16xf32>
    %189 = arith.addf %185, %188 : vector<8x16xf32>
    %190 = vector.shape_cast %175 : vector<8x16xf32> to vector<1x8x16xf32>
    %191 = vector.shape_cast %182 : vector<8x16xf32> to vector<1x8x16xf32>
    %192 = vector.shape_cast %189 : vector<8x16xf32> to vector<1x8x16xf32>
    "tpu.trace_start"() <{level = 10 : i32, message = "bqe,bke->bqk"}> : () -> ()
    %cst_146 = arith.constant dense<0.000000e+00> : vector<1x8x8xf32>
    %193 = tpu.matmul %190, %191, %cst_146 {dimension_numbers = #tpu.dot_dimension_numbers<[2], [2], [1], [1], [0, 0, 0, 1, 1, 1], [0], [0]>} : vector<1x8x16xf32>, vector<1x8x16xf32>, vector<1x8x8xf32> -> vector<1x8x8xf32>
    "tpu.trace_stop"() : () -> ()
    %cst_147 = arith.constant 2.500000e-01 : f32
    %194 = vector.broadcast %cst_147 : f32 to vector<1x8x8xf32>
    %195 = arith.mulf %193, %194 : vector<1x8x8xf32>
    %196 = vector.broadcast %1 : vector<1x1x8xf32> to vector<1x8x8xf32>
    %197 = arith.addf %195, %196 : vector<1x8x8xf32>
    %cst_148 = arith.constant dense<0xFF800000> : vector<1x8xf32>
    %198 = vector.multi_reduction <maximumf>, %197, %cst_148 [2] : vector<1x8x8xf32> to vector<1x8xf32>
    %199 = vector.shape_cast %198 : vector<1x8xf32> to vector<1x8x1xf32>
    %200 = vector.broadcast %199 : vector<1x8x1xf32> to vector<1x8x8xf32>
    %201 = arith.subf %197, %200 : vector<1x8x8xf32>
    %202 = math.exp %201 : vector<1x8x8xf32>
    %cst_149 = arith.constant dense<0.000000e+00> : vector<1x8xf32>
    %203 = vector.multi_reduction <add>, %202, %cst_149 [2] : vector<1x8x8xf32> to vector<1x8xf32>
    %204 = vector.shape_cast %203 : vector<1x8xf32> to vector<1x8x1xf32>
    %205 = vector.broadcast %204 : vector<1x8x1xf32> to vector<1x8x8xf32>
    %206 = arith.divf %202, %205 : vector<1x8x8xf32>
    "tpu.trace_start"() <{level = 10 : i32, message = "bqk,bke->bqe"}> : () -> ()
    %cst_150 = arith.constant dense<0.000000e+00> : vector<1x8x16xf32>
    %207 = tpu.matmul %206, %192, %cst_150 {dimension_numbers = #tpu.dot_dimension_numbers<[2], [1], [1], [2], [0, 0, 0, 1, 1, 2], [0], [0]>} : vector<1x8x8xf32>, vector<1x8x16xf32>, vector<1x8x16xf32> -> vector<1x8x16xf32>
    "tpu.trace_stop"() : () -> ()
    %208 = vector.shape_cast %207 : vector<1x8x16xf32> to vector<8x16xf32>
    %c1_151 = arith.constant 1 : index
    %c0_152 = arith.constant 0 : index
    %c0_153 = arith.constant 0 : index
    %c0_154 = arith.constant 0 : index
    %209 = vector.load %arg9[%c1_151, %c0_152, %c0_153, %c0_154] : memref<2x2x16x32xf32, #tpu.memory_space<vmem>>, vector<1x1x16x32xf32>
    %210 = vector.shape_cast %209 : vector<1x1x16x32xf32> to vector<16x32xf32>
    %cst_155 = arith.constant dense<0.000000e+00> : vector<8x32xf32>
    %211 = tpu.matmul %208, %210, %cst_155 {dimension_numbers = #tpu.dot_dimension_numbers<[1], [0], [0], [1], [0, 0, 1, 1], [], []>} : vector<8x16xf32>, vector<16x32xf32>, vector<8x32xf32> -> vector<8x32xf32>
    %212 = arith.addf %168, %211 : vector<8x32xf32>
    %c1_156 = arith.constant 1 : index
    %c1_157 = arith.constant 1 : index
    %c0_158 = arith.constant 0 : index
    %c0_159 = arith.constant 0 : index
    %213 = vector.load %arg3[%c1_156, %c1_157, %c0_158, %c0_159] : memref<2x2x32x16xf32, #tpu.memory_space<vmem>>, vector<1x1x32x16xf32>
    %214 = vector.shape_cast %213 : vector<1x1x32x16xf32> to vector<32x16xf32>
    %cst_160 = arith.constant dense<0.000000e+00> : vector<8x16xf32>
    %215 = tpu.matmul %167, %214, %cst_160 {dimension_numbers = #tpu.dot_dimension_numbers<[1], [0], [0], [1], [0, 0, 1, 1], [], []>} : vector<8x32xf32>, vector<32x16xf32>, vector<8x16xf32> -> vector<8x16xf32>
    %c1_161 = arith.constant 1 : index
    %c1_162 = arith.constant 1 : index
    %c0_163 = arith.constant 0 : index
    %c0_164 = arith.constant 0 : index
    %216 = vector.load %arg6[%c1_161, %c1_162, %c0_163, %c0_164] : memref<2x2x1x16xf32, #tpu.memory_space<vmem>>, vector<1x1x1x16xf32>
    %217 = vector.shape_cast %216 : vector<1x1x1x16xf32> to vector<1x16xf32>
    %218 = vector.broadcast %217 : vector<1x16xf32> to vector<8x16xf32>
    %219 = arith.addf %215, %218 : vector<8x16xf32>
    %c1_165 = arith.constant 1 : index
    %c1_166 = arith.constant 1 : index
    %c0_167 = arith.constant 0 : index
    %c0_168 = arith.constant 0 : index
    %220 = vector.load %arg4[%c1_165, %c1_166, %c0_167, %c0_168] : memref<2x2x32x16xf32, #tpu.memory_space<vmem>>, vector<1x1x32x16xf32>
    %221 = vector.shape_cast %220 : vector<1x1x32x16xf32> to vector<32x16xf32>
    %cst_169 = arith.constant dense<0.000000e+00> : vector<8x16xf32>
    %222 = tpu.matmul %167, %221, %cst_169 {dimension_numbers = #tpu.dot_dimension_numbers<[1], [0], [0], [1], [0, 0, 1, 1], [], []>} : vector<8x32xf32>, vector<32x16xf32>, vector<8x16xf32> -> vector<8x16xf32>
    %c1_170 = arith.constant 1 : index
    %c1_171 = arith.constant 1 : index
    %c0_172 = arith.constant 0 : index
    %c0_173 = arith.constant 0 : index
    %223 = vector.load %arg7[%c1_170, %c1_171, %c0_172, %c0_173] : memref<2x2x1x16xf32, #tpu.memory_space<vmem>>, vector<1x1x1x16xf32>
    %224 = vector.shape_cast %223 : vector<1x1x1x16xf32> to vector<1x16xf32>
    %225 = vector.broadcast %224 : vector<1x16xf32> to vector<8x16xf32>
    %226 = arith.addf %222, %225 : vector<8x16xf32>
    %c1_174 = arith.constant 1 : index
    %c1_175 = arith.constant 1 : index
    %c0_176 = arith.constant 0 : index
    %c0_177 = arith.constant 0 : index
    %227 = vector.load %arg5[%c1_174, %c1_175, %c0_176, %c0_177] : memref<2x2x32x16xf32, #tpu.memory_space<vmem>>, vector<1x1x32x16xf32>
    %228 = vector.shape_cast %227 : vector<1x1x32x16xf32> to vector<32x16xf32>
    %cst_178 = arith.constant dense<0.000000e+00> : vector<8x16xf32>
    %229 = tpu.matmul %167, %228, %cst_178 {dimension_numbers = #tpu.dot_dimension_numbers<[1], [0], [0], [1], [0, 0, 1, 1], [], []>} : vector<8x32xf32>, vector<32x16xf32>, vector<8x16xf32> -> vector<8x16xf32>
    %c1_179 = arith.constant 1 : index
    %c1_180 = arith.constant 1 : index
    %c0_181 = arith.constant 0 : index
    %c0_182 = arith.constant 0 : index
    %230 = vector.load %arg8[%c1_179, %c1_180, %c0_181, %c0_182] : memref<2x2x1x16xf32, #tpu.memory_space<vmem>>, vector<1x1x1x16xf32>
    %231 = vector.shape_cast %230 : vector<1x1x1x16xf32> to vector<1x16xf32>
    %232 = vector.broadcast %231 : vector<1x16xf32> to vector<8x16xf32>
    %233 = arith.addf %229, %232 : vector<8x16xf32>
    %234 = vector.shape_cast %219 : vector<8x16xf32> to vector<1x8x16xf32>
    %235 = vector.shape_cast %226 : vector<8x16xf32> to vector<1x8x16xf32>
    %236 = vector.shape_cast %233 : vector<8x16xf32> to vector<1x8x16xf32>
    "tpu.trace_start"() <{level = 10 : i32, message = "bqe,bke->bqk"}> : () -> ()
    %cst_183 = arith.constant dense<0.000000e+00> : vector<1x8x8xf32>
    %237 = tpu.matmul %234, %235, %cst_183 {dimension_numbers = #tpu.dot_dimension_numbers<[2], [2], [1], [1], [0, 0, 0, 1, 1, 1], [0], [0]>} : vector<1x8x16xf32>, vector<1x8x16xf32>, vector<1x8x8xf32> -> vector<1x8x8xf32>
    "tpu.trace_stop"() : () -> ()
    %cst_184 = arith.constant 2.500000e-01 : f32
    %238 = vector.broadcast %cst_184 : f32 to vector<1x8x8xf32>
    %239 = arith.mulf %237, %238 : vector<1x8x8xf32>
    %240 = vector.broadcast %1 : vector<1x1x8xf32> to vector<1x8x8xf32>
    %241 = arith.addf %239, %240 : vector<1x8x8xf32>
    %cst_185 = arith.constant dense<0xFF800000> : vector<1x8xf32>
    %242 = vector.multi_reduction <maximumf>, %241, %cst_185 [2] : vector<1x8x8xf32> to vector<1x8xf32>
    %243 = vector.shape_cast %242 : vector<1x8xf32> to vector<1x8x1xf32>
    %244 = vector.broadcast %243 : vector<1x8x1xf32> to vector<1x8x8xf32>
    %245 = arith.subf %241, %244 : vector<1x8x8xf32>
    %246 = math.exp %245 : vector<1x8x8xf32>
    %cst_186 = arith.constant dense<0.000000e+00> : vector<1x8xf32>
    %247 = vector.multi_reduction <add>, %246, %cst_186 [2] : vector<1x8x8xf32> to vector<1x8xf32>
    %248 = vector.shape_cast %247 : vector<1x8xf32> to vector<1x8x1xf32>
    %249 = vector.broadcast %248 : vector<1x8x1xf32> to vector<1x8x8xf32>
    %250 = arith.divf %246, %249 : vector<1x8x8xf32>
    "tpu.trace_start"() <{level = 10 : i32, message = "bqk,bke->bqe"}> : () -> ()
    %cst_187 = arith.constant dense<0.000000e+00> : vector<1x8x16xf32>
    %251 = tpu.matmul %250, %236, %cst_187 {dimension_numbers = #tpu.dot_dimension_numbers<[2], [1], [1], [2], [0, 0, 0, 1, 1, 2], [0], [0]>} : vector<1x8x8xf32>, vector<1x8x16xf32>, vector<1x8x16xf32> -> vector<1x8x16xf32>
    "tpu.trace_stop"() : () -> ()
    %252 = vector.shape_cast %251 : vector<1x8x16xf32> to vector<8x16xf32>
    %c1_188 = arith.constant 1 : index
    %c1_189 = arith.constant 1 : index
    %c0_190 = arith.constant 0 : index
    %c0_191 = arith.constant 0 : index
    %253 = vector.load %arg9[%c1_188, %c1_189, %c0_190, %c0_191] : memref<2x2x16x32xf32, #tpu.memory_space<vmem>>, vector<1x1x16x32xf32>
    %254 = vector.shape_cast %253 : vector<1x1x16x32xf32> to vector<16x32xf32>
    %cst_192 = arith.constant dense<0.000000e+00> : vector<8x32xf32>
    %255 = tpu.matmul %252, %254, %cst_192 {dimension_numbers = #tpu.dot_dimension_numbers<[1], [0], [0], [1], [0, 0, 1, 1], [], []>} : vector<8x16xf32>, vector<16x32xf32>, vector<8x32xf32> -> vector<8x32xf32>
    %256 = arith.addf %212, %255 : vector<8x32xf32>
    %c1_193 = arith.constant 1 : index
    %c0_194 = arith.constant 0 : index
    %c0_195 = arith.constant 0 : index
    %257 = vector.load %arg10[%c1_193, %c0_194, %c0_195] : memref<2x1x32xf32, #tpu.memory_space<vmem>>, vector<1x1x32xf32>
    %258 = vector.shape_cast %257 : vector<1x1x32xf32> to vector<1x32xf32>
    %259 = vector.broadcast %258 : vector<1x32xf32> to vector<8x32xf32>
    %260 = arith.addf %256, %259 : vector<8x32xf32>
    %261 = arith.addf %167, %260 : vector<8x32xf32>
    %c1_196 = arith.constant 1 : index
    %c0_197 = arith.constant 0 : index
    %c0_198 = arith.constant 0 : index
    %262 = vector.load %arg15[%c1_196, %c0_197, %c0_198] : memref<2x1x32xf32, #tpu.memory_space<vmem>>, vector<1x1x32xf32>
    %263 = vector.shape_cast %262 : vector<1x1x32xf32> to vector<1x32xf32>
    %c1_199 = arith.constant 1 : index
    %c0_200 = arith.constant 0 : index
    %c0_201 = arith.constant 0 : index
    %264 = vector.load %arg16[%c1_199, %c0_200, %c0_201] : memref<2x1x32xf32, #tpu.memory_space<vmem>>, vector<1x1x32xf32>
    %265 = vector.shape_cast %264 : vector<1x1x32xf32> to vector<1x32xf32>
    %cst_202 = arith.constant dense<0.000000e+00> : vector<8xf32>
    %266 = vector.multi_reduction <add>, %261, %cst_202 [1] : vector<8x32xf32> to vector<8xf32>
    %267 = vector.shape_cast %266 : vector<8xf32> to vector<8x1xf32>
    %cst_203 = arith.constant 3.200000e+01 : f32
    %268 = vector.broadcast %cst_203 : f32 to vector<8x1xf32>
    %269 = arith.divf %267, %268 : vector<8x1xf32>
    %270 = vector.broadcast %269 : vector<8x1xf32> to vector<8x32xf32>
    %271 = arith.subf %261, %270 : vector<8x32xf32>
    %272 = arith.mulf %271, %271 : vector<8x32xf32>
    %cst_204 = arith.constant dense<0.000000e+00> : vector<8xf32>
    %273 = vector.multi_reduction <add>, %272, %cst_204 [1] : vector<8x32xf32> to vector<8xf32>
    %274 = vector.shape_cast %273 : vector<8xf32> to vector<8x1xf32>
    %cst_205 = arith.constant 3.200000e+01 : f32
    %275 = vector.broadcast %cst_205 : f32 to vector<8x1xf32>
    %276 = arith.divf %274, %275 : vector<8x1xf32>
    %277 = vector.broadcast %269 : vector<8x1xf32> to vector<8x32xf32>
    %278 = arith.subf %261, %277 : vector<8x32xf32>
    %cst_206 = arith.constant 9.99999974E-6 : f32
    %279 = vector.broadcast %cst_206 : f32 to vector<8x1xf32>
    %280 = arith.addf %276, %279 : vector<8x1xf32>
    %281 = math.rsqrt %280 : vector<8x1xf32>
    %282 = vector.broadcast %281 : vector<8x1xf32> to vector<8x32xf32>
    %283 = arith.mulf %278, %282 : vector<8x32xf32>
    %284 = vector.broadcast %263 : vector<1x32xf32> to vector<8x32xf32>
    %285 = arith.mulf %283, %284 : vector<8x32xf32>
    %286 = vector.broadcast %265 : vector<1x32xf32> to vector<8x32xf32>
    %287 = arith.addf %285, %286 : vector<8x32xf32>
    %288 = arith.truncf %287 : vector<8x32xf32> to vector<8x32xbf16>
    %c1_207 = arith.constant 1 : index
    %c0_208 = arith.constant 0 : index
    %c0_209 = arith.constant 0 : index
    %289 = vector.load %arg11[%c1_207, %c0_208, %c0_209] : memref<2x32x2048xbf16, #tpu.memory_space<vmem>>, vector<1x32x2048xbf16>
    %290 = vector.shape_cast %289 : vector<1x32x2048xbf16> to vector<32x2048xbf16>
    %cst_210 = arith.constant dense<0.000000e+00> : vector<8x2048xf32>
    %291 = tpu.matmul %288, %290, %cst_210 {dimension_numbers = #tpu.dot_dimension_numbers<[1], [0], [0], [1], [0, 0, 1, 1], [], []>} : vector<8x32xbf16>, vector<32x2048xbf16>, vector<8x2048xf32> -> vector<8x2048xf32>
    %c1_211 = arith.constant 1 : index
    %c0_212 = arith.constant 0 : index
    %c0_213 = arith.constant 0 : index
    %292 = vector.load %arg12[%c1_211, %c0_212, %c0_213] : memref<2x1x2048xf32, #tpu.memory_space<vmem>>, vector<1x1x2048xf32>
    %293 = vector.shape_cast %292 : vector<1x1x2048xf32> to vector<1x2048xf32>
    %294 = vector.broadcast %293 : vector<1x2048xf32> to vector<8x2048xf32>
    %295 = arith.addf %291, %294 : vector<8x2048xf32>
    %cst_214 = arith.constant 0.000000e+00 : f32
    %296 = vector.broadcast %cst_214 : f32 to vector<8x2048xf32>
    %297 = arith.maximumf %295, %296 : vector<8x2048xf32>
    %298 = arith.truncf %297 : vector<8x2048xf32> to vector<8x2048xbf16>
    %c1_215 = arith.constant 1 : index
    %c0_216 = arith.constant 0 : index
    %c0_217 = arith.constant 0 : index
    %299 = vector.load %arg13[%c1_215, %c0_216, %c0_217] : memref<2x2048x32xbf16, #tpu.memory_space<vmem>>, vector<1x2048x32xbf16>
    %300 = vector.shape_cast %299 : vector<1x2048x32xbf16> to vector<2048x32xbf16>
    %cst_218 = arith.constant dense<0.000000e+00> : vector<8x32xf32>
    %301 = tpu.matmul %298, %300, %cst_218 {dimension_numbers = #tpu.dot_dimension_numbers<[1], [0], [0], [1], [0, 0, 1, 1], [], []>} : vector<8x2048xbf16>, vector<2048x32xbf16>, vector<8x32xf32> -> vector<8x32xf32>
    %c1_219 = arith.constant 1 : index
    %c0_220 = arith.constant 0 : index
    %c0_221 = arith.constant 0 : index
    %302 = vector.load %arg14[%c1_219, %c0_220, %c0_221] : memref<2x1x32xf32, #tpu.memory_space<vmem>>, vector<1x1x32xf32>
    %303 = vector.shape_cast %302 : vector<1x1x32xf32> to vector<1x32xf32>
    %304 = vector.broadcast %303 : vector<1x32xf32> to vector<8x32xf32>
    %305 = arith.addf %301, %304 : vector<8x32xf32>
    %306 = arith.addf %287, %305 : vector<8x32xf32>
    %c1_222 = arith.constant 1 : index
    %c0_223 = arith.constant 0 : index
    %c0_224 = arith.constant 0 : index
    %307 = vector.load %arg17[%c1_222, %c0_223, %c0_224] : memref<2x1x32xf32, #tpu.memory_space<vmem>>, vector<1x1x32xf32>
    %308 = vector.shape_cast %307 : vector<1x1x32xf32> to vector<1x32xf32>
    %c1_225 = arith.constant 1 : index
    %c0_226 = arith.constant 0 : index
    %c0_227 = arith.constant 0 : index
    %309 = vector.load %arg18[%c1_225, %c0_226, %c0_227] : memref<2x1x32xf32, #tpu.memory_space<vmem>>, vector<1x1x32xf32>
    %310 = vector.shape_cast %309 : vector<1x1x32xf32> to vector<1x32xf32>
    %cst_228 = arith.constant dense<0.000000e+00> : vector<8xf32>
    %311 = vector.multi_reduction <add>, %306, %cst_228 [1] : vector<8x32xf32> to vector<8xf32>
    %312 = vector.shape_cast %311 : vector<8xf32> to vector<8x1xf32>
    %cst_229 = arith.constant 3.200000e+01 : f32
    %313 = vector.broadcast %cst_229 : f32 to vector<8x1xf32>
    %314 = arith.divf %312, %313 : vector<8x1xf32>
    %315 = vector.broadcast %314 : vector<8x1xf32> to vector<8x32xf32>
    %316 = arith.subf %306, %315 : vector<8x32xf32>
    %317 = arith.mulf %316, %316 : vector<8x32xf32>
    %cst_230 = arith.constant dense<0.000000e+00> : vector<8xf32>
    %318 = vector.multi_reduction <add>, %317, %cst_230 [1] : vector<8x32xf32> to vector<8xf32>
    %319 = vector.shape_cast %318 : vector<8xf32> to vector<8x1xf32>
    %cst_231 = arith.constant 3.200000e+01 : f32
    %320 = vector.broadcast %cst_231 : f32 to vector<8x1xf32>
    %321 = arith.divf %319, %320 : vector<8x1xf32>
    %322 = vector.broadcast %314 : vector<8x1xf32> to vector<8x32xf32>
    %323 = arith.subf %306, %322 : vector<8x32xf32>
    %cst_232 = arith.constant 9.99999974E-6 : f32
    %324 = vector.broadcast %cst_232 : f32 to vector<8x1xf32>
    %325 = arith.addf %321, %324 : vector<8x1xf32>
    %326 = math.rsqrt %325 : vector<8x1xf32>
    %327 = vector.broadcast %326 : vector<8x1xf32> to vector<8x32xf32>
    %328 = arith.mulf %323, %327 : vector<8x32xf32>
    %329 = vector.broadcast %308 : vector<1x32xf32> to vector<8x32xf32>
    %330 = arith.mulf %328, %329 : vector<8x32xf32>
    %331 = vector.broadcast %310 : vector<1x32xf32> to vector<8x32xf32>
    %332 = arith.addf %330, %331 : vector<8x32xf32>
    %333 = vector.shape_cast %332 : vector<8x32xf32> to vector<1x8x32xf32>
    %334 = vector.extract_strided_slice %333 {offsets = [0, 7, 0], sizes = [1, 1, 32], strides = [1, 1, 1]} : vector<1x8x32xf32> to vector<1x1x32xf32>
    %335 = vector.shape_cast %334 : vector<1x1x32xf32> to vector<1x32xf32>
    %336 = arith.truncf %335 : vector<1x32xf32> to vector<1x32xbf16>
    %c0_233 = arith.constant 0 : index
    %c0_234 = arith.constant 0 : index
    %337 = vector.load %arg19[%c0_233, %c0_234] : memref<32x512xbf16, #tpu.memory_space<vmem>>, vector<32x512xbf16>
    %cst_235 = arith.constant dense<0.000000e+00> : vector<1x512xf32>
    %338 = tpu.matmul %336, %337, %cst_235 {dimension_numbers = #tpu.dot_dimension_numbers<[1], [0], [0], [1], [0, 0, 1, 1], [], []>} : vector<1x32xbf16>, vector<32x512xbf16>, vector<1x512xf32> -> vector<1x512xf32>
    %339 = vector.shape_cast %338 : vector<1x512xf32> to vector<1x1x512xf32>
    %c0_236 = arith.constant 0 : index
    %c0_237 = arith.constant 0 : index
    %c0_238 = arith.constant 0 : index
    %340 = vector.load %arg20[%c0_236, %c0_237, %c0_238] : memref<1x1x512xf32, #tpu.memory_space<vmem>>, vector<1x1x512xf32>
    tpu.vector_store %arg20[%c0_236, %c0_237, %c0_238], %339 {strides = array<i32>} : memref<1x1x512xf32, #tpu.memory_space<vmem>>, vector<1x1x512xf32>,
    return
  }
  func.func @transform_0(%arg0: i32) -> (i32, i32, i32) {
    %c0_i32 = arith.constant 0 : i32
    %c0_i32_0 = arith.constant 0 : i32
    %c0_i32_1 = arith.constant 0 : i32
    return %arg0, %c0_i32, %c0_i32_0 : i32, i32, i32
  }
  func.func @transform_1(%arg0: i32) -> (i32, i32, i32) {
    %c0_i32 = arith.constant 0 : i32
    %c0_i32_0 = arith.constant 0 : i32
    %c0_i32_1 = arith.constant 0 : i32
    return %arg0, %c0_i32, %c0_i32_0 : i32, i32, i32
  }
  func.func @transform_2(%arg0: i32) -> (i32, i32, i32, i32) {
    %c0_i32 = arith.constant 0 : i32
    %c0_i32_0 = arith.constant 0 : i32
    %c0_i32_1 = arith.constant 0 : i32
    %c0_i32_2 = arith.constant 0 : i32
    %c0_i32_3 = arith.constant 0 : i32
    return %c0_i32, %c0_i32_0, %c0_i32_1, %c0_i32_2 : i32, i32, i32, i32
  }
  func.func @transform_3(%arg0: i32) -> (i32, i32, i32, i32) {
    %c0_i32 = arith.constant 0 : i32
    %c0_i32_0 = arith.constant 0 : i32
    %c0_i32_1 = arith.constant 0 : i32
    %c0_i32_2 = arith.constant 0 : i32
    %c0_i32_3 = arith.constant 0 : i32
    return %c0_i32, %c0_i32_0, %c0_i32_1, %c0_i32_2 : i32, i32, i32, i32
  }
  func.func @transform_4(%arg0: i32) -> (i32, i32, i32, i32) {
    %c0_i32 = arith.constant 0 : i32
    %c0_i32_0 = arith.constant 0 : i32
    %c0_i32_1 = arith.constant 0 : i32
    %c0_i32_2 = arith.constant 0 : i32
    %c0_i32_3 = arith.constant 0 : i32
    return %c0_i32, %c0_i32_0, %c0_i32_1, %c0_i32_2 : i32, i32, i32, i32
  }
  func.func @transform_5(%arg0: i32) -> (i32, i32, i32, i32) {
    %c0_i32 = arith.constant 0 : i32
    %c0_i32_0 = arith.constant 0 : i32
    %c0_i32_1 = arith.constant 0 : i32
    %c0_i32_2 = arith.constant 0 : i32
    %c0_i32_3 = arith.constant 0 : i32
    return %c0_i32, %c0_i32_0, %c0_i32_1, %c0_i32_2 : i32, i32, i32, i32
  }
  func.func @transform_6(%arg0: i32) -> (i32, i32, i32, i32) {
    %c0_i32 = arith.constant 0 : i32
    %c0_i32_0 = arith.constant 0 : i32
    %c0_i32_1 = arith.constant 0 : i32
    %c0_i32_2 = arith.constant 0 : i32
    %c0_i32_3 = arith.constant 0 : i32
    return %c0_i32, %c0_i32_0, %c0_i32_1, %c0_i32_2 : i32, i32, i32, i32
  }
  func.func @transform_7(%arg0: i32) -> (i32, i32, i32, i32) {
    %c0_i32 = arith.constant 0 : i32
    %c0_i32_0 = arith.constant 0 : i32
    %c0_i32_1 = arith.constant 0 : i32
    %c0_i32_2 = arith.constant 0 : i32
    %c0_i32_3 = arith.constant 0 : i32
    return %c0_i32, %c0_i32_0, %c0_i32_1, %c0_i32_2 : i32, i32, i32, i32
  }
  func.func @transform_8(%arg0: i32) -> (i32, i32, i32, i32) {
    %c0_i32 = arith.constant 0 : i32
    %c0_i32_0 = arith.constant 0 : i32
    %c0_i32_1 = arith.constant 0 : i32
    %c0_i32_2 = arith.constant 0 : i32
    %c0_i32_3 = arith.constant 0 : i32
    return %c0_i32, %c0_i32_0, %c0_i32_1, %c0_i32_2 : i32, i32, i32, i32
  }
  func.func @transform_9(%arg0: i32) -> (i32, i32, i32) {
    %c0_i32 = arith.constant 0 : i32
    %c0_i32_0 = arith.constant 0 : i32
    %c0_i32_1 = arith.constant 0 : i32
    %c0_i32_2 = arith.constant 0 : i32
    return %c0_i32, %c0_i32_0, %c0_i32_1 : i32, i32, i32
  }
  func.func @transform_10(%arg0: i32) -> (i32, i32, i32) {
    %c0_i32 = arith.constant 0 : i32
    %c0_i32_0 = arith.constant 0 : i32
    %c0_i32_1 = arith.constant 0 : i32
    %c0_i32_2 = arith.constant 0 : i32
    return %c0_i32, %c0_i32_0, %c0_i32_1 : i32, i32, i32
  }
  func.func @transform_11(%arg0: i32) -> (i32, i32, i32) {
    %c0_i32 = arith.constant 0 : i32
    %c0_i32_0 = arith.constant 0 : i32
    %c0_i32_1 = arith.constant 0 : i32
    %c0_i32_2 = arith.constant 0 : i32
    return %c0_i32, %c0_i32_0, %c0_i32_1 : i32, i32, i32
  }
  func.func @transform_12(%arg0: i32) -> (i32, i32, i32) {
    %c0_i32 = arith.constant 0 : i32
    %c0_i32_0 = arith.constant 0 : i32
    %c0_i32_1 = arith.constant 0 : i32
    %c0_i32_2 = arith.constant 0 : i32
    return %c0_i32, %c0_i32_0, %c0_i32_1 : i32, i32, i32
  }
  func.func @transform_13(%arg0: i32) -> (i32, i32, i32) {
    %c0_i32 = arith.constant 0 : i32
    %c0_i32_0 = arith.constant 0 : i32
    %c0_i32_1 = arith.constant 0 : i32
    %c0_i32_2 = arith.constant 0 : i32
    return %c0_i32, %c0_i32_0, %c0_i32_1 : i32, i32, i32
  }
  func.func @transform_14(%arg0: i32) -> (i32, i32, i32) {
    %c0_i32 = arith.constant 0 : i32
    %c0_i32_0 = arith.constant 0 : i32
    %c0_i32_1 = arith.constant 0 : i32
    %c0_i32_2 = arith.constant 0 : i32
    return %c0_i32, %c0_i32_0, %c0_i32_1 : i32, i32, i32
  }
  func.func @transform_15(%arg0: i32) -> (i32, i32, i32) {
    %c0_i32 = arith.constant 0 : i32
    %c0_i32_0 = arith.constant 0 : i32
    %c0_i32_1 = arith.constant 0 : i32
    %c0_i32_2 = arith.constant 0 : i32
    return %c0_i32, %c0_i32_0, %c0_i32_1 : i32, i32, i32
  }
  func.func @transform_16(%arg0: i32) -> (i32, i32, i32) {
    %c0_i32 = arith.constant 0 : i32
    %c0_i32_0 = arith.constant 0 : i32
    %c0_i32_1 = arith.constant 0 : i32
    %c0_i32_2 = arith.constant 0 : i32
    return %c0_i32, %c0_i32_0, %c0_i32_1 : i32, i32, i32
  }
  func.func @transform_17(%arg0: i32) -> (i32, i32, i32) {
    %c0_i32 = arith.constant 0 : i32
    %c0_i32_0 = arith.constant 0 : i32
    %c0_i32_1 = arith.constant 0 : i32
    %c0_i32_2 = arith.constant 0 : i32
    return %c0_i32, %c0_i32_0, %c0_i32_1 : i32, i32, i32
  }
  func.func @transform_18(%arg0: i32) -> (i32, i32) {
    %c0_i32 = arith.constant 0 : i32
    %c0_i32_0 = arith.constant 0 : i32
    %c0_i32_1 = arith.constant 0 : i32
    return %c0_i32, %c0_i32_0 : i32, i32
  }
  func.func @transform_19(%arg0: i32) -> (i32, i32, i32) {
    %c0_i32 = arith.constant 0 : i32
    %c0_i32_0 = arith.constant 0 : i32
    %c0_i32_1 = arith.constant 0 : i32
    return %arg0, %c0_i32, %c0_i32_0 : i32, i32, i32
  }
}

</mosaic_0001>

<bundles_post_ra>
// kernel: tpu_custom_call.1
= control target key start
LH: loop header
LB: loop body
LE: loop exit
PB: predicated region body
PF: predicated region fallthrough
CT: control target
= control target key end

     0   :  { %s10658_s0 = inlined_call_operand.vmem [shape: f32[2,8,32], index: 0, kind: input, shape index: {}]   ;;  %s10659_s1 = inlined_call_operand.vmem [shape: f32[2,1,8], index: 1, kind: input, shape index: {}]   ;;  %s10660_s2 = inlined_call_operand.vmem [shape: f32[2,2,32,16], index: 2, kind: input, shape index: {}]   ;;  %s10661_s3 = inlined_call_operand.vmem [shape: f32[2,2,32,16], index: 3, kind: input, shape index: {}]   ;;  %s10662_s4 = inlined_call_operand.vmem [shape: f32[2,2,32,16], index: 4, kind: input, shape index: {}]   ;;  %s10663_s5 = inlined_call_operand.vmem [shape: f32[2,2,1,16], index: 5, kind: input, shape index: {}]   ;;  %s10664_s6 = inlined_call_operand.vmem [shape: f32[2,2,1,16], index: 6, kind: input, shape index: {}]   ;;  %s10665_s7 = inlined_call_operand.vmem [shape: f32[2,2,1,16], index: 7, kind: input, shape index: {}]   ;;  %s10666_s8 = inlined_call_operand.vmem [shape: f32[2,2,16,32], index: 8, kind: input, shape index: {}]   ;;  %s10667_s9 = inlined_call_operand.vmem [shape: f32[2,1,32], index: 9, kind: input, shape index: {}]   ;;  %s10668_s10 = inlined_call_operand.vmem [shape: bf16[2,32,2048], index: 10, kind: input, shape index: {}]   ;;  %s10669_s11 = inlined_call_operand.vmem [shape: f32[2,1,2048], index: 11, kind: input, shape index: {}]   ;;  %s10670_s12 = inlined_call_operand.vmem [shape: bf16[2,2048,32], index: 12, kind: input, shape index: {}]   ;;  %s10671_s13 = inlined_call_operand.vmem [shape: f32[2,1,32], index: 13, kind: input, shape index: {}]   ;;  %s10672_s14 = inlined_call_operand.vmem [shape: f32[2,1,32], index: 14, kind: input, shape index: {}]   ;;  %s10673_s15 = inlined_call_operand.vmem [shape: f32[2,1,32], index: 15, kind: input, shape index: {}]   ;;  %s10674_s16 = inlined_call_operand.vmem [shape: f32[2,1,32], index: 16, kind: input, shape index: {}]   ;;  %s10675_s17 = inlined_call_operand.vmem [shape: f32[2,1,32], index: 17, kind: input, shape index: {}]   ;;  %s10676_s18 = inlined_call_operand.vmem [shape: bf16[32,512], index: 18, kind: input, shape index: {}]   ;;  %s10677_s19 = inlined_call_operand.hbm [shape: f32[2,1,512], index: 19, kind: output, shape index: {}]  }
   0x1   :  { %10688 = sst [smem:[#allocation11_spill]] %s10658_s0 }
   0x2   :  { %10689 = sst [smem:[#allocation12_spill]] %s10659_s1 }
   0x3   :  { %10690 = sst [smem:[#allocation13_spill]] %s10660_s2 }
   0x4   :  { %10691 = sst [smem:[#allocation14_spill]] %s10661_s3 }
   0x5   :  { %10692 = sst [smem:[#allocation15_spill]] %s10677_s19 }
   0x6   :  { %24 = vsyncpa [#allocation3], 0 }
   0x7   :  { %26 = vsyncpa [#allocation3 + $0x1], 0  ;;  %s8944_s0 = smov 0   ;;  %s8946_s30 = smov 0  }
   0x8   :  { %s8948_s20 = smov 0   ;;  %s8950_s21 = smov 0  }
   0x9 LB: > { %10693 = sst [smem:[#allocation5_spill]] %s8824_s0  ;;  %s8965_s1 = sadd.s32 4294967295, %s8836_s21   ;;  %s8836_s21 = sphi %s8950_s21, %s10710_s21   ;;  %s8832_s20 = sphi %s8948_s20, %s10712_s20   ;;  %s8828_s30 = sphi %s8946_s30, %s10714_s30   ;;  %s8824_s0 = sphi %s8944_s0, %s10713_s0  }
   0xa   : > { %10694 = sst [smem:[#allocation6_spill]] %s8832_s20  ;;  %s6954_s22 = sadd.s32 4294967294, %s8836_s21  }
   0xb   : > { %10695 = sst [smem:[#allocation7_spill]] %s8836_s21  ;;  %s8969_s2 = sadd.s32 1, %s8836_s21  }
   0xc   : > { %10696 = sst [smem:[#allocation8_spill]] %s8969_s2  ;;  %s448_s23 = sadd.s32 1, %s8832_s20 }
   0xd   : > { %s445_s24 = ssub.s32 %s8836_s21, %s8969_s2  ;;  %p458_p0 = scmp.ne.s32.totalorder %s8832_s20, %s8828_s30 }
   0xe   : > { %p446_p1 = scmp.eq.s32.totalorder %s445_s24, 0  ;;  %p459_p2 = scmp.eq.s32.totalorder %s8965_s1, 1 }
   0xf   : > { %p464_p3 = scmp.ne.s32.totalorder %s8828_s30, %s8824_s0  ;;  %p465_p4 = scmp.eq.s32.totalorder %s6954_s22, 1 }
  0x10   : > { %s8980_s25 = scalar_select %p446_p1, %s8832_s20, %s448_s23  }
  0x11   : > { %p8982_p5 = por %p459_p2, %p458_p0  ;;  %p8986_p6 = por %p465_p4, %p464_p3 }
  0x12   : > { %10697 = sst [smem:[#allocation9_spill]] %s8980_s25  ;;  %p6957_p7 = scmp.ge.s32.totalorder %s8836_s21, 1 }
  0x13   : > { %s10699_s26 = scalar_select %p8986_p6, 1, 0 }
  0x14   : > { %p547_p8 = scmp.lt.s32.totalorder %s8836_s21, 3 }
  0x15   : > { %10700 = sst [smem:[#allocation10_spill]] %s10699_s26 }
  0x16   : > { %p548_p9 = pnand %p6957_p7, %p547_p8 }
  0x17   : > { %s10701_s29 = sld [smem:[#allocation14_spill]] (!%p548_p9)  ;;  %s10702_s20 = sld [smem:[#allocation13_spill]] (!%p548_p9)  ;;  %v8838_v3 = vmov (!%p548_p9), 0.0|0.0   ;;  %vm8839_vm0 = vmmov (!%p548_p9), 0   ;;  %v8840_v11 = vmov (!%p548_p9), 0.0   ;;  %vm626_vm1 = vcmask (!%p548_p9), 261120  }
  0x18   : > { %551 = sbr.rel (%p548_p9) target bundleno = 6474 (0x194a), region = 96  ;;  %8358 = vmatprep.subr.bf16.mxu1 (!%p548_p9), %v8838_v3  ;;  %8352 = vmatprep.subr.bf16.mxu0 (!%p548_p9), %v8838_v3  ;;  %p605_p10 = scmp.lt.s32.totalorder (!%p548_p9), %s8965_s1, 1  ;;  %v6962_v15 = vld [vmem:[%s10664_s6] ss:$0 sm:$0xff] (!%p548_p9)  ;;  %vm862_vm2 = vcmask (!%p548_p9), 130048   ;;  %v782_v24 = vld [vmem:[%s10662_s4 + $0x8] sm:$0xff] (!%p548_p9) }
  0x19   : > { %8171 = vmatprep.mubr.msk.f32.mxu1 (!%p548_p9), %vm8839_vm0, %v8840_v11  ;;  %8160 = vmatprep.mubr.msk.f32.mxu0 (!%p548_p9), %vm8839_vm0, %v8840_v11  ;;  %s10704_s28 = sld [smem:[#allocation11_spill]] (!%p548_p9)  ;;  %v6960_v16 = vld [vmem:[%s10663_s5] ss:$0 sm:$0xff] (!%p548_p9)  ;;  %v783_v25 = vld [vmem:[%s10662_s4 + $0x10] sm:$0xff] (!%p548_p9)  ;;  %v784_v27 = vld [vmem:[%s10662_s4 + $0x18] sm:$0xff] (!%p548_p9)  ;;  %s10705_s27 = sld [smem:[#allocation12_spill]] (!%p548_p9) }
  0x1a   : > { %v781_v23 = vld [vmem:[%s10662_s4] sm:$0xff] (!%p548_p9)  ;;  %v8368_v28 = vpack.c.bf16 (!%p548_p9), %v784_v27, %v783_v25  ;;  %vm947_vm3 = vcmask (!%p548_p9), 64512   ;;  %s602_s19 = sand.u32 (!%p548_p9), 1, %s8828_s30   ;;  %s10706_s24 = sld [smem:[#allocation15_spill]] (!%p548_p9) }
  0x1b   : > { %v8365_v26 = vpack.c.bf16 (!%p548_p9), %v782_v24, %v781_v23  ;;  %v6964_v42 = vld [vmem:[%s10665_s7] ss:$0 sm:$0xff] (!%p548_p9)  ;;  %v6989_v25 = vld [vmem:[%s10665_s7 + $0x1] ss:$0 sm:$0xff] (!%p548_p9)  ;;  %s6872_s26 = scalar_lea.sflag (!%p548_p9), [#allocation3], %s602_s19 }
  0x1d   : > { %v700_v0 = vld [vmem:[%s10701_s29] sm:$0xff] (!%p548_p9)  ;;  %v701_v1 = vld [vmem:[%s10701_s29 + $0x8] sm:$0xff] (!%p548_p9)  ;;  %s10703_s2 = smov (!%p548_p9), %s10702_s20  ;;  %v702_v6 = vld [vmem:[%s10701_s29 + $0x10] sm:$0xff] (!%p548_p9) }
  0x1e   : > { %v615_v2 = vld [vmem:[%s10702_s20] sm:$0xff] (!%p548_p9)  ;;  %v8359_v4 = vpack.c.bf16 (!%p548_p9), %v701_v1, %v700_v0  ;;  %v616_v5 = vld [vmem:[%s10703_s2 + $0x8] sm:$0xff] (!%p548_p9)  ;;  %v703_v7 = vld [vmem:[%s10701_s29 + $0x18] sm:$0xff] (!%p548_p9) }
  0x1f   : > { %v8353_v8 = vpack.c.bf16 %v616_v5, %v615_v2  ;;  %v617_v9 = vld [vmem:[%s10703_s2 + $0x10] sm:$0xff]  ;;  %v618_v10 = vld [vmem:[%s10703_s2 + $0x18] sm:$0xff]  ;;  %v8362_v12 = vpack.c.bf16 %v703_v7, %v702_v6  ;;  %s9024_s0 = scalar_select %p605_p10, %s8965_s1, 1  ;;  %v6970_v45 = vld [vmem:[%s10703_s2 + $0x20] sm:$0xff] }
  0x20   : > { %8360 = vmatpush3.bf16.msra.mxu1 %v8359_v4  ;;  %v8356_v13 = vpack.c.bf16 %v618_v10, %v617_v9  ;;  %v6971_v46 = vld [vmem:[%s10703_s2 + $0x28] sm:$0xff]  ;;  %v6972_v48 = vld [vmem:[%s10703_s2 + $0x30] sm:$0xff]  ;;  %v6973_v49 = vld [vmem:[%s10703_s2 + $0x38] sm:$0xff] }
  0x21   : > { %8354 = vmatpush3.bf16.msra.mxu0 %v8353_v8  ;;  %8361 = vmatprep.subr.bf16.mxu1 %v8838_v3  ;;  %s6959_s21 = sshll.u32 %s9024_s0, 3  ;;  %v8371_v47 = vpack.c.bf16 %v6971_v46, %v6970_v45  ;;  %v8374_v50 = vpack.c.bf16 %v6973_v49, %v6972_v48  ;;  %v6977_v52 = vld [vmem:[%s10701_s29 + $0x20] sm:$0xff]  ;;  %v6978_v53 = vld [vmem:[%s10701_s29 + $0x28] sm:$0xff]  ;;  %v6979_v57 = vld [vmem:[%s10701_s29 + $0x30] sm:$0xff] }
  0x22   : > { %8355 = vmatprep.subr.bf16.mxu0 %v8838_v3  ;;  %s9032_s22 = scalar_lea.vmem %s10704_s28, %s6959_s21  ;;  %s9079_s28 = scalar_lea.vmem %s10705_s27, %s9024_s0  ;;  %v8377_v55 = vpack.c.bf16 %v6978_v53, %v6977_v52  ;;  %v6980_v58 = vld [vmem:[%s10701_s29 + $0x38] sm:$0xff]  ;;  %v6982_v0 = vld [vmem:[%s10664_s6 + $0x1] ss:$0 sm:$0xff]  ;;  %v6985_v8 = vld [vmem:[%s10662_s4 + $0x28] sm:$0xff] }
  0x23   : > { %v613_v14 = vld [vmem:[%s9032_s22] sm:$0xff]  ;;  %v8380_v59 = vpack.c.bf16 %v6980_v58, %v6979_v57  ;;  %v6986_v9 = vld [vmem:[%s10662_s4 + $0x30] sm:$0xff]  ;;  %v1643_v57 = vld [vmem:[%s10668_s10 + $0x48] sm:$0xff]  ;;  %s6958_s0 = sshll.u32 %s602_s19, 2 }
  0x24   : > { %8363 = vmatpush3.bf16.msra.mxu1 %v8362_v12  ;;  %v9069_v29 = vld [vmem:[%s9032_s22] sm:$0xff]  ;;  %v6987_v12 = vld [vmem:[%s10662_s4 + $0x38] sm:$0xff]  ;;  %s7711_s22 = sshll.u32 %s8965_s1, 6  ;;  %s8843_s1 = smov [#allocation2]  }
  0x25   : > { %8357 = vmatpush3.bf16.msra.mxu0 %v8356_v13  ;;  %8185 = vmatprep.subr.mxu1 %v8840_v11  ;;  %v9082_v31 = vld [vmem:[%s9079_s28] ss:$0 sm:$0xff]  ;;  %v6975_v1 = vld [vmem:[%s10663_s5 + $0x1] ss:$0 sm:$0xff]  ;;  %v8386_v13 = vpack.c.bf16 %v6987_v12, %v6986_v9  ;;  %v8841_v12 = vmov 0   ;;  %s10616_s21 = scalar_lea.hbm %s10706_s24, %s7711_s22 }
  0x26   : > { %8364 = vmatprep.subr.bf16.mxu0 %v8838_v3  ;;  %v6984_v7 = vld [vmem:[%s10662_s4 + $0x20] sm:$0xff] }
  0x27   : > { %8172 = vmatmul.mubr.msk.f32.vlgmr.msra.gmra.mrb[0].mxu1 %vm626_vm1, %v613_v14  ;;  %v8383_v10 = vpack.c.bf16 %v6985_v8, %v6984_v7  ;;  %v1644_v7 = vld [vmem:[%s10668_s10 + $0x50] sm:$0xff]  ;;  %v1637_v8 = vld [vmem:[%s10668_s10 + $0x18] sm:$0xff] }
  0x28   : > { %8161 = vmatmul.mubr.msk.f32.vlgmr.msra.gmra.mrb[0].mxu0 %vm626_vm1, %v613_v14  ;;  %8187 = vmatprep.mubr.msk.f32.mxu1 %vm8839_vm0, %v8840_v11 }
  0x29   : > { %8182 = vmatprep.mubr.msk.f32.mxu0 %vm8839_vm0, %v8840_v11  ;;  %8366 = vmatpush3.bf16.msra.mxu0 %v8365_v26 }
  0x2a   : > { %8367 = vmatprep.subr.bf16.mxu0 %v8838_v3 }
  0x2d   : > { %8369 = vmatpush3.bf16.msra.mxu0 %v8368_v28  ;;  %v6994_v28 = vld [vmem:[%s10666_s8 + $0x10] sm:$0xff] }
  0x2e   : > { %8370 = vmatprep.subr.bf16.mxu0 %v8838_v3 }
  0x30   : > { %8183 = vmatmul.mubr.msk.f32.vlgmr.msra.gmra.mrb[2].mxu0 %vm626_vm1, %v9069_v29 }
  0x31   : > { %8203 = vmatprep.mubr.msk.f32.mxu0 %vm8839_vm0, %v8840_v11  ;;  %8372 = vmatpush3.bf16.msra.mxu0 %v8371_v47 }
  0x32   : > { %8373 = vmatprep.subr.bf16.mxu0 %v8838_v3 }
  0x35   : > { %8375 = vmatpush3.bf16.msra.mxu0 %v8374_v50 }
  0x36   : > { %8382 = vmatprep.subr.bf16.mxu0 %v8838_v3 }
  0x38   : > { %8204 = vmatmul.mubr.msk.f32.vlgmr.msra.gmra.mrb[4].mxu0 %vm626_vm1, %v9069_v29 }
  0x39   : > { %8225 = vmatprep.mubr.msk.f32.mxu0 %vm8839_vm0, %v8840_v11  ;;  %8384 = vmatpush3.bf16.msra.mxu0 %v8383_v10  ;;  %v1645_v10 = vld [vmem:[%s10668_s10 + $0x58] sm:$0xff] }
  0x3a   : > { %8385 = vmatprep.subr.bf16.mxu0 %v8838_v3 }
  0x3d   : > { %8387 = vmatpush3.bf16.msra.mxu0 %v8386_v13 }
  0x3e   : > { %8388 = vmatprep.subr.bf16.mxu0 %v8838_v3 }
  0x40   : > { %8226 = vmatmul.mubr.msk.f32.vlgmr.msra.gmra.mrb[6].mxu0 %vm626_vm1, %v9069_v29 }
  0x41   : > { %8242 = vmatprep.mubr.msk.f32.mxu0 %vm8839_vm0, %v8840_v11 }
  0xfa   : > { %v777_v17 = vpop.f32.mrb[0].mxu1 }
  0xfb   : > { %v778_v18 = vadd.f32 %v6962_v15, %v777_v17  ;;  %v8173_v19 = vpop.f32.mrb[1].mxu1  ;;  %v696_v20 = vpop.f32.mrb[0].mxu0 }
  0xfc   : > { %v697_v21 = vadd.f32 %v6960_v16, %v696_v20  ;;  %v8162_v22 = vpop.f32.mrb[1].mxu0 }
  0xfd   : > { %8186 = vmatpush3.xpose.msk.msra.mxu1 %vm862_vm2, %v778_v18 }
  0xfe   : > { %8190 = vmatprep.subr.mxu1 %v8840_v11 }
 0x100   : > { %8188 = vmatmul.mubr.msk.f32.vlgmr.msra.gmra.mrb[2].mxu1 %vm862_vm2, %v697_v21 }
 0x101   : > { %8192 = vmatprep.mubr.msk.f32.mxu1 %vm8839_vm0, %v8840_v11 }
 0x103   : > { %v858_v41 = vpop.f32.mrb[2].mxu0 }
 0x104   : > { %v8184_v43 = vpop.f32.mrb[3].mxu0  ;;  %v859_v44 = vadd.f32 %v6964_v42, %v858_v41 }
 0x105   : > { %v6998_v43 = vld [vmem:[%s10667_s9] ss:$0 sm:$0xff] }
 0x106   : > { %8191 = vmatpush3.msra.mxu1 %v859_v44 }
 0x107   : > { %8376 = vmatprep.subr.bf16.mxu1 %v8838_v3 }
 0x10b   : > { %v1113_v60 = vpop.f32.mrb[4].mxu0 }
 0x10c   : > { %v8205_v61 = vpop.f32.mrb[5].mxu0  ;;  %v1114_v6 = vadd.f32 %v6975_v1, %v1113_v60  ;;  %v1659_v1 = vld [vmem:[%s10668_s10 + $0xc8] sm:$0xff] }
 0x10d   : > { %v1650_v61 = vld [vmem:[%s10668_s10 + $0x80] sm:$0xff] }
 0x113   : > { %v1279_v24 = vpop.f32.mrb[6].mxu0 }
 0x114   : > { %v8227_v26 = vpop.f32.mrb[7].mxu0  ;;  %v1280_v27 = vadd.f32 %v6989_v25, %v1279_v24  ;;  %v1652_v24 = vld [vmem:[%s10668_s10 + $0x90] sm:$0xff] }
 0x115   : > { %v1660_v25 = vld [vmem:[%s10668_s10 + $0xd0] sm:$0xff]  ;;  %v1653_v26 = vld [vmem:[%s10668_s10 + $0x98] sm:$0xff] }
 0x1d3   : > { %v935_v30 = vpop.f32.mrb[2].mxu1 }
 0x1d4   : > { %v939_v32 = vmul.f32 0.25, %v935_v30  ;;  %v8189_v33 = vpop.f32.mrb[3].mxu1  ;;  %v6995_v30 = vld [vmem:[%s10666_s8 + $0x18] sm:$0xff] }
 0x1d5   : > { %v1032_v33 = vld [vmem:[%s10666_s8] sm:$0xff] }
 0x1d6   : > { %v946_v34 = vadd.f32 %v9082_v31, %v939_v32 }
 0x1d8   : > { %v948_v35 = vsel %vm947_vm3, %v946_v34, -inf }
 0x1d9   : > { %949 = vmax.xlane.f32.xlu0 %v948_v35 }
 0x266   : > { %v950_v36 = vpop.xlane.xlu0 %949 }
 0x267   : > { %v951_v37 = vsub.f32 %v946_v34, %v950_v36  ;;  %v1033_v34 = vld [vmem:[%s10666_s8 + $0x8] sm:$0xff] }
 0x268   : > { %v8392_v36 = vpack.c.bf16 %v1033_v34, %v1032_v33  ;;  %v1638_v33 = vld [vmem:[%s10668_s10 + $0x20] sm:$0xff] }
 0x269   : > { %v952_v38 = vmul.f32 1.442695, %v951_v37  ;;  %v1646_v34 = vld [vmem:[%s10668_s10 + $0x60] sm:$0xff] }
 0x26b   : > { %8748 = vpow2.f32 %v952_v38 }
 0x275   : > { %v8749_v39 = vpop.eup %8748 }
 0x276   : > { %v954_v40 = vsel %vm947_vm3, %v8749_v39, 0.0 }
 0x277   : > { %955 = vadd.xlane.f32.xlu0 %v954_v40 }
 0x304   : > { %v956_v51 = vpop.xlane.xlu0 %955 }
 0x305   : > { %8750 = vrcp.f32 %v956_v51 }
 0x30f   : > { %v8751_v54 = vpop.eup %8750 }
 0x310   : > { %v958_v56 = vmul.f32 %v8751_v54, %v8749_v39  ;;  %v1634_v54 = vld [vmem:[%s10668_s10] sm:$0xff] }
 0x312   : > { %8193 = vmatmul.mubr.msk.f32.vlgmr.msra.gmra.mrb[4].mxu1 %vm947_vm3, %v958_v56 }
 0x313   : > { %8378 = vmatpush3.bf16.msra.mxu1 %v8377_v55  ;;  %8214 = vmatprep.mubr.msk.f32.mxu1 %vm8839_vm0, %v8840_v11  ;;  %v1642_v55 = vld [vmem:[%s10668_s10 + $0x40] sm:$0xff] }
 0x314   : > { %8379 = vmatprep.subr.bf16.mxu1 %v8838_v3  ;;  %v7002_v56 = vcombine.high %v1634_v54, %v1642_v55  ;;  %v7001_v58 = vcombine.low %v1634_v54, %v1642_v55 }
 0x317   : > { %8381 = vmatpush3.bf16.msra.mxu1 %v8380_v59 }
 0x318   : > { %8228 = vmatprep.subr.mxu1 %v8840_v11 }
 0x31a   : > { %8215 = vmatmul.mubr.msk.f32.vlgmr.msra.gmra.mrb[6].mxu1 %vm626_vm1, %v9069_v29 }
 0x31b   : > { %8230 = vmatprep.mubr.msk.f32.mxu1 %vm8839_vm0, %v8840_v11 }
 0x3e5   : > { %v1028_v62 = vpop.f32.mrb[4].mxu1 }
 0x3e6   : > { %v8194_v63 = vpop.f32.mrb[5].mxu1 }
 0x3e7   : > { %v1651_v63 = vld [vmem:[%s10668_s10 + $0x88] sm:$0xff] }
 0x3ed   : > { %v1196_v2 = vpop.f32.mrb[6].mxu1 }
 0x3ee   : > { %v1197_v4 = vadd.f32 %v6982_v0, %v1196_v2  ;;  %v8216_v5 = vpop.f32.mrb[7].mxu1 }
 0x3ef   : > { %v7020_v5 = vcombine.high %v1651_v63, %v1659_v1 }
 0x3f0   : > { %8229 = vmatpush3.xpose.msk.msra.mxu1 %vm862_vm2, %v1197_v4  ;;  %v7019_v4 = vcombine.low %v1651_v63, %v1659_v1 }
 0x3f1   : > { %8233 = vmatprep.subr.mxu1 %v8840_v11 }
 0x3f3   : > { %8231 = vmatmul.mubr.msk.f32.vlgmr.msra.gmra.mrb[8].mxu1 %vm862_vm2, %v1114_v6  ;;  %v1636_v6 = vld [vmem:[%s10668_s10 + $0x10] sm:$0xff] }
 0x3f4   : > { %8235 = vmatprep.mubr.msk.f32.mxu1 %vm8839_vm0, %v8840_v11  ;;  %8234 = vmatpush3.msra.mxu1 %v1280_v27  ;;  %v7006_v9 = vcombine.high %v1636_v6, %v1644_v7  ;;  %v7005_v13 = vcombine.low %v1636_v6, %v1644_v7  ;;  %v1661_v27 = vld [vmem:[%s10668_s10 + $0xd8] sm:$0xff]  ;;  %v8483_v6 = vld [vmem:[%s10670_s12 + $0x80] sm:$0xff]   ;;  %v8484_v7 = vld [vmem:[%s10670_s12 + $0x48] sm:$0xff]  }
 0x3f5   : > { %8391 = vmatprep.subr.bf16.mxu1 %v8838_v3 }
 0x4c6   : > { %v1355_v14 = vpop.f32.mrb[8].mxu1 }
 0x4c7   : > { %v1359_v15 = vmul.f32 0.25, %v1355_v14  ;;  %v8232_v16 = vpop.f32.mrb[9].mxu1  ;;  %v7007_v14 = vcombine.low %v1637_v8, %v1645_v10 }
 0x4c9   : > { %v1360_v17 = vadd.f32 %v9082_v31, %v1359_v15  ;;  %v8389_v31 = vpack.c.bf16 %v6995_v30, %v6994_v28  ;;  %v7008_v15 = vcombine.high %v1637_v8, %v1645_v10  ;;  %v8485_v8 = vld [vmem:[%s10670_s12 + $0xc8] sm:$0xff]  }
 0x4ca   : > { %v8487_v10 = vld [vmem:[%s10670_s12 + $0x88] sm:$0xff]  }
 0x4cb   : > { %v1361_v18 = vsel %vm947_vm3, %v1360_v17, -inf  ;;  %8390 = vmatpush3.bf16.msra.mxu0 %v8389_v31  ;;  %v7022_v31 = vcombine.high %v1652_v24, %v1660_v25 }
 0x4cc   : > { %1362 = vmax.xlane.f32.xlu1 %v1361_v18  ;;  %1913 = vmatprep.subr.bf16.mxu0 %v7002_v56  ;;  %v1656_v56 = vld [vmem:[%s10668_s10 + $0xb0] sm:$0xff] }
 0x559   : > { %v1363_v19 = vpop.xlane.xlu1 %1362 }
 0x55a   : > { %v1364_v20 = vsub.f32 %v1360_v17, %v1363_v19 }
 0x55c   : > { %v1365_v21 = vmul.f32 1.442695, %v1364_v20  ;;  %v6999_v20 = vld [vmem:[%s10672_s14] ss:$0 sm:$0xff] }
 0x55e   : > { %8752 = vpow2.f32 %v1365_v21 }
 0x568   : > { %v8753_v22 = vpop.eup %8752 }
 0x569   : > { %v1367_v23 = vsel %vm947_vm3, %v8753_v22, 0.0 }
 0x56a   : > { %1368 = vadd.xlane.f32.xlu1 %v1367_v23 }
 0x5f7   : > { %v1369_v32 = vpop.xlane.xlu1 %1368 }
 0x5f8   : > { %8754 = vrcp.f32 %v1369_v32  ;;  %v7024_v32 = vcombine.high %v1653_v26, %v1661_v27 }
 0x602   : > { %v8755_v35 = vpop.eup %8754 }
 0x603   : > { %v1371_v37 = vmul.f32 %v8755_v35, %v8753_v22  ;;  %v7000_v22 = vld [vmem:[%s10673_s15] ss:$0 sm:$0xff]  ;;  %v1639_v35 = vld [vmem:[%s10668_s10 + $0x28] sm:$0xff] }
 0x605   : > { %8236 = vmatmul.mubr.msk.f32.vlgmr.msra.gmra.mrb[10].mxu1 %vm947_vm3, %v1371_v37  ;;  %v7021_v37 = vcombine.low %v1652_v24, %v1660_v25  ;;  %v8499_v24 = vld [vmem:[%s10670_s12 + $0xa0] sm:$0xff]   ;;  %v8500_v25 = vld [vmem:[%s10670_s12 + $0x68] sm:$0xff]  }
 0x606   : > { %8393 = vmatpush3.bf16.msra.mxu1 %v8392_v36  ;;  %8249 = vmatprep.mubr.msk.f32.mxu1 %vm8839_vm0, %v8840_v11  ;;  %v1647_v36 = vld [vmem:[%s10668_s10 + $0x68] sm:$0xff] }
 0x609   : > { %8250 = vmatmul.mubr.msk.f32.vlgmr.msra.gmra.mrb[12].mxu1 %vm862_vm2, %v1028_v62  ;;  %v1658_v62 = vld [vmem:[%s10668_s10 + $0xc0] sm:$0xff] }
 0x60a   : > { %v7018_v0 = vcombine.high %v1650_v61, %v1658_v62  ;;  %v7017_v2 = vcombine.low %v1650_v61, %v1658_v62  ;;  %1986 = vmatprep.mubr.bf16.mxu1 %v8841_v12 }
 0x6d8   : > { %v1441_v38 = vpop.f32.mrb[10].mxu1 }
 0x6d9   : > { %v8237_v39 = vpop.f32.mrb[11].mxu1  ;;  %8243 = vmatmul.mubr.msk.f32.vlgmr.msra.gmra.mrb[8].mxu0 %vm862_vm2, %v1441_v38  ;;  %v7023_v38 = vcombine.low %v1653_v26, %v1661_v27  ;;  %v8501_v26 = vld [vmem:[%s10670_s12 + $0xe8] sm:$0xff]  }
 0x6da   : > { %1914 = vmatpush1.bf16.msra.mxu0 %v7001_v58  ;;  %1945 = vmatprep.mubr.bf16.mxu0 %v8841_v12  ;;  %v7010_v39 = vcombine.high %v1638_v33, %v1646_v34  ;;  %v1657_v58 = vld [vmem:[%s10668_s10 + $0xb8] sm:$0xff]  ;;  %v8502_v27 = vld [vmem:[%s10670_s12 + $0x28] sm:$0xff]  }
 0x6db   : > { %1915 = vmatprep.subr.bf16.mxu0 %v7018_v0 }
 0x6dc   : > { %v1590_v40 = vpop.f32.mrb[12].mxu1 }
 0x6dd   : > { %v8251_v41 = vpop.f32.mrb[13].mxu1 }
 0x6de   : > { %1916 = vmatpush1.bf16.msra.mxu0 %v7017_v2  ;;  %v1654_v41 = vld [vmem:[%s10668_s10 + $0xa0] sm:$0xff] }
 0x6df   : > { %1995 = vmatprep.subr.bf16.mxu0 %v7006_v9  ;;  %v8480_v2 = vld [vmem:[%s10670_s12 + $0x40] sm:$0xff]   ;;  %v8486_v9 = vld [vmem:[%s10670_s12 + $0x8] sm:$0xff]  }
 0x7ac   : > { %v1517_v42 = vpop.f32.mrb[8].mxu0 }
 0x7ad   : > { %v1591_v44 = vadd.f32 %v1590_v40, %v1517_v42  ;;  %v8244_v45 = vpop.f32.mrb[9].mxu0  ;;  %v7012_v40 = vcombine.high %v1639_v35, %v1647_v36  ;;  %v1662_v42 = vld [vmem:[%s10668_s10 + $0xe0] sm:$0xff] }
 0x7ae   : > { %v7009_v45 = vcombine.low %v1638_v33, %v1646_v34  ;;  %v8506_v33 = vld [vmem:[%s10670_s12 + $0x30] sm:$0xff]  }
 0x7af   : > { %v1601_v46 = vadd.f32 %v6998_v43, %v1591_v44  ;;  %v1655_v43 = vld [vmem:[%s10668_s10 + $0xa8] sm:$0xff]  ;;  %v8507_v34 = vld [vmem:[%s10670_s12 + $0xb0] sm:$0xff]  }
 0x7b0   : > { %v1663_v44 = vld [vmem:[%s10668_s10 + $0xe8] sm:$0xff] }
 0x7b1   : > { %v1602_v47 = vadd.f32 %v9069_v29, %v1601_v46  ;;  %v1635_v29 = vld [vmem:[%s10668_s10 + $0x8] sm:$0xff]  ;;  %v7011_v46 = vcombine.low %v1639_v35, %v1647_v36  ;;  %v7027_v54 = vcombine.low %v1655_v43, %v1663_v44  ;;  %v8508_v35 = vld [vmem:[%s10670_s12 + $0x78] sm:$0xff]  }
 0x7b2   : > { %v7003_v59 = vcombine.low %v1635_v29, %v1643_v57  ;;  %v7004_v60 = vcombine.high %v1635_v29, %v1643_v57  ;;  %v1664_v57 = vld [vmem:[%s10668_s10 + $0xf0] sm:$0xff]  ;;  %v8509_v36 = vld [vmem:[%s10670_s12 + $0xf8] sm:$0xff]  }
 0x7b3   : > { %v1605_v48 = vsel %vm626_vm1, %v1602_v47, 0.0  ;;  %v7030_v62 = vcombine.high %v1656_v56, %v1664_v57  ;;  %v7029_v0 = vcombine.low %v1656_v56, %v1664_v57 }
 0x7b4   : > { %1606 = vadd.xlane.f32.xlu0 %v1605_v48  ;;  %1954 = vmatprep.subr.bf16.mxu1 %v7004_v60  ;;  %v7028_v48 = vcombine.high %v1655_v43, %v1663_v44 }
 0x7b5   : > { %1955 = vmatpush1.bf16.msra.mxu1 %v7003_v59  ;;  %v1665_v59 = vld [vmem:[%s10668_s10 + $0xf8] sm:$0xff] }
 0x7b6   : > { %1956 = vmatprep.subr.bf16.mxu1 %v7020_v5  ;;  %v7032_v63 = vcombine.high %v1657_v58, %v1665_v59  ;;  %v7031_v1 = vcombine.low %v1657_v58, %v1665_v59  ;;  %v8482_v5 = vld [vmem:[%s10670_s12] sm:$0xff]  }
 0x7b9   : > { %1957 = vmatpush1.bf16.msra.mxu1 %v7019_v4  ;;  %v8481_v4 = vld [vmem:[%s10670_s12 + $0xc0] sm:$0xff]  }
 0x7ba   : > { %2036 = vmatprep.subr.bf16.mxu1 %v7008_v15  ;;  %v8490_v15 = vld [vmem:[%s10670_s12 + $0x10] sm:$0xff]  }
 0x841   : > { %v1607_v49 = vpop.xlane.xlu0 %1606 }
 0x842   : > { %v1609_v50 = vmul.f32 0.03125, %v1607_v49  ;;  %v1640_v49 = vld [vmem:[%s10668_s10 + $0x30] sm:$0xff] }
 0x844   : > { %v1610_v51 = vsub.f32 %v1602_v47, %v1609_v50  ;;  %v7026_v47 = vcombine.high %v1654_v41, %v1662_v42  ;;  %v1648_v50 = vld [vmem:[%s10668_s10 + $0x70] sm:$0xff] }
 0x845   : > { %v7014_v55 = vcombine.high %v1640_v49, %v1648_v50  ;;  %v7013_v60 = vcombine.low %v1640_v49, %v1648_v50 }
 0x846   : > { %v1611_v52 = vmul.f32 %v1610_v51, %v1610_v51 }
 0x848   : > { %v1612_v53 = vsel %vm626_vm1, %v1611_v52, 0.0  ;;  %v1649_v52 = vld [vmem:[%s10668_s10 + $0x78] sm:$0xff] }
 0x849   : > { %1613 = vadd.xlane.f32.xlu1 %v1612_v53  ;;  %v7025_v53 = vcombine.low %v1654_v41, %v1662_v42  ;;  %v1670_v41 = vlaneseq }
 0x84b   : > { %v9424_v42 = vshrl.u32 %v1670_v41, 7  ;;  %vm6868_vm4 = vcmp.lt.s32.totalorder %v1670_v41, 512 }
 0x84d   : > { %v9427_v43 = vsub.s32 0, %v9424_v42  ;;  %v9430_v44 = vsub.s32 2, %v9424_v42 }
 0x8d6   : > { %v1614_v16 = vpop.xlane.xlu1 %1613 }
 0x8d7   : > { %v1615_v17 = vmul.f32 0.03125, %v1614_v16  ;;  %v8491_v16 = vld [vmem:[%s10670_s12 + $0x90] sm:$0xff]  }
 0x8d9   : > { %v1616_v18 = vadd.f32 1e-05, %v1615_v17  ;;  %v8492_v17 = vld [vmem:[%s10670_s12 + $0x58] sm:$0xff]  }
 0x8db   : > { %8756 = vrsqrt.f32 %v1616_v18  ;;  %v8493_v18 = vld [vmem:[%s10670_s12 + $0xd8] sm:$0xff]  }
 0x8e5   : > { %v8757_v19 = vpop.eup %8756 }
 0x8e6   : > { %v1618_v21 = vmul.f32 %v8757_v19, %v1610_v51  ;;  %v1641_v51 = vld [vmem:[%s10668_s10 + $0x38] sm:$0xff] }
 0x8e7   : > { %v7016_v29 = vcombine.high %v1641_v51, %v1649_v52  ;;  %v7015_v61 = vcombine.low %v1641_v51, %v1649_v52  ;;  %v8494_v19 = vld [vmem:[%s10670_s12 + $0x18] sm:$0xff]  }
 0x8e8   : > { %v1625_v23 = vmul.f32 %v6999_v20, %v1618_v21  ;;  %v8495_v20 = vld [vmem:[%s10670_s12 + $0x98] sm:$0xff]   ;;  %v8496_v21 = vld [vmem:[%s10670_s12 + $0x60] sm:$0xff]  }
 0x8ea   : > { %v9245_v28 = vadd.f32 %v7000_v22, %v1625_v23  ;;  %v8497_v22 = vld [vmem:[%s10670_s12 + $0xe0] sm:$0xff]  }
 0x8eb   : > { %v8498_v23 = vld [vmem:[%s10670_s12 + $0x20] sm:$0xff]  }
 0x8ec   : > { %v9249_v30 = vpack.c.bf16 %v9245_v28, %v9245_v28 }
 0x8ee   : > { %7033 = vmatmul.mubr.msk.bf16.vlgmr.msra.gmra.mrb[12].mxu0 %vm626_vm1, %v9249_v30  ;;  %7034 = vmatmul.mubr.msk.bf16.vlgmr.msra.gmra.mrb[16].mxu1 %vm626_vm1, %v9249_v30 }
 0x8ef   : > { %1996 = vmatpush1.bf16.msra.mxu0 %v7005_v13  ;;  %2037 = vmatpush1.bf16.msra.mxu1 %v7007_v14  ;;  %v8488_v13 = vld [vmem:[%s10670_s12 + $0x50] sm:$0xff]  }
 0x8f0   : > { %1997 = vmatprep.subr.bf16.mxu0 %v7022_v31  ;;  %2038 = vmatprep.subr.bf16.mxu1 %v7024_v32  ;;  %v8489_v14 = vld [vmem:[%s10670_s12 + $0xd0] sm:$0xff]  }
 0x8f1   : > { %2027 = vmatprep.mubr.bf16.mxu0 %v8841_v12  ;;  %2068 = vmatprep.mubr.bf16.mxu1 %v8841_v12  ;;  %v8504_v31 = vld [vmem:[%s10670_s12 + $0x70] sm:$0xff]  }
 0x8f2   : > { %v8505_v32 = vld [vmem:[%s10670_s12 + $0xf0] sm:$0xff]  }
 0x8f3   : > { %1998 = vmatpush1.bf16.msra.mxu0 %v7021_v37  ;;  %2039 = vmatpush1.bf16.msra.mxu1 %v7023_v38  ;;  %v8510_v37 = vld [vmem:[%s10670_s12 + $0x38] sm:$0xff]  }
 0x8f4   : > { %2077 = vmatprep.subr.bf16.mxu0 %v7010_v39  ;;  %2118 = vmatprep.subr.bf16.mxu1 %v7012_v40  ;;  %v8511_v38 = vld [vmem:[%s10670_s12 + $0xb8] sm:$0xff]   ;;  %v8512_v39 = vld [vmem:[%s10670_s12 + $0x140] sm:$0xff]  }
 0x8f5   : > { %v8513_v40 = vld [vmem:[%s10670_s12 + $0x1c0] sm:$0xff]  }
 0x8f6   : > { %7035 = vmatmul.mubr.msk.bf16.vlgmr.msra.gmra.mrb[16].mxu0 %vm626_vm1, %v9249_v30  ;;  %7036 = vmatmul.mubr.msk.bf16.vlgmr.msra.gmra.mrb[20].mxu1 %vm626_vm1, %v9249_v30 }
 0x8f7   : > { %2078 = vmatpush1.bf16.msra.mxu0 %v7009_v45  ;;  %2119 = vmatpush1.bf16.msra.mxu1 %v7011_v46  ;;  %v9435_v45 = vld [vmem:[%s10669_s11] sm:$0xff]  ;;  %v9438_v46 = vsub.s32 1, %v9424_v42 }
 0x8f8   : > { %2079 = vmatprep.subr.bf16.mxu0 %v7026_v47  ;;  %2120 = vmatprep.subr.bf16.mxu1 %v7028_v48  ;;  %v9441_v47 = vsub.s32 3, %v9424_v42  ;;  %v1673_v48 = vrot.slane %v9435_v45, %v9427_v43  ;;  %v1681_v49 = vrot.slane %v9435_v45, %v9430_v44 }
 0x8f9   : > { %2109 = vmatprep.mubr.bf16.mxu0 %v8841_v12  ;;  %2150 = vmatprep.mubr.bf16.mxu1 %v8841_v12  ;;  %v1677_v50 = vrot.slane %v9435_v45, %v9438_v46 }
 0x8fa   : > { %v1685_v51 = vrot.slane %v9435_v45, %v9441_v47 }
 0x8fb   : > { %2080 = vmatpush1.bf16.msra.mxu0 %v7025_v53  ;;  %2121 = vmatpush1.bf16.msra.mxu1 %v7027_v54 }
 0x8fc   : > { %2159 = vmatprep.subr.bf16.mxu0 %v7014_v55  ;;  %2200 = vmatprep.subr.bf16.mxu1 %v7016_v29 }
 0x8fe   : > { %7037 = vmatmul.mubr.msk.bf16.vlgmr.msra.gmra.mrb[20].mxu0 %vm626_vm1, %v9249_v30  ;;  %7038 = vmatmul.mubr.msk.bf16.vlgmr.msra.gmra.mrb[24].mxu1 %vm626_vm1, %v9249_v30 }
 0x8ff   : > { %2160 = vmatpush1.bf16.msra.mxu0 %v7013_v60  ;;  %2201 = vmatpush1.bf16.msra.mxu1 %v7015_v61  ;;  %v9452_v61 = vsub.s32 5, %v9424_v42 }
 0x900   : > { %2161 = vmatprep.subr.bf16.mxu0 %v7030_v62  ;;  %2202 = vmatprep.subr.bf16.mxu1 %v7032_v63  ;;  %v9455_v62 = vsub.s32 7, %v9424_v42 }
 0x901   : > { %2191 = vmatprep.mubr.bf16.mxu0 %v8841_v12  ;;  %2232 = vmatprep.mubr.bf16.mxu1 %v8841_v12 }
 0x903   : > { %2162 = vmatpush1.bf16.msra.mxu0 %v7029_v0  ;;  %2203 = vmatpush1.bf16.msra.mxu1 %v7031_v1 }
 0x904   : > { %7756 = vmatprep.subr.bf16.mxu0 %v8480_v2  ;;  %7778 = vmatprep.subr.bf16.mxu1 %v8481_v4 }
 0x906   : > { %7039 = vmatmul.mubr.msk.bf16.vlgmr.msra.gmra.mrb[24].mxu0 %vm626_vm1, %v9249_v30  ;;  %7040 = vmatmul.mubr.msk.bf16.vlgmr.msra.gmra.mrb[28].mxu1 %vm626_vm1, %v9249_v30  ;;  %v8503_v30 = vld [vmem:[%s10670_s12 + $0xa8] sm:$0xff]  }
 0x907   : > { %7757 = vmatpush3.bf16.msra.mxu0 %v8482_v5  ;;  %7779 = vmatpush3.bf16.msra.mxu1 %v8483_v6 }
 0x908   : > { %7758 = vmatprep.subr.bf16.mxu0 %v8484_v7  ;;  %7780 = vmatprep.subr.bf16.mxu1 %v8485_v8  ;;  %v1693_v8 = vrot.slane %v9435_v45, %v9452_v61 }
 0x90b   : > { %7759 = vmatpush3.bf16.msra.mxu0 %v8486_v9  ;;  %7781 = vmatpush3.bf16.msra.mxu1 %v8487_v10  ;;  %v1701_v9 = vrot.slane %v9435_v45, %v9455_v62  ;;  %v8514_v10 = vld [vmem:[%s10670_s12 + $0x100] sm:$0xff]  }
 0x90c   : > { %7760 = vmatprep.subr.bf16.mxu0 %v8488_v13  ;;  %7782 = vmatprep.subr.bf16.mxu1 %v8489_v14  ;;  %v8515_v13 = vld [vmem:[%s10670_s12 + $0x180] sm:$0xff]  }
 0x90f   : > { %7761 = vmatpush3.bf16.msra.mxu0 %v8490_v15  ;;  %7783 = vmatpush3.bf16.msra.mxu1 %v8491_v16  ;;  %v8516_v16 = vld [vmem:[%s10670_s12 + $0x148] sm:$0xff]  }
 0x910   : > { %7762 = vmatprep.subr.bf16.mxu0 %v8492_v17  ;;  %7784 = vmatprep.subr.bf16.mxu1 %v8493_v18  ;;  %v8517_v17 = vld [vmem:[%s10670_s12 + $0x1c8] sm:$0xff]  }
 0x913   : > { %7763 = vmatpush3.bf16.msra.mxu0 %v8494_v19  ;;  %7785 = vmatpush3.bf16.msra.mxu1 %v8495_v20 }
 0x914   : > { %7764 = vmatprep.subr.bf16.mxu0 %v8496_v21  ;;  %7786 = vmatprep.subr.bf16.mxu1 %v8497_v22 }
 0x917   : > { %7765 = vmatpush3.bf16.msra.mxu0 %v8498_v23  ;;  %7787 = vmatpush3.bf16.msra.mxu1 %v8499_v24 }
 0x918   : > { %7766 = vmatprep.subr.bf16.mxu0 %v8500_v25  ;;  %7788 = vmatprep.subr.bf16.mxu1 %v8501_v26  ;;  %v8518_v26 = vld [vmem:[%s10670_s12 + $0x108] sm:$0xff]  }
 0x91b   : > { %7767 = vmatpush3.bf16.msra.mxu0 %v8502_v27  ;;  %7789 = vmatpush3.bf16.msra.mxu1 %v8503_v30  ;;  %v8519_v27 = vld [vmem:[%s10670_s12 + $0x188] sm:$0xff]  }
 0x91c   : > { %7768 = vmatprep.subr.bf16.mxu0 %v8504_v31  ;;  %7790 = vmatprep.subr.bf16.mxu1 %v8505_v32  ;;  %v8520_v32 = vld [vmem:[%s10670_s12 + $0x150] sm:$0xff]  }
 0x91f   : > { %7769 = vmatpush3.bf16.msra.mxu0 %v8506_v33  ;;  %7791 = vmatpush3.bf16.msra.mxu1 %v8507_v34  ;;  %v8521_v33 = vld [vmem:[%s10670_s12 + $0x1d0] sm:$0xff]  }
 0x920   : > { %7770 = vmatprep.subr.bf16.mxu0 %v8508_v35  ;;  %7792 = vmatprep.subr.bf16.mxu1 %v8509_v36 }
 0x923   : > { %7771 = vmatpush3.bf16.msra.mxu0 %v8510_v37  ;;  %7793 = vmatpush3.bf16.msra.mxu1 %v8511_v38  ;;  %v8522_v38 = vld [vmem:[%s10670_s12 + $0x110] sm:$0xff]  }
 0x924   : > { %7800 = vmatprep.subr.bf16.mxu0 %v8512_v39  ;;  %7822 = vmatprep.subr.bf16.mxu1 %v8513_v40  ;;  %v8523_v39 = vld [vmem:[%s10670_s12 + $0x190] sm:$0xff]   ;;  %v8524_v40 = vld [vmem:[%s10670_s12 + $0x158] sm:$0xff]  }
 0x9c1   : > { %v1947_v52 = vpop.f32.mrb[12].mxu0  ;;  %v1988_v53 = vpop.f32.mrb[16].mxu1 }
 0x9c2   : > { %v1948_v54 = vadd.f32 %v1947_v52, %v1673_v48  ;;  %v1989_v55 = vadd.f32 %v1988_v53, %v1681_v49  ;;  %v1949_v29 = vpop.f32.mrb[13].mxu0  ;;  %v1990_v56 = vpop.f32.mrb[17].mxu1  ;;  %v8525_v48 = vld [vmem:[%s10670_s12 + $0x1d8] sm:$0xff]  }
 0x9c3   : > { %v1950_v57 = vadd.f32 %v1949_v29, %v1677_v50  ;;  %v1991_v58 = vadd.f32 %v1990_v56, %v1685_v51  ;;  %v1951_v59 = vpop.f32.mrb[14].mxu0  ;;  %v1992_v60 = vpop.f32.mrb[18].mxu1  ;;  %v8527_v29 = vld [vmem:[%s10670_s12 + $0x198] sm:$0xff]   ;;  %v9512_v56 = vsub.s32 6, %v9424_v42 }
 0x9c4   : > { %v2241_v63 = vmax.f32 %v1948_v54, 0.0  ;;  %v2243_v0 = vmax.f32 %v1989_v55, 0.0  ;;  %v1952_v1 = vpop.f32.mrb[15].mxu0  ;;  %v1993_v2 = vpop.f32.mrb[19].mxu1  ;;  %v8526_v55 = vld [vmem:[%s10670_s12 + $0x118] sm:$0xff]   ;;  %v8528_v59 = vld [vmem:[%s10670_s12 + $0x160] sm:$0xff]  }
 0x9c5   : > { %v2242_v4 = vmax.f32 %v1950_v57, 0.0  ;;  %v2244_v5 = vmax.f32 %v1991_v58, 0.0  ;;  %v8529_v60 = vld [vmem:[%s10670_s12 + $0x1e0] sm:$0xff]  }
 0x9c6   : > { %v2257_v14 = vpack.c.bf16 %v2241_v63, %v2241_v63  ;;  %v2259_v15 = vpack.c.bf16 %v2243_v0, %v2243_v0  ;;  %v9523_v63 = vld [vmem:[%s10669_s11 + $0x8] sm:$0xff]  ;;  %v8530_v1 = vld [vmem:[%s10670_s12 + $0x120] sm:$0xff]  }
 0x9c7   : > { %v2258_v6 = vpack.c.bf16 %v2242_v4, %v2242_v4  ;;  %v2260_v7 = vpack.c.bf16 %v2244_v5, %v2244_v5  ;;  %v1729_v0 = vrot.slane %v9523_v63, %v9512_v56  ;;  %v8531_v2 = vld [vmem:[%s10670_s12 + $0x1a0] sm:$0xff]   ;;  %v9534_v4 = vsub.s32 4, %v9424_v42  ;;  %v8532_v5 = vld [vmem:[%s10670_s12 + $0x168] sm:$0xff]  }
 0x9c9   : > { %v9473_v18 = vpop.f32.mrb[16].mxu0  ;;  %v9475_v19 = vpop.f32.mrb[20].mxu1  ;;  %3336 = vmatprep.mubr.bf16.mxu0 %v2258_v6  ;;  %3376 = vmatprep.mubr.bf16.mxu1 %v2260_v7  ;;  %v8533_v6 = vld [vmem:[%s10670_s12 + $0x1e8] sm:$0xff]  }
 0x9ca   : > { %v2031_v20 = vpop.f32.mrb[17].mxu0  ;;  %v2072_v21 = vpop.f32.mrb[21].mxu1  ;;  %3337 = vmatmul.mubr.bf16.vlgmr.msra.gmra.mrb[28].mxu0 %v2257_v14  ;;  %3377 = vmatmul.mubr.bf16.vlgmr.msra.gmra.mrb[32].mxu1 %v2259_v15 }
 0x9cb   : > { %v2032_v22 = vadd.f32 %v2031_v20, %v1693_v8  ;;  %v2073_v23 = vadd.f32 %v2072_v21, %v1701_v9  ;;  %7801 = vmatpush3.bf16.msra.mxu0 %v8514_v10  ;;  %7823 = vmatpush3.bf16.msra.mxu1 %v8515_v13  ;;  %v2033_v24 = vpop.f32.mrb[18].mxu0  ;;  %v2074_v25 = vpop.f32.mrb[22].mxu1  ;;  %v1689_v20 = vrot.slane %v9435_v45, %v9534_v4 }
 0x9cc   : > { %v2034_v30 = vpop.f32.mrb[19].mxu0  ;;  %v2075_v31 = vpop.f32.mrb[23].mxu1  ;;  %7802 = vmatprep.subr.bf16.mxu0 %v8516_v16  ;;  %7824 = vmatprep.subr.bf16.mxu1 %v8517_v17  ;;  %v8534_v16 = vld [vmem:[%s10670_s12 + $0x128] sm:$0xff]   ;;  %v1697_v21 = vrot.slane %v9435_v45, %v9512_v56  ;;  %v8536_v24 = vld [vmem:[%s10670_s12 + $0x170] sm:$0xff]  }
 0x9cd   : > { %v2246_v34 = vmax.f32 %v2032_v22, 0.0  ;;  %v2248_v35 = vmax.f32 %v2073_v23, 0.0  ;;  %v8535_v17 = vld [vmem:[%s10670_s12 + $0x1a8] sm:$0xff]   ;;  %v8537_v25 = vld [vmem:[%s10670_s12 + $0x1f0] sm:$0xff]   ;;  %v2030_v31 = vadd.f32 %v9473_v18, %v1689_v20  ;;  %v8542_v18 = vld [vmem:[%s10670_s12 + $0x138] sm:$0xff]  }
 0x9ce   : > { %v8538_v45 = vld [vmem:[%s10670_s12 + $0x130] sm:$0xff]   ;;  %v8561_v20 = vld [vmem:[%s10670_s12 + $0x2e0] sm:$0xff]  }
 0x9cf   : > { %v2262_v36 = vpack.c.bf16 %v2246_v34, %v2246_v34  ;;  %v2264_v37 = vpack.c.bf16 %v2248_v35, %v2248_v35  ;;  %7803 = vmatpush3.bf16.msra.mxu0 %v8518_v26  ;;  %7825 = vmatpush3.bf16.msra.mxu1 %v8519_v27  ;;  %v1709_v26 = vrot.slane %v9523_v63, %v9438_v46  ;;  %v8539_v30 = vld [vmem:[%s10670_s12 + $0x1b0] sm:$0xff]   ;;  %v8541_v34 = vld [vmem:[%s10670_s12 + $0x1f8] sm:$0xff]  }
 0x9d0   : > { %7804 = vmatprep.subr.bf16.mxu0 %v8520_v32  ;;  %7826 = vmatprep.subr.bf16.mxu1 %v8521_v33  ;;  %v1717_v27 = vrot.slane %v9523_v63, %v9441_v47  ;;  %v2071_v32 = vadd.f32 %v9475_v19, %v1697_v21  ;;  %v8540_v33 = vld [vmem:[%s10670_s12 + $0x178] sm:$0xff]   ;;  %v8562_v21 = vld [vmem:[%s10670_s12 + $0x220] sm:$0xff]  }
 0x9d1   : > { %v9501_v49 = vpop.f32.mrb[20].mxu0  ;;  %v9503_v50 = vpop.f32.mrb[24].mxu1  ;;  %3416 = vmatprep.mubr.bf16.mxu0 %v2262_v36  ;;  %3456 = vmatprep.mubr.bf16.mxu1 %v2264_v37  ;;  %v8543_v19 = vld [vmem:[%s10670_s12 + $0x1b8] sm:$0xff]   ;;  %v2245_v37 = vmax.f32 %v2030_v31, 0.0  ;;  %v8569_v31 = vld [vmem:[%s10670_s12 + $0x2f0] sm:$0xff]  }
 0x9d2   : > { %v2113_v51 = vpop.f32.mrb[21].mxu0  ;;  %v2154_v52 = vpop.f32.mrb[25].mxu1 }
 0x9d3   : > { %7805 = vmatpush3.bf16.msra.mxu0 %v8522_v38  ;;  %7827 = vmatpush3.bf16.msra.mxu1 %v8523_v39  ;;  %v2115_v53 = vpop.f32.mrb[22].mxu0  ;;  %v2156_v54 = vpop.f32.mrb[26].mxu1  ;;  %v2114_v35 = vadd.f32 %v2113_v51, %v1709_v26  ;;  %v2155_v36 = vadd.f32 %v2154_v52, %v1717_v27  ;;  %v2247_v38 = vmax.f32 %v2071_v32, 0.0  ;;  %v8544_v39 = vld [vmem:[%s10670_s12 + $0x240] sm:$0xff]   ;;  %v1705_v26 = vrot.slane %v9523_v63, %v9427_v43  ;;  %v8567_v27 = vld [vmem:[%s10670_s12 + $0x2a8] sm:$0xff]  }
 0x9d4   : > { %v2116_v57 = vpop.f32.mrb[23].mxu0  ;;  %v2157_v58 = vpop.f32.mrb[27].mxu1  ;;  %7806 = vmatprep.subr.bf16.mxu0 %v8524_v40  ;;  %7828 = vmatprep.subr.bf16.mxu1 %v8525_v48  ;;  %v8545_v40 = vld [vmem:[%s10670_s12 + $0x2c0] sm:$0xff]   ;;  %v2261_v53 = vpack.c.bf16 %v2245_v37, %v2245_v37  ;;  %v1725_v32 = vrot.slane %v9523_v63, %v9452_v61  ;;  %v8573_v37 = vld [vmem:[%s10670_s12 + $0x2f8] sm:$0xff]  }
 0x9d5   : > { %v2250_v48 = vmax.f32 %v2114_v35, 0.0  ;;  %v2252_v51 = vmax.f32 %v2155_v36, 0.0  ;;  %v8546_v52 = vld [vmem:[%s10670_s12 + $0x200] sm:$0xff]   ;;  %v2263_v54 = vpack.c.bf16 %v2247_v38, %v2247_v38  ;;  %v8548_v57 = vld [vmem:[%s10670_s12 + $0x248] sm:$0xff]   ;;  %v2112_v35 = vadd.f32 %v9501_v49, %v1705_v26  ;;  %v8571_v36 = vld [vmem:[%s10670_s12 + $0x2b0] sm:$0xff]  }
 0x9d6   : > { %v8549_v58 = vld [vmem:[%s10670_s12 + $0x2c8] sm:$0xff]  }
 0x9d7   : > { %7807 = vmatpush3.bf16.msra.mxu0 %v8526_v55  ;;  %7829 = vmatpush3.bf16.msra.mxu1 %v8527_v29  ;;  %v8547_v55 = vld [vmem:[%s10670_s12 + $0x280] sm:$0xff]   ;;  %v2266_v29 = vpack.c.bf16 %v2250_v48, %v2250_v48  ;;  %v8598_v26 = vld [vmem:[%s10670_s12 + $0x328] sm:$0xff]  }
 0x9d8   : > { %7808 = vmatprep.subr.bf16.mxu0 %v8528_v59  ;;  %7830 = vmatprep.subr.bf16.mxu1 %v8529_v60  ;;  %v2268_v59 = vpack.c.bf16 %v2252_v51, %v2252_v51  ;;  %v8550_v60 = vld [vmem:[%s10670_s12 + $0x208] sm:$0xff]   ;;  %v8576_v48 = vld [vmem:[%s10670_s12 + $0x340] sm:$0xff]  }
 0x9d9   : > { %v9542_v7 = vpop.f32.mrb[24].mxu0  ;;  %v2234_v8 = vpop.f32.mrb[28].mxu1 }
 0x9da   : > { %v9544_v9 = vadd.f32 %v2234_v8, %v1729_v0  ;;  %v9546_v10 = vpop.f32.mrb[25].mxu0  ;;  %v9548_v13 = vpop.f32.mrb[29].mxu1  ;;  %v8551_v0 = vld [vmem:[%s10670_s12 + $0x288] sm:$0xff]   ;;  %v8556_v8 = vld [vmem:[%s10670_s12 + $0x258] sm:$0xff]  }
 0x9db   : > { %7809 = vmatpush3.bf16.msra.mxu0 %v8530_v1  ;;  %7831 = vmatpush3.bf16.msra.mxu1 %v8531_v2  ;;  %v2197_v14 = vpop.f32.mrb[26].mxu0  ;;  %v2238_v15 = vpop.f32.mrb[30].mxu1  ;;  %v8552_v1 = vld [vmem:[%s10670_s12 + $0x250] sm:$0xff]   ;;  %v2196_v38 = vadd.f32 %v9546_v10, %v1725_v32  ;;  %v8577_v10 = vld [vmem:[%s10670_s12 + $0x3c0] sm:$0xff]  }
 0x9dc   : > { %v2198_v22 = vpop.f32.mrb[27].mxu0  ;;  %v2239_v23 = vpop.f32.mrb[31].mxu1  ;;  %7810 = vmatprep.subr.bf16.mxu0 %v8532_v5  ;;  %7832 = vmatprep.subr.bf16.mxu1 %v8533_v6  ;;  %v8553_v2 = vld [vmem:[%s10670_s12 + $0x2d0] sm:$0xff]   ;;  %v8557_v14 = vld [vmem:[%s10670_s12 + $0x2d8] sm:$0xff]  }
 0x9dd   : > { %v8554_v5 = vld [vmem:[%s10670_s12 + $0x210] sm:$0xff]   ;;  %v8558_v15 = vld [vmem:[%s10670_s12 + $0x218] sm:$0xff]   ;;  %v8563_v22 = vld [vmem:[%s10670_s12 + $0x2a0] sm:$0xff]  }
 0x9de   : > { %v8555_v6 = vld [vmem:[%s10670_s12 + $0x290] sm:$0xff]   ;;  %v8564_v23 = vld [vmem:[%s10670_s12 + $0x268] sm:$0xff]  }
 0x9df   : > { %7811 = vmatpush3.bf16.msra.mxu0 %v8534_v16  ;;  %7833 = vmatpush3.bf16.msra.mxu1 %v8535_v17  ;;  %v8559_v16 = vld [vmem:[%s10670_s12 + $0x298] sm:$0xff]   ;;  %v8560_v17 = vld [vmem:[%s10670_s12 + $0x260] sm:$0xff]  }
 0x9e0   : > { %7812 = vmatprep.subr.bf16.mxu0 %v8536_v24  ;;  %7834 = vmatprep.subr.bf16.mxu1 %v8537_v25  ;;  %v8565_v24 = vld [vmem:[%s10670_s12 + $0x2e8] sm:$0xff]  }
 0x9e1   : > { %v8566_v25 = vld [vmem:[%s10670_s12 + $0x228] sm:$0xff]  }
 0x9e3   : > { %7813 = vmatpush3.bf16.msra.mxu0 %v8538_v45  ;;  %7835 = vmatpush3.bf16.msra.mxu1 %v8539_v30  ;;  %v8568_v45 = vld [vmem:[%s10670_s12 + $0x270] sm:$0xff]   ;;  %v1713_v30 = vrot.slane %v9523_v63, %v9430_v44 }
 0x9e4   : > { %7814 = vmatprep.subr.bf16.mxu0 %v8540_v33  ;;  %7836 = vmatprep.subr.bf16.mxu1 %v8541_v34  ;;  %v1733_v33 = vrot.slane %v9523_v63, %v9455_v62  ;;  %v8570_v34 = vld [vmem:[%s10670_s12 + $0x230] sm:$0xff]  }
 0x9e6   : > { %v2237_v49 = vadd.f32 %v9548_v13, %v1733_v33  ;;  %v2254_v13 = vmax.f32 %v2196_v38, 0.0  ;;  %v8603_v33 = vld [vmem:[%s10670_s12 + $0x3b0] sm:$0xff]  }
 0x9e7   : > { %7815 = vmatpush3.bf16.msra.mxu0 %v8542_v18  ;;  %7837 = vmatpush3.bf16.msra.mxu1 %v8543_v19  ;;  %v8572_v18 = vld [vmem:[%s10670_s12 + $0x278] sm:$0xff]   ;;  %v2153_v19 = vadd.f32 %v9503_v50, %v1713_v30  ;;  %v8600_v30 = vld [vmem:[%s10670_s12 + $0x370] sm:$0xff]  }
 0x9e8   : > { %7844 = vmatprep.subr.bf16.mxu0 %v8544_v39  ;;  %7866 = vmatprep.subr.bf16.mxu1 %v8545_v40  ;;  %v8574_v39 = vld [vmem:[%s10670_s12 + $0x238] sm:$0xff]   ;;  %v2249_v40 = vmax.f32 %v2112_v35, 0.0 }
 0x9e9   : > { %v8575_v50 = vld [vmem:[%s10670_s12 + $0x2b8] sm:$0xff]   ;;  %v2251_v51 = vmax.f32 %v2153_v19, 0.0  ;;  %v2255_v19 = vmax.f32 %v9544_v9, 0.0  ;;  %v7041_v9 = vld [vmem:[%s10671_s13] ss:$0 sm:$0xff] }
 0x9ea   : > { %3417 = vmatmul.mubr.bf16.vlgmr.msra.gmra.mrb[32].mxu0 %v2261_v53  ;;  %3457 = vmatmul.mubr.bf16.vlgmr.msra.gmra.mrb[36].mxu1 %v2263_v54  ;;  %v8578_v53 = vld [vmem:[%s10670_s12 + $0x300] sm:$0xff]   ;;  %v2265_v54 = vpack.c.bf16 %v2249_v40, %v2249_v40  ;;  %v8605_v35 = vld [vmem:[%s10670_s12 + $0x3f8] sm:$0xff]  }
 0x9eb   : > { %7845 = vmatpush3.bf16.msra.mxu0 %v8546_v52  ;;  %3496 = vmatprep.mubr.bf16.mxu0 %v2266_v29  ;;  %v2256_v52 = vmax.f32 %v2237_v49, 0.0  ;;  %v2267_v29 = vpack.c.bf16 %v2251_v51, %v2251_v51  ;;  %v2271_v38 = vpack.c.bf16 %v2255_v19, %v2255_v19 }
 0x9ec   : > { %7867 = vmatpush3.bf16.msra.mxu1 %v8547_v55  ;;  %3536 = vmatprep.mubr.bf16.mxu1 %v2268_v59  ;;  %v8579_v55 = vld [vmem:[%s10670_s12 + $0x380] sm:$0xff]   ;;  %v8581_v59 = vld [vmem:[%s10670_s12 + $0x3c8] sm:$0xff]  }
 0x9ed   : > { %7846 = vmatprep.subr.bf16.mxu0 %v8548_v57  ;;  %7868 = vmatprep.subr.bf16.mxu1 %v8549_v58  ;;  %v8580_v57 = vld [vmem:[%s10670_s12 + $0x348] sm:$0xff]   ;;  %v2270_v58 = vpack.c.bf16 %v2254_v13, %v2254_v13 }
 0x9ef   : > { %7847 = vmatpush3.bf16.msra.mxu0 %v8550_v60  ;;  %v2272_v60 = vpack.c.bf16 %v2256_v52, %v2256_v52 }
 0x9f0   : > { %7869 = vmatpush3.bf16.msra.mxu1 %v8551_v0  ;;  %7848 = vmatprep.subr.bf16.mxu0 %v8552_v1  ;;  %v8582_v0 = vld [vmem:[%s10670_s12 + $0x308] sm:$0xff]  }
 0x9f1   : > { %7870 = vmatprep.subr.bf16.mxu1 %v8553_v2  ;;  %v8583_v1 = vld [vmem:[%s10670_s12 + $0x388] sm:$0xff]   ;;  %v8584_v2 = vld [vmem:[%s10670_s12 + $0x350] sm:$0xff]  }
 0x9f3   : > { %7849 = vmatpush3.bf16.msra.mxu0 %v8554_v5  ;;  %v8585_v5 = vld [vmem:[%s10670_s12 + $0x3d0] sm:$0xff]  }
 0x9f4   : > { %7871 = vmatpush3.bf16.msra.mxu1 %v8555_v6  ;;  %7850 = vmatprep.subr.bf16.mxu0 %v8556_v8  ;;  %v8586_v6 = vld [vmem:[%s10670_s12 + $0x310] sm:$0xff]  }
 0x9f5   : > { %7872 = vmatprep.subr.bf16.mxu1 %v8557_v14  ;;  %v8587_v8 = vld [vmem:[%s10670_s12 + $0x390] sm:$0xff]   ;;  %v8588_v14 = vld [vmem:[%s10670_s12 + $0x358] sm:$0xff]  }
 0x9f7   : > { %7851 = vmatpush3.bf16.msra.mxu0 %v8558_v15  ;;  %v8589_v15 = vld [vmem:[%s10670_s12 + $0x3d8] sm:$0xff]  }
 0x9f8   : > { %7873 = vmatpush3.bf16.msra.mxu1 %v8559_v16  ;;  %7852 = vmatprep.subr.bf16.mxu0 %v8560_v17  ;;  %v8590_v16 = vld [vmem:[%s10670_s12 + $0x318] sm:$0xff]  }
 0x9f9   : > { %7874 = vmatprep.subr.bf16.mxu1 %v8561_v20  ;;  %v8591_v17 = vld [vmem:[%s10670_s12 + $0x398] sm:$0xff]   ;;  %v8592_v20 = vld [vmem:[%s10670_s12 + $0x360] sm:$0xff]  }
 0x9fb   : > { %7853 = vmatpush3.bf16.msra.mxu0 %v8562_v21  ;;  %v8593_v21 = vld [vmem:[%s10670_s12 + $0x3e0] sm:$0xff]  }
 0x9fc   : > { %7875 = vmatpush3.bf16.msra.mxu1 %v8563_v22  ;;  %7854 = vmatprep.subr.bf16.mxu0 %v8564_v23  ;;  %v8594_v22 = vld [vmem:[%s10670_s12 + $0x320] sm:$0xff]  }
 0x9fd   : > { %7876 = vmatprep.subr.bf16.mxu1 %v8565_v24  ;;  %v8595_v23 = vld [vmem:[%s10670_s12 + $0x3a0] sm:$0xff]   ;;  %v8596_v24 = vld [vmem:[%s10670_s12 + $0x368] sm:$0xff]  }
 0x9ff   : > { %7855 = vmatpush3.bf16.msra.mxu0 %v8566_v25  ;;  %v8597_v25 = vld [vmem:[%s10670_s12 + $0x3e8] sm:$0xff]  }
 0xa00   : > { %7877 = vmatpush3.bf16.msra.mxu1 %v8567_v27  ;;  %7856 = vmatprep.subr.bf16.mxu0 %v8568_v45  ;;  %v1721_v27 = vrot.slane %v9523_v63, %v9534_v4  ;;  %v8599_v45 = vld [vmem:[%s10670_s12 + $0x3a8] sm:$0xff]   ;;  %v8602_v63 = vld [vmem:[%s10670_s12 + $0x330] sm:$0xff]  }
 0xa01   : > { %7878 = vmatprep.subr.bf16.mxu1 %v8569_v31  ;;  %v8601_v31 = vld [vmem:[%s10670_s12 + $0x3f0] sm:$0xff]  }
 0xa02   : > { %v2194_v32 = vadd.f32 %v9542_v7, %v1721_v27  ;;  %v8606_v7 = vld [vmem:[%s10670_s12 + $0x338] sm:$0xff]  }
 0xa03   : > { %7857 = vmatpush3.bf16.msra.mxu0 %v8570_v34  ;;  %v8604_v34 = vld [vmem:[%s10670_s12 + $0x378] sm:$0xff]  }
 0xa04   : > { %7879 = vmatpush3.bf16.msra.mxu1 %v8571_v36  ;;  %7858 = vmatprep.subr.bf16.mxu0 %v8572_v18  ;;  %v2253_v36 = vmax.f32 %v2194_v32, 0.0  ;;  %v8607_v18 = vld [vmem:[%s10670_s12 + $0x3b8] sm:$0xff]  }
 0xa05   : > { %7880 = vmatprep.subr.bf16.mxu1 %v8573_v37 }
 0xa06   : > { %v2269_v37 = vpack.c.bf16 %v2253_v36, %v2253_v36 }
 0xa07   : > { %7859 = vmatpush3.bf16.msra.mxu0 %v8574_v39 }
 0xa08   : > { %7881 = vmatpush3.bf16.msra.mxu1 %v8575_v50  ;;  %7888 = vmatprep.subr.bf16.mxu0 %v8576_v48 }
 0xa09   : > { %7910 = vmatprep.subr.bf16.mxu1 %v8577_v10 }
 0xa0a   : > { %3497 = vmatmul.mubr.bf16.vlgmr.msra.gmra.mrb[36].mxu0 %v2265_v54 }
 0xa0b   : > { %3537 = vmatmul.mubr.bf16.vlgmr.msra.gmra.mrb[40].mxu1 %v2267_v29  ;;  %7889 = vmatpush3.bf16.msra.mxu0 %v8578_v53 }
 0xa0c   : > { %3576 = vmatprep.mubr.bf16.mxu0 %v2270_v58  ;;  %7911 = vmatpush3.bf16.msra.mxu1 %v8579_v55 }
 0xa0d   : > { %3616 = vmatprep.mubr.bf16.mxu1 %v2272_v60  ;;  %7890 = vmatprep.subr.bf16.mxu0 %v8580_v57 }
 0xa0e   : > { %7912 = vmatprep.subr.bf16.mxu1 %v8581_v59 }
 0xa0f   : > { %7891 = vmatpush3.bf16.msra.mxu0 %v8582_v0 }
 0xa10   : > { %7913 = vmatpush3.bf16.msra.mxu1 %v8583_v1  ;;  %7892 = vmatprep.subr.bf16.mxu0 %v8584_v2 }
 0xa11   : > { %7914 = vmatprep.subr.bf16.mxu1 %v8585_v5 }
 0xa13   : > { %7893 = vmatpush3.bf16.msra.mxu0 %v8586_v6 }
 0xa14   : > { %7915 = vmatpush3.bf16.msra.mxu1 %v8587_v8  ;;  %7894 = vmatprep.subr.bf16.mxu0 %v8588_v14 }
 0xa15   : > { %7916 = vmatprep.subr.bf16.mxu1 %v8589_v15 }
 0xa17   : > { %7895 = vmatpush3.bf16.msra.mxu0 %v8590_v16 }
 0xa18   : > { %7917 = vmatpush3.bf16.msra.mxu1 %v8591_v17  ;;  %7896 = vmatprep.subr.bf16.mxu0 %v8592_v20 }
 0xa19   : > { %7918 = vmatprep.subr.bf16.mxu1 %v8593_v21 }
 0xa1b   : > { %7897 = vmatpush3.bf16.msra.mxu0 %v8594_v22 }
 0xa1c   : > { %7919 = vmatpush3.bf16.msra.mxu1 %v8595_v23  ;;  %7898 = vmatprep.subr.bf16.mxu0 %v8596_v24 }
 0xa1d   : > { %7920 = vmatprep.subr.bf16.mxu1 %v8597_v25 }
 0xa1f   : > { %7899 = vmatpush3.bf16.msra.mxu0 %v8598_v26 }
 0xa20   : > { %7921 = vmatpush3.bf16.msra.mxu1 %v8599_v45  ;;  %7900 = vmatprep.subr.bf16.mxu0 %v8600_v30 }
 0xa21   : > { %7922 = vmatprep.subr.bf16.mxu1 %v8601_v31 }
 0xa23   : > { %7901 = vmatpush3.bf16.msra.mxu0 %v8602_v63 }
 0xa24   : > { %7923 = vmatpush3.bf16.msra.mxu1 %v8603_v33  ;;  %7902 = vmatprep.subr.bf16.mxu0 %v8604_v34 }
 0xa25   : > { %7924 = vmatprep.subr.bf16.mxu1 %v8605_v35 }
 0xa27   : > { %7903 = vmatpush3.bf16.msra.mxu0 %v8606_v7 }
 0xa28   : > { %7925 = vmatpush3.bf16.msra.mxu1 %v8607_v18  ;;  %8394 = vmatprep.subr.bf16.mxu0 %v8838_v3 }
 0xa29   : > { %8400 = vmatprep.subr.bf16.mxu1 %v8838_v3 }
 0xa2a   : > { %3577 = vmatmul.mubr.bf16.vlgmr.msra.gmra.mrb[40].mxu0 %v2269_v37 }
 0xa2b   : > { %3617 = vmatmul.mubr.bf16.vlgmr.msra.gmra.mrb[44].mxu1 %v2271_v38  ;;  %8260 = vmatprep.mubr.msk.f32.mxu0 %vm8839_vm0, %v8840_v11 }
 0xa2c   : > { %8271 = vmatprep.mubr.msk.f32.mxu1 %vm8839_vm0, %v8840_v11 }
 0xa9d   : > { %v7772_v49 = vpop.f32.mrb[28].mxu0  ;;  %v7794_v39 = vpop.f32.mrb[32].mxu1 }
 0xa9e   : > { %v7773_v40 = vpop.f32.mrb[29].mxu0  ;;  %v7795_v50 = vpop.f32.mrb[33].mxu1 }
 0xa9f   : > { %v7774_v48 = vadd.f32 %v7773_v40, %v7772_v49  ;;  %v7796_v51 = vadd.f32 %v7795_v50, %v7794_v39  ;;  %v7775_v10 = vpop.f32.mrb[30].mxu0  ;;  %v7797_v13 = vpop.f32.mrb[34].mxu1 }
 0xaa0   : > { %v7776_v52 = vpop.f32.mrb[31].mxu0  ;;  %v7798_v53 = vpop.f32.mrb[35].mxu1  ;;  %v7173_v10 = vld [vmem:[%s10703_s2 + $0x48] sm:$0xff] }
 0xaa1   : > { %v3339_v54 = vadd.f32 %v7774_v48, %v7041_v9  ;;  %v7180_v52 = vld [vmem:[%s10701_s29 + $0x48] sm:$0xff] }
 0xaa3   : > { %v3379_v55 = vadd.f32 %v7796_v51, %v3339_v54  ;;  %v7172_v51 = vld [vmem:[%s10703_s2 + $0x40] sm:$0xff]  ;;  %v7174_v54 = vld [vmem:[%s10703_s2 + $0x50] sm:$0xff] }
 0xaa4   : > { %v8395_v13 = vpack.c.bf16 %v7173_v10, %v7172_v51 }
 0xaa6   : > { %8396 = vmatpush3.bf16.msra.mxu0 %v8395_v13 }
 0xaa7   : > { %8397 = vmatprep.subr.bf16.mxu0 %v8838_v3 }
 0xabd   : > { %v7816_v29 = vpop.f32.mrb[32].mxu0  ;;  %v7838_v57 = vpop.f32.mrb[36].mxu1 }
 0xabe   : > { %v7817_v58 = vpop.f32.mrb[33].mxu0  ;;  %v7839_v59 = vpop.f32.mrb[37].mxu1 }
 0xabf   : > { %v7818_v60 = vadd.f32 %v7817_v58, %v7816_v29  ;;  %v7840_v0 = vadd.f32 %v7839_v59, %v7838_v57  ;;  %v7819_v1 = vpop.f32.mrb[34].mxu0  ;;  %v7841_v2 = vpop.f32.mrb[38].mxu1  ;;  %v7181_v57 = vld [vmem:[%s10701_s29 + $0x50] sm:$0xff]  ;;  %v7182_v58 = vld [vmem:[%s10701_s29 + $0x58] sm:$0xff] }
 0xac0   : > { %v7820_v5 = vpop.f32.mrb[35].mxu0  ;;  %v7842_v6 = vpop.f32.mrb[39].mxu1  ;;  %v8404_v59 = vpack.c.bf16 %v7182_v58, %v7181_v57 }
 0xac1   : > { %v3419_v8 = vadd.f32 %v7818_v60, %v3379_v55  ;;  %v7175_v55 = vld [vmem:[%s10703_s2 + $0x58] sm:$0xff]  ;;  %v7170_v5 = vld [vmem:[%s10674_s16] ss:$0 sm:$0xff] }
 0xac2   : > { %v8398_v29 = vpack.c.bf16 %v7175_v55, %v7174_v54  ;;  %v8773_v55 = vld [vmem:[%s9079_s28] ss:$0 sm:$0xff]  ;;  %s604_s28 = scalar_lea.vmem [#allocation2], %s6958_s0  ;;  %s8778_s0 = sshll.u32 %s8843_s1, 4  ;;  %s8779_s0 = int_to_ptr.vmem [resolvable:$false] %s8778_s0 }
 0xac3   : > { %v3459_v14 = vadd.f32 %v7840_v0, %v3419_v8  ;;  %v7186_v8 = vld [vmem:[%s10662_s4 + $0x40] sm:$0xff]  ;;  %s6886_s23 = sshll.u32 %s604_s28, 4  ;;  %s10618_s23 = int_to_ptr.vmem [resolvable:$true] %s6886_s23 }
 0xac4   : > { %8399 = vmatpush3.bf16.msra.mxu0 %v8398_v29  ;;  %s8774_s27 = scalar_lea.vmem %s10618_s23, 64  ;;  %p8781_p0 = scmp.lt.s32.totalorder %s10618_s23, %s8779_s0 }
 0xac5   : > { %8406 = vmatprep.subr.bf16.mxu0 %v8838_v3  ;;  %p8775_p11 = scmp.ne.s32.totalorder %s10618_s23, %s8774_s27 }
 0xac7   : > { %p8776_p12 = pnand %p8775_p11, %p8982_p5 }
 0xac9   : > { %p8777_p13 = pneg %p8776_p12 }
 0xadd   : > { %v7860_v15 = vpop.f32.mrb[36].mxu0 }
 0xade   : > { %v7882_v16 = vpop.f32.mrb[40].mxu1  ;;  %v7861_v17 = vpop.f32.mrb[37].mxu0 }
 0xadf   : > { %v7862_v20 = vadd.f32 %v7861_v17, %v7860_v15  ;;  %v7883_v21 = vpop.f32.mrb[41].mxu1  ;;  %v7863_v22 = vpop.f32.mrb[38].mxu0  ;;  %v7171_v15 = vld [vmem:[%s10675_s17] ss:$0 sm:$0xff] }
 0xae0   : > { %v7884_v23 = vadd.f32 %v7883_v21, %v7882_v16  ;;  %v7885_v24 = vpop.f32.mrb[42].mxu1  ;;  %v7864_v25 = vpop.f32.mrb[39].mxu0  ;;  %v7188_v21 = vld [vmem:[%s10662_s4 + $0x50] sm:$0xff]  ;;  %v7189_v22 = vld [vmem:[%s10662_s4 + $0x58] sm:$0xff] }
 0xae1   : > { %v3499_v26 = vadd.f32 %v7862_v20, %v3459_v14  ;;  %v7886_v27 = vpop.f32.mrb[43].mxu1  ;;  %v7187_v14 = vld [vmem:[%s10662_s4 + $0x48] sm:$0xff]  ;;  %v7198_v24 = vld [vmem:[%s10703_s2 + $0x60] sm:$0xff] }
 0xae2   : > { %v8407_v17 = vpack.c.bf16 %v7187_v14, %v7186_v8  ;;  %v7199_v25 = vld [vmem:[%s10703_s2 + $0x68] sm:$0xff]  ;;  %v7200_v27 = vld [vmem:[%s10703_s2 + $0x70] sm:$0xff] }
 0xae3   : > { %v3539_v45 = vadd.f32 %v7884_v23, %v3499_v26  ;;  %v8410_v23 = vpack.c.bf16 %v7189_v22, %v7188_v21  ;;  %v8413_v26 = vpack.c.bf16 %v7199_v25, %v7198_v24  ;;  %v7210_v24 = vld [vmem:[%s10664_s6 + $0x3] ss:$0 sm:$0xff] }
 0xafd   : > { %v7904_v30 = vpop.f32.mrb[40].mxu0 }
 0xafe   : > { %v7926_v31 = vpop.f32.mrb[44].mxu1  ;;  %v7905_v63 = vpop.f32.mrb[41].mxu0 }
 0xaff   : > { %v7906_v32 = vadd.f32 %v7905_v63, %v7904_v30  ;;  %v7927_v33 = vpop.f32.mrb[45].mxu1  ;;  %v7907_v34 = vpop.f32.mrb[42].mxu0  ;;  %v7213_v63 = vld [vmem:[%s10662_s4 + $0x68] sm:$0xff] }
 0xb00   : > { %v7928_v35 = vadd.f32 %v7927_v33, %v7926_v31  ;;  %v7929_v7 = vpop.f32.mrb[46].mxu1  ;;  %v7908_v36 = vpop.f32.mrb[43].mxu0  ;;  %v7212_v31 = vld [vmem:[%s10662_s4 + $0x60] sm:$0xff]  ;;  %v7214_v33 = vld [vmem:[%s10662_s4 + $0x70] sm:$0xff]  ;;  %v7215_v34 = vld [vmem:[%s10662_s4 + $0x78] sm:$0xff] }
 0xb01   : > { %v3579_v18 = vadd.f32 %v7906_v32, %v3539_v45  ;;  %v7930_v19 = vpop.f32.mrb[47].mxu1  ;;  %v7201_v45 = vld [vmem:[%s10703_s2 + $0x78] sm:$0xff]  ;;  %v8425_v32 = vpack.c.bf16 %v7213_v63, %v7212_v31  ;;  %v7184_v7 = vld [vmem:[%s10664_s6 + $0x2] ss:$0 sm:$0xff]  ;;  %s8780_s2 = scalar_lea.vmem %s8779_s0, 128 }
 0xb02   : > { %v8416_v30 = vpack.c.bf16 %v7201_v45, %v7200_v27  ;;  %v7177_v19 = vld [vmem:[%s10663_s5 + $0x2] ss:$0 sm:$0xff]  ;;  %p8782_p1 = scmp.lt.s32.totalorder %s8780_s2, %s8774_s27 }
 0xb03   : > { %v3619_v37 = vadd.f32 %v7928_v35, %v3579_v18  ;;  %v8428_v35 = vpack.c.bf16 %v7215_v34, %v7214_v33 }
 0xb04   : > { %p8783_p2 = por %p8782_p1, %p8781_p0 }
 0xb05   : > { %v3624_v38 = vadd.f32 %v3619_v37, %v9245_v28  ;;  %v7179_v28 = vld [vmem:[%s10701_s29 + $0x40] sm:$0xff] }
 0xb06   : > { %v8401_v53 = vpack.c.bf16 %v7180_v52, %v7179_v28  ;;  %p8784_p3 = pnand %p8783_p2, %p8777_p13 }
 0xb07   : > { %v3627_v49 = vsel %vm626_vm1, %v3624_v38, 0.0 }
 0xb08   : > { %3628 = vadd.xlane.f32.xlu0 %v3627_v49  ;;  %8402 = vmatpush3.bf16.msra.mxu1 %v8401_v53 }
 0xb09   : > { %8403 = vmatprep.subr.bf16.mxu1 %v8838_v3 }
 0xb0c   : > { %8405 = vmatpush3.bf16.msra.mxu1 %v8404_v59 }
 0xb0d   : > { %8285 = vmatprep.subr.mxu1 %v8840_v11 }
 0xb95   : > { %v3629_v39 = vpop.xlane.xlu0 %3628 }
 0xb96   : > { %v3630_v9 = vmul.f32 0.03125, %v3629_v39 }
 0xb98   : > { %v3631_v40 = vsub.f32 %v3624_v38, %v3630_v9  ;;  %v7191_v9 = vld [vmem:[%s10665_s7 + $0x2] ss:$0 sm:$0xff] }
 0xb9a   : > { %v3632_v50 = vmul.f32 %v3631_v40, %v3631_v40 }
 0xb9c   : > { %v3633_v48 = vsel %vm626_vm1, %v3632_v50, 0.0 }
 0xb9d   : > { %3634 = vadd.xlane.f32.xlu1 %v3633_v48 }
 0xc2a   : > { %v3635_v60 = vpop.xlane.xlu1 %3634 }
 0xc2b   : > { %v3636_v0 = vmul.f32 0.03125, %v3635_v60 }
 0xc2d   : > { %v3637_v1 = vadd.f32 1e-05, %v3636_v0 }
 0xc2f   : > { %8758 = vrsqrt.f32 %v3637_v1 }
 0xc39   : > { %v8759_v2 = vpop.eup %8758 }
 0xc3a   : > { %v3639_v6 = vmul.f32 %v8759_v2, %v3631_v40 }
 0xc3c   : > { %v3646_v16 = vmul.f32 %v7170_v5, %v3639_v6  ;;  %v7205_v5 = vld [vmem:[%s10701_s29 + $0x60] sm:$0xff]  ;;  %v7206_v6 = vld [vmem:[%s10701_s29 + $0x68] sm:$0xff] }
 0xc3d   : > { %v8419_v14 = vpack.c.bf16 %v7206_v6, %v7205_v5  ;;  %v7232_v6 = vld [vmem:[%s10668_s10 + $0x100] sm:$0xff] }
 0xc3e   : > { %v9850_v20 = vadd.f32 %v7171_v15, %v3646_v16  ;;  %v7207_v16 = vld [vmem:[%s10701_s29 + $0x70] sm:$0xff] }
 0xc40   : > { %8261 = vmatmul.mubr.msk.f32.vlgmr.msra.gmra.mrb[10].mxu0 %vm626_vm1, %v9850_v20  ;;  %8272 = vmatmul.mubr.msk.f32.vlgmr.msra.gmra.mrb[14].mxu1 %vm626_vm1, %v9850_v20 }
 0xc41   : > { %8408 = vmatpush3.bf16.msra.mxu0 %v8407_v17  ;;  %8282 = vmatprep.mubr.msk.f32.mxu0 %vm8839_vm0, %v8840_v11  ;;  %v7208_v17 = vld [vmem:[%s10701_s29 + $0x78] sm:$0xff] }
 0xc42   : > { %8409 = vmatprep.subr.bf16.mxu0 %v8838_v3  ;;  %8287 = vmatprep.mubr.msk.f32.mxu1 %vm8839_vm0, %v8840_v11  ;;  %v8422_v21 = vpack.c.bf16 %v7208_v17, %v7207_v16 }
 0xc45   : > { %8411 = vmatpush3.bf16.msra.mxu0 %v8410_v23 }
 0xc46   : > { %8412 = vmatprep.subr.bf16.mxu0 %v8838_v3 }
 0xc48   : > { %8283 = vmatmul.mubr.msk.f32.vlgmr.msra.gmra.mrb[44].mxu0 %vm626_vm1, %v9850_v20 }
 0xc49   : > { %8414 = vmatpush3.bf16.msra.mxu0 %v8413_v26  ;;  %8303 = vmatprep.mubr.msk.f32.mxu0 %vm8839_vm0, %v8840_v11  ;;  %v7203_v26 = vld [vmem:[%s10663_s5 + $0x3] ss:$0 sm:$0xff] }
 0xc4a   : > { %8415 = vmatprep.subr.bf16.mxu0 %v8838_v3 }
 0xc4d   : > { %8417 = vmatpush3.bf16.msra.mxu0 %v8416_v30  ;;  %v7217_v30 = vld [vmem:[%s10665_s7 + $0x3] ss:$0 sm:$0xff] }
 0xc4e   : > { %8424 = vmatprep.subr.bf16.mxu0 %v8838_v3 }
 0xc50   : > { %8304 = vmatmul.mubr.msk.f32.vlgmr.msra.gmra.mrb[46].mxu0 %vm626_vm1, %v9850_v20 }
 0xc51   : > { %8426 = vmatpush3.bf16.msra.mxu0 %v8425_v32  ;;  %8325 = vmatprep.mubr.msk.f32.mxu0 %vm8839_vm0, %v8840_v11 }
 0xc52   : > { %8427 = vmatprep.subr.bf16.mxu0 %v8838_v3 }
 0xc55   : > { %8429 = vmatpush3.bf16.msra.mxu0 %v8428_v35 }
 0xc56   : > { %8430 = vmatprep.subr.bf16.mxu0 %v8838_v3 }
 0xc58   : > { %8326 = vmatmul.mubr.msk.f32.vlgmr.msra.gmra.mrb[48].mxu0 %vm626_vm1, %v9850_v20 }
 0xc59   : > { %8342 = vmatprep.mubr.msk.f32.mxu0 %vm8839_vm0, %v8840_v11 }
 0xd13   : > { %v3736_v36 = vpop.f32.mrb[10].mxu0  ;;  %v3819_v18 = vpop.f32.mrb[14].mxu1 }
 0xd14   : > { %v3820_v37 = vadd.f32 %v7184_v7, %v3819_v18  ;;  %v8262_v38 = vpop.f32.mrb[11].mxu0  ;;  %v8273_v49 = vpop.f32.mrb[15].mxu1  ;;  %v3737_v39 = vadd.f32 %v7177_v19, %v3736_v36 }
 0xd15   : > { %v7222_v49 = vld [vmem:[%s10666_s8 + $0x30] sm:$0xff] }
 0xd16   : > { %8286 = vmatpush3.xpose.msk.msra.mxu1 %vm862_vm2, %v3820_v37 }
 0xd17   : > { %8290 = vmatprep.subr.mxu1 %v8840_v11 }
 0xd19   : > { %8288 = vmatmul.mubr.msk.f32.vlgmr.msra.gmra.mrb[48].mxu1 %vm862_vm2, %v3737_v39 }
 0xd1a   : > { %8292 = vmatprep.mubr.msk.f32.mxu1 %vm8839_vm0, %v8840_v11 }
 0xd1b   : > { %v3902_v40 = vpop.f32.mrb[44].mxu0 }
 0xd1c   : > { %v3903_v50 = vadd.f32 %v7191_v9, %v3902_v40  ;;  %v8284_v48 = vpop.f32.mrb[45].mxu0  ;;  %v7196_v40 = vld [vmem:[%s10666_s8 + $0x20] sm:$0xff] }
 0xd1e   : > { %8291 = vmatpush3.msra.mxu1 %v3903_v50  ;;  %v7197_v50 = vld [vmem:[%s10666_s8 + $0x28] sm:$0xff] }
 0xd1f   : > { %8418 = vmatprep.subr.bf16.mxu1 %v8838_v3 }
 0xd23   : > { %v4150_v51 = vpop.f32.mrb[46].mxu0 }
 0xd24   : > { %v8305_v10 = vpop.f32.mrb[47].mxu0  ;;  %v4151_v31 = vadd.f32 %v7203_v26, %v4150_v51  ;;  %v8434_v51 = vpack.c.bf16 %v7197_v50, %v7196_v40  ;;  %v7257_v26 = vld [vmem:[%s10668_s10 + $0x1c8] sm:$0xff]  ;;  %v7250_v40 = vld [vmem:[%s10668_s10 + $0x190] sm:$0xff] }
 0xd25   : > { %v7258_v50 = vld [vmem:[%s10668_s10 + $0x1d0] sm:$0xff] }
 0xd2b   : > { %v4316_v13 = vpop.f32.mrb[48].mxu0 }
 0xd2c   : > { %v8327_v28 = vpop.f32.mrb[49].mxu0  ;;  %v4317_v63 = vadd.f32 %v7217_v30, %v4316_v13 }
 0xdec   : > { %v3978_v52 = vpop.f32.mrb[48].mxu1 }
 0xded   : > { %v3982_v53 = vmul.f32 0.25, %v3978_v52  ;;  %v8289_v54 = vpop.f32.mrb[49].mxu1 }
 0xdef   : > { %v3983_v29 = vadd.f32 %v8773_v55, %v3982_v53 }
 0xdf1   : > { %v3984_v57 = vsel %vm947_vm3, %v3983_v29, -inf }
 0xdf2   : > { %3985 = vmax.xlane.f32.xlu0 %v3984_v57 }
 0xe7f   : > { %v3986_v58 = vpop.xlane.xlu0 %3985 }
 0xe80   : > { %v3987_v59 = vsub.f32 %v3983_v29, %v3986_v58 }
 0xe82   : > { %v3988_v60 = vmul.f32 1.442695, %v3987_v59 }
 0xe84   : > { %8760 = vpow2.f32 %v3988_v60 }
 0xe8e   : > { %v8761_v0 = vpop.eup %8760 }
 0xe8f   : > { %v3990_v1 = vsel %vm947_vm3, %v8761_v0, 0.0 }
 0xe90   : > { %3991 = vadd.xlane.f32.xlu1 %v3990_v1 }
 0xf1d   : > { %v3992_v2 = vpop.xlane.xlu1 %3991 }
 0xf1e   : > { %8762 = vrcp.f32 %v3992_v2 }
 0xf28   : > { %v8763_v8 = vpop.eup %8762 }
 0xf29   : > { %v3994_v15 = vmul.f32 %v8763_v8, %v8761_v0  ;;  %v7240_v8 = vld [vmem:[%s10668_s10 + $0x140] sm:$0xff] }
 0xf2a   : > { %v7266_v16 = vcombine.low %v7232_v6, %v7240_v8 }
 0xf2b   : > { %8293 = vmatmul.mubr.msk.f32.vlgmr.msra.gmra.mrb[50].mxu1 %vm947_vm3, %v3994_v15  ;;  %v7241_v15 = vld [vmem:[%s10668_s10 + $0x148] sm:$0xff] }
 0xf2c   : > { %8420 = vmatpush3.bf16.msra.mxu1 %v8419_v14  ;;  %8314 = vmatprep.mubr.msk.f32.mxu1 %vm8839_vm0, %v8840_v11  ;;  %v7267_v14 = vcombine.high %v7232_v6, %v7240_v8 }
 0xf2d   : > { %8421 = vmatprep.subr.bf16.mxu1 %v8838_v3 }
 0xf30   : > { %8423 = vmatpush3.bf16.msra.mxu1 %v8422_v21 }
 0xf31   : > { %8328 = vmatprep.subr.mxu1 %v8840_v11 }
 0xf33   : > { %8315 = vmatmul.mubr.msk.f32.vlgmr.msra.gmra.mrb[52].mxu1 %vm626_vm1, %v9850_v20 }
 0xf34   : > { %8330 = vmatprep.mubr.msk.f32.mxu1 %vm8839_vm0, %v8840_v11 }
 0xffe   : > { %v4064_v22 = vpop.f32.mrb[50].mxu1 }
 0xfff   : > { %v8294_v23 = vpop.f32.mrb[51].mxu1 }
0x1000   : > { %v7256_v23 = vld [vmem:[%s10668_s10 + $0x1c0] sm:$0xff] }
0x1006   : > { %v4233_v25 = vpop.f32.mrb[52].mxu1 }
0x1007   : > { %v4234_v27 = vadd.f32 %v7210_v24, %v4233_v25  ;;  %v8316_v45 = vpop.f32.mrb[53].mxu1  ;;  %v7249_v24 = vld [vmem:[%s10668_s10 + $0x188] sm:$0xff] }
0x1008   : > { %v7284_v45 = vcombine.low %v7249_v24, %v7257_v26  ;;  %v7285_v30 = vcombine.high %v7249_v24, %v7257_v26  ;;  %v7262_v26 = vld [vmem:[%s10668_s10 + $0x1f0] sm:$0xff] }
0x1009   : > { %8329 = vmatpush3.xpose.msk.msra.mxu1 %vm862_vm2, %v4234_v27 }
0x100a   : > { %8333 = vmatprep.subr.mxu1 %v8840_v11 }
0x100c   : > { %8331 = vmatmul.mubr.msk.f32.vlgmr.msra.gmra.mrb[54].mxu1 %vm862_vm2, %v4151_v31  ;;  %v7234_v31 = vld [vmem:[%s10668_s10 + $0x110] sm:$0xff] }
0x100d   : > { %8334 = vmatpush3.msra.mxu1 %v4317_v63  ;;  %8335 = vmatprep.mubr.msk.f32.mxu1 %vm8839_vm0, %v8840_v11  ;;  %v7242_v63 = vld [vmem:[%s10668_s10 + $0x150] sm:$0xff] }
0x100e   : > { %8433 = vmatprep.subr.bf16.mxu1 %v8838_v3  ;;  %v7223_v3 = vld [vmem:[%s10666_s8 + $0x38] sm:$0xff] }
0x100f   : > { %v8431_v39 = vpack.c.bf16 %v7223_v3, %v7222_v49  ;;  %v7230_v49 = vld [vmem:[%s10672_s14 + $0x1] ss:$0 sm:$0xff] }
0x1011   : > { %8432 = vmatpush3.bf16.msra.mxu0 %v8431_v39  ;;  %v7231_v39 = vld [vmem:[%s10673_s15 + $0x1] ss:$0 sm:$0xff] }
0x1012   : > { %4954 = vmatprep.subr.bf16.mxu0 %v7267_v14  ;;  %v7238_v14 = vld [vmem:[%s10668_s10 + $0x130] sm:$0xff] }
0x10df   : > { %v4392_v32 = vpop.f32.mrb[54].mxu1 }
0x10e0   : > { %v4396_v33 = vmul.f32 0.25, %v4392_v32  ;;  %v8332_v34 = vpop.f32.mrb[55].mxu1  ;;  %v7235_v32 = vld [vmem:[%s10668_s10 + $0x118] sm:$0xff] }
0x10e1   : > { %v7243_v34 = vld [vmem:[%s10668_s10 + $0x158] sm:$0xff] }
0x10e2   : > { %v4397_v35 = vadd.f32 %v8773_v55, %v4396_v33  ;;  %v7227_v55 = vld [vmem:[%s10667_s9 + $0x1] ss:$0 sm:$0xff]  ;;  %v7271_v33 = vcombine.high %v7234_v31, %v7242_v63 }
0x10e4   : > { %v4398_v7 = vsel %vm947_vm3, %v4397_v35, -inf }
0x10e5   : > { %4399 = vmax.xlane.f32.xlu0 %v4398_v7  ;;  %v7272_v7 = vcombine.low %v7235_v32, %v7243_v34 }
0x1172   : > { %v4400_v36 = vpop.xlane.xlu0 %4399 }
0x1173   : > { %v4401_v18 = vsub.f32 %v4397_v35, %v4400_v36  ;;  %v7270_v35 = vcombine.low %v7234_v31, %v7242_v63  ;;  %v7273_v36 = vcombine.high %v7235_v32, %v7243_v34 }
0x1175   : > { %v4402_v19 = vmul.f32 1.442695, %v4401_v18 }
0x1177   : > { %8764 = vpow2.f32 %v4402_v19 }
0x1181   : > { %v8765_v37 = vpop.eup %8764 }
0x1182   : > { %v4404_v38 = vsel %vm947_vm3, %v8765_v37, 0.0 }
0x1183   : > { %4405 = vadd.xlane.f32.xlu1 %v4404_v38 }
0x1210   : > { %v4406_v9 = vpop.xlane.xlu1 %4405 }
0x1211   : > { %8766 = vrcp.f32 %v4406_v9 }
0x121b   : > { %v8767_v48 = vpop.eup %8766 }
0x121c   : > { %v4408_v10 = vmul.f32 %v8767_v48, %v8765_v37  ;;  %v7251_v48 = vld [vmem:[%s10668_s10 + $0x198] sm:$0xff] }
0x121e   : > { %8336 = vmatmul.mubr.msk.f32.vlgmr.msra.gmra.mrb[56].mxu1 %vm947_vm3, %v4408_v10 }
0x121f   : > { %8435 = vmatpush3.bf16.msra.mxu1 %v8434_v51  ;;  %8349 = vmatprep.mubr.msk.f32.mxu1 %vm8839_vm0, %v8840_v11  ;;  %v7259_v51 = vld [vmem:[%s10668_s10 + $0x1d8] sm:$0xff] }
0x1222   : > { %8350 = vmatmul.mubr.msk.f32.vlgmr.msra.gmra.mrb[58].mxu1 %vm862_vm2, %v4064_v22  ;;  %v7248_v22 = vld [vmem:[%s10668_s10 + $0x180] sm:$0xff] }
0x1223   : > { %5027 = vmatprep.mubr.bf16.mxu1 %v8841_v12  ;;  %v7283_v25 = vcombine.high %v7248_v22, %v7256_v23  ;;  %v7282_v27 = vcombine.low %v7248_v22, %v7256_v23 }
0x12f1   : > { %v4478_v13 = vpop.f32.mrb[56].mxu1 }
0x12f2   : > { %v8337_v28 = vpop.f32.mrb[57].mxu1  ;;  %8343 = vmatmul.mubr.msk.f32.vlgmr.msra.gmra.mrb[50].mxu0 %vm862_vm2, %v4478_v13 }
0x12f3   : > { %4986 = vmatprep.mubr.bf16.mxu0 %v8841_v12  ;;  %4955 = vmatpush1.bf16.msra.mxu0 %v7266_v16  ;;  %v7287_v28 = vcombine.high %v7250_v40, %v7258_v50  ;;  %v7239_v16 = vld [vmem:[%s10668_s10 + $0x138] sm:$0xff] }
0x12f4   : > { %4956 = vmatprep.subr.bf16.mxu0 %v7283_v25  ;;  %v7254_v25 = vld [vmem:[%s10668_s10 + $0x1b0] sm:$0xff] }
0x12f5   : > { %v4627_v52 = vpop.f32.mrb[58].mxu1  ;;  %v7295_v63 = vcombine.high %v7254_v25, %v7262_v26 }
0x12f6   : > { %v8351_v53 = vpop.f32.mrb[59].mxu1 }
0x12f7   : > { %4957 = vmatpush1.bf16.msra.mxu0 %v7282_v27  ;;  %v7236_v53 = vld [vmem:[%s10668_s10 + $0x120] sm:$0xff]  ;;  %v7255_v27 = vld [vmem:[%s10668_s10 + $0x1b8] sm:$0xff] }
0x12f8   : > { %5036 = vmatprep.subr.bf16.mxu0 %v7271_v33  ;;  %v7294_v33 = vcombine.low %v7254_v25, %v7262_v26 }
0x13c5   : > { %v4554_v54 = vpop.f32.mrb[50].mxu0 }
0x13c6   : > { %v4628_v29 = vadd.f32 %v4627_v52, %v4554_v54  ;;  %v8344_v57 = vpop.f32.mrb[51].mxu0  ;;  %v7289_v52 = vcombine.high %v7251_v48, %v7259_v51  ;;  %v7244_v54 = vld [vmem:[%s10668_s10 + $0x160] sm:$0xff] }
0x13c7   : > { %v7286_v57 = vcombine.low %v7250_v40, %v7258_v50  ;;  %v8619_v40 = vld [vmem:[%s10670_s12 + $0x490] sm:$0xff]   ;;  %v8620_v50 = vld [vmem:[%s10670_s12 + $0x458] sm:$0xff]  }
0x13c8   : > { %v4639_v11 = vadd.f32 %v7227_v55, %v4628_v29  ;;  %v7237_v55 = vld [vmem:[%s10668_s10 + $0x128] sm:$0xff] }
0x13c9   : > { %v7245_v29 = vld [vmem:[%s10668_s10 + $0x168] sm:$0xff] }
0x13ca   : > { %v4640_v58 = vadd.f32 %v4639_v11, %v9850_v20  ;;  %v7233_v20 = vld [vmem:[%s10668_s10 + $0x108] sm:$0xff]  ;;  %v7288_v11 = vcombine.low %v7251_v48, %v7259_v51  ;;  %v7276_v6 = vcombine.low %v7237_v55, %v7245_v29  ;;  %v8621_v48 = vld [vmem:[%s10670_s12 + $0x4d8] sm:$0xff]  }
0x13cb   : > { %v7268_v17 = vcombine.low %v7233_v20, %v7241_v15  ;;  %v7269_v21 = vcombine.high %v7233_v20, %v7241_v15  ;;  %v7246_v15 = vld [vmem:[%s10668_s10 + $0x170] sm:$0xff]  ;;  %v8622_v51 = vld [vmem:[%s10670_s12 + $0x418] sm:$0xff]  }
0x13cc   : > { %v4645_v59 = vsel %vm626_vm1, %v4640_v58, 0.0  ;;  %v7279_v23 = vcombine.high %v7238_v14, %v7246_v15 }
0x13cd   : > { %4646 = vadd.xlane.f32.xlu0 %v4645_v59  ;;  %4995 = vmatprep.subr.bf16.mxu1 %v7269_v21  ;;  %v7277_v59 = vcombine.high %v7237_v55, %v7245_v29  ;;  %v8628_v55 = vld [vmem:[%s10670_s12 + $0x468] sm:$0xff]  }
0x13ce   : > { %4996 = vmatpush1.bf16.msra.mxu1 %v7268_v17  ;;  %v7247_v17 = vld [vmem:[%s10668_s10 + $0x178] sm:$0xff]  ;;  %v8629_v29 = vld [vmem:[%s10670_s12 + $0x4e8] sm:$0xff]  }
0x13cf   : > { %4997 = vmatprep.subr.bf16.mxu1 %v7285_v30  ;;  %v7281_v24 = vcombine.high %v7239_v16, %v7247_v17  ;;  %v7278_v30 = vcombine.low %v7238_v14, %v7246_v15  ;;  %v7280_v31 = vcombine.low %v7239_v16, %v7247_v17  ;;  %v10224_v14 = vld [vmem:[%s10669_s11 + $0x10] sm:$0xff] }
0x13d0   : > { %v4714_v15 = vrot.slane %v10224_v14, %v9427_v43  ;;  %v4722_v16 = vrot.slane %v10224_v14, %v9430_v44  ;;  %v4718_v17 = vrot.slane %v10224_v14, %v9438_v46 }
0x13d2   : > { %4998 = vmatpush1.bf16.msra.mxu1 %v7284_v45  ;;  %v7263_v45 = vld [vmem:[%s10668_s10 + $0x1f8] sm:$0xff] }
0x13d3   : > { %5077 = vmatprep.subr.bf16.mxu1 %v7273_v36  ;;  %v7297_v32 = vcombine.high %v7255_v27, %v7263_v45  ;;  %v7296_v34 = vcombine.low %v7255_v27, %v7263_v45  ;;  %v8610_v36 = vld [vmem:[%s10670_s12 + $0x400] sm:$0xff]  }
0x145a   : > { %v4647_v60 = vpop.xlane.xlu0 %4646 }
0x145b   : > { %v4648_v0 = vmul.f32 0.03125, %v4647_v60  ;;  %v7252_v60 = vld [vmem:[%s10668_s10 + $0x1a0] sm:$0xff] }
0x145d   : > { %v4649_v1 = vsub.f32 %v4640_v58, %v4648_v0  ;;  %v7275_v58 = vcombine.high %v7236_v53, %v7244_v54  ;;  %v7260_v0 = vld [vmem:[%s10668_s10 + $0x1e0] sm:$0xff] }
0x145e   : > { %v7291_v8 = vcombine.high %v7252_v60, %v7260_v0  ;;  %v7290_v21 = vcombine.low %v7252_v60, %v7260_v0  ;;  %v8634_v60 = vld [vmem:[%s10670_s12 + $0x430] sm:$0xff]  }
0x145f   : > { %v4650_v2 = vmul.f32 %v4649_v1, %v4649_v1  ;;  %v8635_v0 = vld [vmem:[%s10670_s12 + $0x4b0] sm:$0xff]  }
0x1461   : > { %v4651_v5 = vsel %vm626_vm1, %v4650_v2, 0.0  ;;  %v7261_v2 = vld [vmem:[%s10668_s10 + $0x1e8] sm:$0xff] }
0x1462   : > { %4652 = vadd.xlane.f32.xlu1 %v4651_v5  ;;  %v7274_v5 = vcombine.low %v7236_v53, %v7244_v54  ;;  %v8626_v53 = vld [vmem:[%s10670_s12 + $0x420] sm:$0xff]  }
0x1463   : > { %v8627_v54 = vld [vmem:[%s10670_s12 + $0x4a0] sm:$0xff]  }
0x14ef   : > { %v4653_v18 = vpop.xlane.xlu1 %4652 }
0x14f0   : > { %v4654_v19 = vmul.f32 0.03125, %v4653_v18  ;;  %v8611_v18 = vld [vmem:[%s10670_s12 + $0x480] sm:$0xff]  }
0x14f2   : > { %v4655_v37 = vadd.f32 1e-05, %v4654_v19  ;;  %v8612_v19 = vld [vmem:[%s10670_s12 + $0x448] sm:$0xff]  }
0x14f4   : > { %8768 = vrsqrt.f32 %v4655_v37  ;;  %v8613_v37 = vld [vmem:[%s10670_s12 + $0x4c8] sm:$0xff]  }
0x14fe   : > { %v8769_v38 = vpop.eup %8768 }
0x14ff   : > { %v4657_v3 = vmul.f32 %v8769_v38, %v4649_v1  ;;  %v7253_v1 = vld [vmem:[%s10668_s10 + $0x1a8] sm:$0xff] }
0x1500   : > { %v7293_v20 = vcombine.high %v7253_v1, %v7261_v2  ;;  %v7292_v22 = vcombine.low %v7253_v1, %v7261_v2  ;;  %v8614_v38 = vld [vmem:[%s10670_s12 + $0x408] sm:$0xff]   ;;  %v8636_v1 = vld [vmem:[%s10670_s12 + $0x478] sm:$0xff]  }
0x1501   : > { %v4664_v9 = vmul.f32 %v7230_v49, %v4657_v3  ;;  %v8615_v49 = vld [vmem:[%s10670_s12 + $0x488] sm:$0xff]   ;;  %v8616_v3 = vld [vmem:[%s10670_s12 + $0x450] sm:$0xff]   ;;  %v8637_v2 = vld [vmem:[%s10670_s12 + $0x4f8] sm:$0xff]  }
0x1503   : > { %v10043_v10 = vadd.f32 %v7231_v39, %v4664_v9  ;;  %v8617_v39 = vld [vmem:[%s10670_s12 + $0x4d0] sm:$0xff]  }
0x1504   : > { %v8618_v9 = vld [vmem:[%s10670_s12 + $0x410] sm:$0xff]  }
0x1505   : > { %v10047_v13 = vpack.c.bf16 %v10043_v10, %v10043_v10 }
0x1507   : > { %7298 = vmatmul.mubr.msk.bf16.vlgmr.msra.gmra.mrb[52].mxu0 %vm626_vm1, %v10047_v13  ;;  %7299 = vmatmul.mubr.msk.bf16.vlgmr.msra.gmra.mrb[60].mxu1 %vm626_vm1, %v10047_v13 }
0x1508   : > { %5037 = vmatpush1.bf16.msra.mxu0 %v7270_v35  ;;  %5078 = vmatpush1.bf16.msra.mxu1 %v7272_v7  ;;  %v8608_v35 = vld [vmem:[%s10670_s12 + $0x440] sm:$0xff]  }
0x1509   : > { %5038 = vmatprep.subr.bf16.mxu0 %v7287_v28  ;;  %5079 = vmatprep.subr.bf16.mxu1 %v7289_v52  ;;  %v8609_v7 = vld [vmem:[%s10670_s12 + $0x4c0] sm:$0xff]  }
0x150a   : > { %5068 = vmatprep.mubr.bf16.mxu0 %v8841_v12  ;;  %5109 = vmatprep.mubr.bf16.mxu1 %v8841_v12  ;;  %v8624_v28 = vld [vmem:[%s10670_s12 + $0x460] sm:$0xff]  }
0x150b   : > { %v8625_v52 = vld [vmem:[%s10670_s12 + $0x4e0] sm:$0xff]  }
0x150c   : > { %5039 = vmatpush1.bf16.msra.mxu0 %v7286_v57  ;;  %5080 = vmatpush1.bf16.msra.mxu1 %v7288_v11  ;;  %v8630_v57 = vld [vmem:[%s10670_s12 + $0x428] sm:$0xff]  }
0x150d   : > { %5118 = vmatprep.subr.bf16.mxu0 %v7275_v58  ;;  %5159 = vmatprep.subr.bf16.mxu1 %v7277_v59  ;;  %v8631_v11 = vld [vmem:[%s10670_s12 + $0x4a8] sm:$0xff]   ;;  %v8632_v58 = vld [vmem:[%s10670_s12 + $0x470] sm:$0xff]  }
0x150e   : > { %v8633_v59 = vld [vmem:[%s10670_s12 + $0x4f0] sm:$0xff]  }
0x150f   : > { %7300 = vmatmul.mubr.msk.bf16.vlgmr.msra.gmra.mrb[56].mxu0 %vm626_vm1, %v10047_v13  ;;  %7301 = vmatmul.mubr.msk.bf16.vlgmr.msra.gmra.mrb[64].mxu1 %vm626_vm1, %v10047_v13 }
0x1510   : > { %5119 = vmatpush1.bf16.msra.mxu0 %v7274_v5  ;;  %5160 = vmatpush1.bf16.msra.mxu1 %v7276_v6  ;;  %v8638_v5 = vld [vmem:[%s10670_s12 + $0x438] sm:$0xff]  }
0x1511   : > { %5120 = vmatprep.subr.bf16.mxu0 %v7291_v8  ;;  %5161 = vmatprep.subr.bf16.mxu1 %v7293_v20  ;;  %v8639_v6 = vld [vmem:[%s10670_s12 + $0x4b8] sm:$0xff]   ;;  %v8640_v8 = vld [vmem:[%s10670_s12 + $0x540] sm:$0xff]  }
0x1512   : > { %5150 = vmatprep.mubr.bf16.mxu0 %v8841_v12  ;;  %5191 = vmatprep.mubr.bf16.mxu1 %v8841_v12  ;;  %v8641_v20 = vld [vmem:[%s10670_s12 + $0x5c0] sm:$0xff]  }
0x1514   : > { %5121 = vmatpush1.bf16.msra.mxu0 %v7290_v21  ;;  %5162 = vmatpush1.bf16.msra.mxu1 %v7292_v22  ;;  %v4726_v21 = vrot.slane %v10224_v14, %v9441_v47 }
0x1515   : > { %5200 = vmatprep.subr.bf16.mxu0 %v7279_v23  ;;  %5241 = vmatprep.subr.bf16.mxu1 %v7281_v24 }
0x1517   : > { %7302 = vmatmul.mubr.msk.bf16.vlgmr.msra.gmra.mrb[60].mxu0 %vm626_vm1, %v10047_v13  ;;  %7303 = vmatmul.mubr.msk.bf16.vlgmr.msra.gmra.mrb[68].mxu1 %vm626_vm1, %v10047_v13 }
0x1518   : > { %5201 = vmatpush1.bf16.msra.mxu0 %v7278_v30  ;;  %5242 = vmatpush1.bf16.msra.mxu1 %v7280_v31 }
0x1519   : > { %5202 = vmatprep.subr.bf16.mxu0 %v7295_v63  ;;  %5243 = vmatprep.subr.bf16.mxu1 %v7297_v32 }
0x151a   : > { %5232 = vmatprep.mubr.bf16.mxu0 %v8841_v12  ;;  %5273 = vmatprep.mubr.bf16.mxu1 %v8841_v12 }
0x151c   : > { %5203 = vmatpush1.bf16.msra.mxu0 %v7294_v33  ;;  %5244 = vmatpush1.bf16.msra.mxu1 %v7296_v34 }
0x151d   : > { %7976 = vmatprep.subr.bf16.mxu0 %v8608_v35  ;;  %7998 = vmatprep.subr.bf16.mxu1 %v8609_v7 }
0x151f   : > { %7304 = vmatmul.mubr.msk.bf16.vlgmr.msra.gmra.mrb[64].mxu0 %vm626_vm1, %v10047_v13  ;;  %7305 = vmatmul.mubr.msk.bf16.vlgmr.msra.gmra.mrb[72].mxu1 %vm626_vm1, %v10047_v13  ;;  %v8623_v13 = vld [vmem:[%s10670_s12 + $0x498] sm:$0xff]  }
0x1520   : > { %7977 = vmatpush3.bf16.msra.mxu0 %v8610_v36  ;;  %7999 = vmatpush3.bf16.msra.mxu1 %v8611_v18 }
0x1521   : > { %7978 = vmatprep.subr.bf16.mxu0 %v8612_v19  ;;  %8000 = vmatprep.subr.bf16.mxu1 %v8613_v37  ;;  %v4734_v37 = vrot.slane %v10224_v14, %v9452_v61 }
0x1524   : > { %7979 = vmatpush3.bf16.msra.mxu0 %v8614_v38  ;;  %8001 = vmatpush3.bf16.msra.mxu1 %v8615_v49  ;;  %v4742_v38 = vrot.slane %v10224_v14, %v9455_v62  ;;  %v8642_v49 = vld [vmem:[%s10670_s12 + $0x500] sm:$0xff]  }
0x1525   : > { %7980 = vmatprep.subr.bf16.mxu0 %v8616_v3  ;;  %8002 = vmatprep.subr.bf16.mxu1 %v8617_v39  ;;  %v8643_v3 = vld [vmem:[%s10670_s12 + $0x580] sm:$0xff]  }
0x1528   : > { %7981 = vmatpush3.bf16.msra.mxu0 %v8618_v9  ;;  %8003 = vmatpush3.bf16.msra.mxu1 %v8619_v40  ;;  %v8644_v40 = vld [vmem:[%s10670_s12 + $0x548] sm:$0xff]  }
0x1529   : > { %7982 = vmatprep.subr.bf16.mxu0 %v8620_v50  ;;  %8004 = vmatprep.subr.bf16.mxu1 %v8621_v48  ;;  %v8645_v50 = vld [vmem:[%s10670_s12 + $0x5c8] sm:$0xff]  }
0x152c   : > { %7983 = vmatpush3.bf16.msra.mxu0 %v8622_v51  ;;  %8005 = vmatpush3.bf16.msra.mxu1 %v8623_v13 }
0x152d   : > { %7984 = vmatprep.subr.bf16.mxu0 %v8624_v28  ;;  %8006 = vmatprep.subr.bf16.mxu1 %v8625_v52 }
0x1530   : > { %7985 = vmatpush3.bf16.msra.mxu0 %v8626_v53  ;;  %8007 = vmatpush3.bf16.msra.mxu1 %v8627_v54 }
0x1531   : > { %7986 = vmatprep.subr.bf16.mxu0 %v8628_v55  ;;  %8008 = vmatprep.subr.bf16.mxu1 %v8629_v29  ;;  %v8646_v29 = vld [vmem:[%s10670_s12 + $0x508] sm:$0xff]  }
0x1534   : > { %7987 = vmatpush3.bf16.msra.mxu0 %v8630_v57  ;;  %8009 = vmatpush3.bf16.msra.mxu1 %v8631_v11  ;;  %v8647_v57 = vld [vmem:[%s10670_s12 + $0x588] sm:$0xff]  }
0x1535   : > { %7988 = vmatprep.subr.bf16.mxu0 %v8632_v58  ;;  %8010 = vmatprep.subr.bf16.mxu1 %v8633_v59  ;;  %v8648_v59 = vld [vmem:[%s10670_s12 + $0x550] sm:$0xff]  }
0x1538   : > { %7989 = vmatpush3.bf16.msra.mxu0 %v8634_v60  ;;  %8011 = vmatpush3.bf16.msra.mxu1 %v8635_v0  ;;  %v8649_v60 = vld [vmem:[%s10670_s12 + $0x5d0] sm:$0xff]  }
0x1539   : > { %7990 = vmatprep.subr.bf16.mxu0 %v8636_v1  ;;  %8012 = vmatprep.subr.bf16.mxu1 %v8637_v2 }
0x153c   : > { %7991 = vmatpush3.bf16.msra.mxu0 %v8638_v5  ;;  %8013 = vmatpush3.bf16.msra.mxu1 %v8639_v6  ;;  %v8650_v6 = vld [vmem:[%s10670_s12 + $0x510] sm:$0xff]  }
0x153d   : > { %8020 = vmatprep.subr.bf16.mxu0 %v8640_v8  ;;  %8042 = vmatprep.subr.bf16.mxu1 %v8641_v20  ;;  %v8651_v8 = vld [vmem:[%s10670_s12 + $0x590] sm:$0xff]   ;;  %v8652_v20 = vld [vmem:[%s10670_s12 + $0x558] sm:$0xff]  }
0x15da   : > { %v4988_v22 = vpop.f32.mrb[52].mxu0  ;;  %v5029_v23 = vpop.f32.mrb[60].mxu1 }
0x15db   : > { %v4989_v24 = vadd.f32 %v4988_v22, %v4714_v15  ;;  %v5030_v25 = vadd.f32 %v5029_v23, %v4722_v16  ;;  %v4990_v26 = vpop.f32.mrb[53].mxu0  ;;  %v5031_v27 = vpop.f32.mrb[61].mxu1  ;;  %v8653_v15 = vld [vmem:[%s10670_s12 + $0x5d8] sm:$0xff]  }
0x15dc   : > { %v4991_v45 = vadd.f32 %v4990_v26, %v4718_v17  ;;  %v5032_v30 = vadd.f32 %v5031_v27, %v4726_v21  ;;  %v4992_v31 = vpop.f32.mrb[54].mxu0  ;;  %v5033_v63 = vpop.f32.mrb[62].mxu1  ;;  %v8655_v26 = vld [vmem:[%s10670_s12 + $0x598] sm:$0xff]  }
0x15dd   : > { %v5282_v32 = vmax.f32 %v4989_v24, 0.0  ;;  %v5284_v33 = vmax.f32 %v5030_v25, 0.0  ;;  %v4993_v34 = vpop.f32.mrb[55].mxu0  ;;  %v5034_v35 = vpop.f32.mrb[63].mxu1  ;;  %v8654_v25 = vld [vmem:[%s10670_s12 + $0x518] sm:$0xff]   ;;  %v8657_v31 = vld [vmem:[%s10670_s12 + $0x5e0] sm:$0xff]  }
0x15de   : > { %v5283_v7 = vmax.f32 %v4991_v45, 0.0  ;;  %v5285_v36 = vmax.f32 %v5032_v30, 0.0  ;;  %v8656_v30 = vld [vmem:[%s10670_s12 + $0x560] sm:$0xff]   ;;  %v10297_v63 = vld [vmem:[%s10669_s11 + $0x18] sm:$0xff]  ;;  %v8660_v35 = vld [vmem:[%s10670_s12 + $0x568] sm:$0xff]  }
0x15df   : > { %v5298_v39 = vpack.c.bf16 %v5282_v32, %v5282_v32  ;;  %v5300_v9 = vpack.c.bf16 %v5284_v33, %v5284_v33  ;;  %v4770_v32 = vrot.slane %v10297_v63, %v9512_v56  ;;  %v8658_v33 = vld [vmem:[%s10670_s12 + $0x520] sm:$0xff]  }
0x15e0   : > { %v5299_v18 = vpack.c.bf16 %v5283_v7, %v5283_v7  ;;  %v5301_v19 = vpack.c.bf16 %v5285_v36, %v5285_v36  ;;  %v8659_v34 = vld [vmem:[%s10670_s12 + $0x5a0] sm:$0xff]   ;;  %v8661_v7 = vld [vmem:[%s10670_s12 + $0x5e8] sm:$0xff]  }
0x15e2   : > { %v10250_v48 = vpop.f32.mrb[56].mxu0  ;;  %v10252_v51 = vpop.f32.mrb[64].mxu1  ;;  %6379 = vmatprep.mubr.bf16.mxu0 %v5299_v18  ;;  %6419 = vmatprep.mubr.bf16.mxu1 %v5301_v19 }
0x15e3   : > { %v5072_v13 = vpop.f32.mrb[57].mxu0  ;;  %v5113_v28 = vpop.f32.mrb[65].mxu1  ;;  %6380 = vmatmul.mubr.bf16.vlgmr.msra.gmra.mrb[68].mxu0 %v5298_v39  ;;  %6420 = vmatmul.mubr.bf16.vlgmr.msra.gmra.mrb[76].mxu1 %v5300_v9  ;;  %v8662_v39 = vld [vmem:[%s10670_s12 + $0x528] sm:$0xff]  }
0x15e4   : > { %v5073_v52 = vadd.f32 %v5072_v13, %v4734_v37  ;;  %v5114_v53 = vadd.f32 %v5113_v28, %v4742_v38  ;;  %8021 = vmatpush3.bf16.msra.mxu0 %v8642_v49  ;;  %8043 = vmatpush3.bf16.msra.mxu1 %v8643_v3  ;;  %v5074_v54 = vpop.f32.mrb[58].mxu0  ;;  %v5115_v55 = vpop.f32.mrb[66].mxu1  ;;  %v8663_v9 = vld [vmem:[%s10670_s12 + $0x5a8] sm:$0xff]  }
0x15e5   : > { %v5075_v11 = vpop.f32.mrb[59].mxu0  ;;  %v5116_v58 = vpop.f32.mrb[67].mxu1  ;;  %8022 = vmatprep.subr.bf16.mxu0 %v8644_v40  ;;  %8044 = vmatprep.subr.bf16.mxu1 %v8645_v50  ;;  %v4730_v40 = vrot.slane %v10224_v14, %v9534_v4  ;;  %v4738_v50 = vrot.slane %v10224_v14, %v9512_v56  ;;  %v4750_v54 = vrot.slane %v10297_v63, %v9438_v46  ;;  %v8666_v56 = vld [vmem:[%s10670_s12 + $0x530] sm:$0xff]   ;;  %v8668_v46 = vld [vmem:[%s10670_s12 + $0x578] sm:$0xff]  }
0x15e6   : > { %v5287_v0 = vmax.f32 %v5073_v52, 0.0  ;;  %v5289_v1 = vmax.f32 %v5114_v53, 0.0  ;;  %v8664_v52 = vld [vmem:[%s10670_s12 + $0x570] sm:$0xff]   ;;  %v4758_v55 = vrot.slane %v10297_v63, %v9441_v47  ;;  %v8669_v47 = vld [vmem:[%s10670_s12 + $0x5f8] sm:$0xff]  }
0x15e7   : > { %v8665_v53 = vld [vmem:[%s10670_s12 + $0x5f0] sm:$0xff]  }
0x15e8   : > { %v5303_v2 = vpack.c.bf16 %v5287_v0, %v5287_v0  ;;  %v5305_v5 = vpack.c.bf16 %v5289_v1, %v5289_v1  ;;  %8023 = vmatpush3.bf16.msra.mxu0 %v8646_v29  ;;  %8045 = vmatpush3.bf16.msra.mxu1 %v8647_v57  ;;  %v8667_v14 = vld [vmem:[%s10670_s12 + $0x5b0] sm:$0xff]   ;;  %v5071_v29 = vadd.f32 %v10250_v48, %v4730_v40  ;;  %v8670_v48 = vld [vmem:[%s10670_s12 + $0x538] sm:$0xff]   ;;  %v8672_v0 = vld [vmem:[%s10670_s12 + $0x640] sm:$0xff]  }
0x15e9   : > { %8024 = vmatprep.subr.bf16.mxu0 %v8648_v59  ;;  %8046 = vmatprep.subr.bf16.mxu1 %v8649_v60  ;;  %v5112_v57 = vadd.f32 %v10252_v51, %v4738_v50  ;;  %v8671_v51 = vld [vmem:[%s10670_s12 + $0x5b8] sm:$0xff]   ;;  %v8673_v1 = vld [vmem:[%s10670_s12 + $0x6c0] sm:$0xff]   ;;  %v8694_v40 = vld [vmem:[%s10670_s12 + $0x628] sm:$0xff]   ;;  %v4746_v50 = vrot.slane %v10297_v63, %v9427_v43  ;;  %v4766_v43 = vrot.slane %v10297_v63, %v9452_v61 }
0x15ea   : > { %v10278_v16 = vpop.f32.mrb[60].mxu0  ;;  %v10280_v17 = vpop.f32.mrb[68].mxu1  ;;  %6459 = vmatprep.mubr.bf16.mxu0 %v5303_v2  ;;  %6499 = vmatprep.mubr.bf16.mxu1 %v5305_v5  ;;  %v5286_v59 = vmax.f32 %v5071_v29, 0.0  ;;  %v8700_v61 = vld [vmem:[%s10670_s12 + $0x678] sm:$0xff]  }
0x15eb   : > { %v5154_v21 = vpop.f32.mrb[61].mxu0  ;;  %v5195_v22 = vpop.f32.mrb[69].mxu1  ;;  %v5288_v60 = vmax.f32 %v5112_v57, 0.0  ;;  %v8702_v57 = vld [vmem:[%s10670_s12 + $0x638] sm:$0xff]  }
0x15ec   : > { %8025 = vmatpush3.bf16.msra.mxu0 %v8650_v6  ;;  %8047 = vmatpush3.bf16.msra.mxu1 %v8651_v8  ;;  %v5156_v23 = vpop.f32.mrb[62].mxu0  ;;  %v5197_v24 = vpop.f32.mrb[70].mxu1  ;;  %v5155_v11 = vadd.f32 %v5154_v21, %v4750_v54  ;;  %v5196_v58 = vadd.f32 %v5195_v22, %v4758_v55  ;;  %v8674_v6 = vld [vmem:[%s10670_s12 + $0x600] sm:$0xff]   ;;  %v5302_v8 = vpack.c.bf16 %v5286_v59, %v5286_v59  ;;  %v8676_v22 = vld [vmem:[%s10670_s12 + $0x648] sm:$0xff]   ;;  %v8698_v55 = vld [vmem:[%s10670_s12 + $0x630] sm:$0xff]  }
0x15ed   : > { %v5157_v27 = vpop.f32.mrb[63].mxu0  ;;  %v5198_v45 = vpop.f32.mrb[71].mxu1  ;;  %8026 = vmatprep.subr.bf16.mxu0 %v8652_v20  ;;  %8048 = vmatprep.subr.bf16.mxu1 %v8653_v15  ;;  %v5304_v20 = vpack.c.bf16 %v5288_v60, %v5288_v60  ;;  %v8675_v15 = vld [vmem:[%s10670_s12 + $0x680] sm:$0xff]   ;;  %v8677_v23 = vld [vmem:[%s10670_s12 + $0x6c8] sm:$0xff]   ;;  %v4774_v54 = vrot.slane %v10297_v63, %v9455_v62  ;;  %v8701_v62 = vld [vmem:[%s10670_s12 + $0x6f8] sm:$0xff]  }
0x15ee   : > { %v5291_v2 = vmax.f32 %v5155_v11, 0.0  ;;  %v5293_v5 = vmax.f32 %v5196_v58, 0.0  ;;  %v8680_v27 = vld [vmem:[%s10670_s12 + $0x650] sm:$0xff]   ;;  %v8707_v59 = vld [vmem:[%s10670_s12 + $0x780] sm:$0xff]  }
0x15ef   : > { %v8681_v45 = vld [vmem:[%s10670_s12 + $0x6d0] sm:$0xff]  }
0x15f0   : > { %8027 = vmatpush3.bf16.msra.mxu0 %v8654_v25  ;;  %8049 = vmatpush3.bf16.msra.mxu1 %v8655_v26  ;;  %v5307_v21 = vpack.c.bf16 %v5291_v2, %v5291_v2  ;;  %v5309_v24 = vpack.c.bf16 %v5293_v5, %v5293_v5  ;;  %v8678_v25 = vld [vmem:[%s10670_s12 + $0x608] sm:$0xff]  }
0x15f1   : > { %8028 = vmatprep.subr.bf16.mxu0 %v8656_v30  ;;  %8050 = vmatprep.subr.bf16.mxu1 %v8657_v31  ;;  %v8679_v26 = vld [vmem:[%s10670_s12 + $0x688] sm:$0xff]   ;;  %v8682_v30 = vld [vmem:[%s10670_s12 + $0x610] sm:$0xff]  }
0x15f2   : > { %v10313_v36 = vpop.f32.mrb[64].mxu0  ;;  %v5275_v18 = vpop.f32.mrb[72].mxu1  ;;  %v8683_v31 = vld [vmem:[%s10670_s12 + $0x690] sm:$0xff]   ;;  %v8709_v2 = vld [vmem:[%s10670_s12 + $0x7c8] sm:$0xff]  }
0x15f3   : > { %v10315_v19 = vadd.f32 %v5275_v18, %v4770_v32  ;;  %v10317_v37 = vpop.f32.mrb[65].mxu0  ;;  %v10319_v38 = vpop.f32.mrb[73].mxu1  ;;  %v8684_v32 = vld [vmem:[%s10670_s12 + $0x658] sm:$0xff]   ;;  %v8689_v18 = vld [vmem:[%s10670_s12 + $0x6e0] sm:$0xff]  }
0x15f4   : > { %8029 = vmatpush3.bf16.msra.mxu0 %v8658_v33  ;;  %8051 = vmatpush3.bf16.msra.mxu1 %v8659_v34  ;;  %v5238_v49 = vpop.f32.mrb[66].mxu0  ;;  %v5279_v3 = vpop.f32.mrb[74].mxu1  ;;  %v8685_v33 = vld [vmem:[%s10670_s12 + $0x6d8] sm:$0xff]   ;;  %v5237_v29 = vadd.f32 %v10317_v37, %v4766_v43  ;;  %v8705_v37 = vld [vmem:[%s10670_s12 + $0x7c0] sm:$0xff]  }
0x15f5   : > { %v5239_v13 = vpop.f32.mrb[67].mxu0  ;;  %v5280_v28 = vpop.f32.mrb[75].mxu1  ;;  %8030 = vmatprep.subr.bf16.mxu0 %v8660_v35  ;;  %8052 = vmatprep.subr.bf16.mxu1 %v8661_v7  ;;  %v8686_v34 = vld [vmem:[%s10670_s12 + $0x618] sm:$0xff]   ;;  %v8688_v7 = vld [vmem:[%s10670_s12 + $0x660] sm:$0xff]  }
0x15f6   : > { %v8687_v35 = vld [vmem:[%s10670_s12 + $0x698] sm:$0xff]   ;;  %v8690_v49 = vld [vmem:[%s10670_s12 + $0x620] sm:$0xff]   ;;  %v8695_v13 = vld [vmem:[%s10670_s12 + $0x6a8] sm:$0xff]  }
0x15f7   : > { %v8691_v3 = vld [vmem:[%s10670_s12 + $0x6a0] sm:$0xff]   ;;  %v8696_v28 = vld [vmem:[%s10670_s12 + $0x670] sm:$0xff]  }
0x15f8   : > { %8031 = vmatpush3.bf16.msra.mxu0 %v8662_v39  ;;  %8053 = vmatpush3.bf16.msra.mxu1 %v8663_v9  ;;  %v8692_v39 = vld [vmem:[%s10670_s12 + $0x668] sm:$0xff]  }
0x15f9   : > { %8032 = vmatprep.subr.bf16.mxu0 %v8664_v52  ;;  %8054 = vmatprep.subr.bf16.mxu1 %v8665_v53  ;;  %v8693_v9 = vld [vmem:[%s10670_s12 + $0x6e8] sm:$0xff]   ;;  %v4754_v52 = vrot.slane %v10297_v63, %v9430_v44  ;;  %v8697_v53 = vld [vmem:[%s10670_s12 + $0x6f0] sm:$0xff]  }
0x15fa   : > { %v8699_v44 = vld [vmem:[%s10670_s12 + $0x6b0] sm:$0xff]  }
0x15fc   : > { %8033 = vmatpush3.bf16.msra.mxu0 %v8666_v56  ;;  %8055 = vmatpush3.bf16.msra.mxu1 %v8667_v14  ;;  %v5153_v56 = vadd.f32 %v10278_v16, %v4746_v50  ;;  %v5194_v14 = vadd.f32 %v10280_v17, %v4754_v52  ;;  %v5278_v16 = vadd.f32 %v10319_v38, %v4774_v54  ;;  %v8703_v17 = vld [vmem:[%s10670_s12 + $0x6b8] sm:$0xff]   ;;  %v5295_v38 = vmax.f32 %v5237_v29, 0.0  ;;  %v7563_v54 = vld [vmem:[%s10671_s13 + $0x1] ss:$0 sm:$0xff] }
0x15fd   : > { %8034 = vmatprep.subr.bf16.mxu0 %v8668_v46  ;;  %8056 = vmatprep.subr.bf16.mxu1 %v8669_v47  ;;  %v8704_v47 = vld [vmem:[%s10670_s12 + $0x740] sm:$0xff]   ;;  %v8735_v50 = vld [vmem:[%s10670_s12 + $0x7b8] sm:$0xff]  }
0x15fe   : > { %v5290_v46 = vmax.f32 %v5153_v56, 0.0  ;;  %v5292_v11 = vmax.f32 %v5194_v14, 0.0  ;;  %v5297_v58 = vmax.f32 %v5278_v16, 0.0 }
0x1600   : > { %8035 = vmatpush3.bf16.msra.mxu0 %v8670_v48  ;;  %8057 = vmatpush3.bf16.msra.mxu1 %v8671_v51  ;;  %v8706_v48 = vld [vmem:[%s10670_s12 + $0x700] sm:$0xff]   ;;  %v5306_v51 = vpack.c.bf16 %v5290_v46, %v5290_v46  ;;  %v5308_v60 = vpack.c.bf16 %v5292_v11, %v5292_v11  ;;  %v5313_v5 = vpack.c.bf16 %v5297_v58, %v5297_v58 }
0x1601   : > { %8064 = vmatprep.subr.bf16.mxu0 %v8672_v0  ;;  %8086 = vmatprep.subr.bf16.mxu1 %v8673_v1  ;;  %v8708_v0 = vld [vmem:[%s10670_s12 + $0x748] sm:$0xff]   ;;  %v5311_v1 = vpack.c.bf16 %v5295_v38, %v5295_v38 }
0x1603   : > { %6460 = vmatmul.mubr.bf16.vlgmr.msra.gmra.mrb[72].mxu0 %v5302_v8  ;;  %6500 = vmatmul.mubr.bf16.vlgmr.msra.gmra.mrb[80].mxu1 %v5304_v20  ;;  %v8711_v8 = vld [vmem:[%s10670_s12 + $0x788] sm:$0xff]   ;;  %v8712_v20 = vld [vmem:[%s10670_s12 + $0x750] sm:$0xff]  }
0x1604   : > { %8065 = vmatpush3.bf16.msra.mxu0 %v8674_v6  ;;  %6539 = vmatprep.mubr.bf16.mxu0 %v5307_v21  ;;  %v8710_v6 = vld [vmem:[%s10670_s12 + $0x708] sm:$0xff]   ;;  %v8714_v21 = vld [vmem:[%s10670_s12 + $0x710] sm:$0xff]  }
0x1605   : > { %8087 = vmatpush3.bf16.msra.mxu1 %v8675_v15  ;;  %6579 = vmatprep.mubr.bf16.mxu1 %v5309_v24  ;;  %v8713_v15 = vld [vmem:[%s10670_s12 + $0x7d0] sm:$0xff]   ;;  %v8717_v24 = vld [vmem:[%s10670_s12 + $0x7d8] sm:$0xff]  }
0x1606   : > { %8066 = vmatprep.subr.bf16.mxu0 %v8676_v22  ;;  %8088 = vmatprep.subr.bf16.mxu1 %v8677_v23  ;;  %v8715_v22 = vld [vmem:[%s10670_s12 + $0x790] sm:$0xff]   ;;  %v8716_v23 = vld [vmem:[%s10670_s12 + $0x758] sm:$0xff]  }
0x1608   : > { %8067 = vmatpush3.bf16.msra.mxu0 %v8678_v25  ;;  %v8718_v25 = vld [vmem:[%s10670_s12 + $0x718] sm:$0xff]  }
0x1609   : > { %8089 = vmatpush3.bf16.msra.mxu1 %v8679_v26  ;;  %8068 = vmatprep.subr.bf16.mxu0 %v8680_v27  ;;  %v8719_v26 = vld [vmem:[%s10670_s12 + $0x798] sm:$0xff]   ;;  %v8720_v27 = vld [vmem:[%s10670_s12 + $0x760] sm:$0xff]  }
0x160a   : > { %8090 = vmatprep.subr.bf16.mxu1 %v8681_v45  ;;  %v8721_v45 = vld [vmem:[%s10670_s12 + $0x7e0] sm:$0xff]  }
0x160c   : > { %8069 = vmatpush3.bf16.msra.mxu0 %v8682_v30  ;;  %v8722_v30 = vld [vmem:[%s10670_s12 + $0x720] sm:$0xff]  }
0x160d   : > { %8091 = vmatpush3.bf16.msra.mxu1 %v8683_v31  ;;  %8070 = vmatprep.subr.bf16.mxu0 %v8684_v32  ;;  %v8723_v31 = vld [vmem:[%s10670_s12 + $0x7a0] sm:$0xff]   ;;  %v8724_v32 = vld [vmem:[%s10670_s12 + $0x768] sm:$0xff]  }
0x160e   : > { %8092 = vmatprep.subr.bf16.mxu1 %v8685_v33  ;;  %v8725_v33 = vld [vmem:[%s10670_s12 + $0x7e8] sm:$0xff]  }
0x1610   : > { %8071 = vmatpush3.bf16.msra.mxu0 %v8686_v34  ;;  %v8726_v34 = vld [vmem:[%s10670_s12 + $0x728] sm:$0xff]  }
0x1611   : > { %8093 = vmatpush3.bf16.msra.mxu1 %v8687_v35  ;;  %8072 = vmatprep.subr.bf16.mxu0 %v8688_v7  ;;  %v4762_v35 = vrot.slane %v10297_v63, %v9534_v4  ;;  %v8727_v7 = vld [vmem:[%s10670_s12 + $0x7a8] sm:$0xff]   ;;  %v8730_v4 = vld [vmem:[%s10670_s12 + $0x730] sm:$0xff]  }
0x1612   : > { %8094 = vmatprep.subr.bf16.mxu1 %v8689_v18  ;;  %v8728_v18 = vld [vmem:[%s10670_s12 + $0x770] sm:$0xff]  }
0x1613   : > { %v5235_v63 = vadd.f32 %v10313_v36, %v4762_v35  ;;  %v8734_v36 = vld [vmem:[%s10670_s12 + $0x738] sm:$0xff]  }
0x1614   : > { %8073 = vmatpush3.bf16.msra.mxu0 %v8690_v49  ;;  %v8729_v49 = vld [vmem:[%s10670_s12 + $0x7f0] sm:$0xff]  }
0x1615   : > { %8095 = vmatpush3.bf16.msra.mxu1 %v8691_v3  ;;  %8074 = vmatprep.subr.bf16.mxu0 %v8692_v39  ;;  %v8731_v3 = vld [vmem:[%s10670_s12 + $0x7b0] sm:$0xff]   ;;  %v8732_v39 = vld [vmem:[%s10670_s12 + $0x778] sm:$0xff]  }
0x1616   : > { %8096 = vmatprep.subr.bf16.mxu1 %v8693_v9  ;;  %v8733_v9 = vld [vmem:[%s10670_s12 + $0x7f8] sm:$0xff]  }
0x1618   : > { %8075 = vmatpush3.bf16.msra.mxu0 %v8694_v40  ;;  %v5294_v40 = vmax.f32 %v5235_v63, 0.0 }
0x1619   : > { %8097 = vmatpush3.bf16.msra.mxu1 %v8695_v13  ;;  %8076 = vmatprep.subr.bf16.mxu0 %v8696_v28  ;;  %v5296_v13 = vmax.f32 %v10315_v19, 0.0 }
0x161a   : > { %8098 = vmatprep.subr.bf16.mxu1 %v8697_v53  ;;  %v5310_v28 = vpack.c.bf16 %v5294_v40, %v5294_v40  ;;  %v8736_v40 = vld [vmem:[%s10676_s18] ss:$16 sps:$4 sm:$0xff]  }
0x161b   : > { %v5312_v52 = vpack.c.bf16 %v5296_v13, %v5296_v13  ;;  %v8741_v13 = vld [vmem:[%s10676_s18 + $0xc] ss:$16 sps:$4 sm:$0xff]  }
0x161c   : > { %8077 = vmatpush3.bf16.msra.mxu0 %v8698_v55 }
0x161d   : > { %8099 = vmatpush3.bf16.msra.mxu1 %v8699_v44  ;;  %8078 = vmatprep.subr.bf16.mxu0 %v8700_v61 }
0x161e   : > { %8100 = vmatprep.subr.bf16.mxu1 %v8701_v62 }
0x1620   : > { %8079 = vmatpush3.bf16.msra.mxu0 %v8702_v57 }
0x1621   : > { %8101 = vmatpush3.bf16.msra.mxu1 %v8703_v17  ;;  %8108 = vmatprep.subr.bf16.mxu0 %v8704_v47 }
0x1622   : > { %8130 = vmatprep.subr.bf16.mxu1 %v8705_v37 }
0x1623   : > { %6540 = vmatmul.mubr.bf16.vlgmr.msra.gmra.mrb[76].mxu0 %v5306_v51 }
0x1624   : > { %6580 = vmatmul.mubr.bf16.vlgmr.msra.gmra.mrb[84].mxu1 %v5308_v60  ;;  %8109 = vmatpush3.bf16.msra.mxu0 %v8706_v48 }
0x1625   : > { %6619 = vmatprep.mubr.bf16.mxu0 %v5311_v1  ;;  %8131 = vmatpush3.bf16.msra.mxu1 %v8707_v59 }
0x1626   : > { %6659 = vmatprep.mubr.bf16.mxu1 %v5313_v5  ;;  %8110 = vmatprep.subr.bf16.mxu0 %v8708_v0 }
0x1627   : > { %8132 = vmatprep.subr.bf16.mxu1 %v8709_v2 }
0x1628   : > { %8111 = vmatpush3.bf16.msra.mxu0 %v8710_v6 }
0x1629   : > { %8133 = vmatpush3.bf16.msra.mxu1 %v8711_v8  ;;  %8112 = vmatprep.subr.bf16.mxu0 %v8712_v20 }
0x162a   : > { %8134 = vmatprep.subr.bf16.mxu1 %v8713_v15 }
0x162c   : > { %8113 = vmatpush3.bf16.msra.mxu0 %v8714_v21 }
0x162d   : > { %8135 = vmatpush3.bf16.msra.mxu1 %v8715_v22  ;;  %8114 = vmatprep.subr.bf16.mxu0 %v8716_v23 }
0x162e   : > { %8136 = vmatprep.subr.bf16.mxu1 %v8717_v24 }
0x1630   : > { %8115 = vmatpush3.bf16.msra.mxu0 %v8718_v25 }
0x1631   : > { %8137 = vmatpush3.bf16.msra.mxu1 %v8719_v26  ;;  %8116 = vmatprep.subr.bf16.mxu0 %v8720_v27 }
0x1632   : > { %8138 = vmatprep.subr.bf16.mxu1 %v8721_v45 }
0x1634   : > { %8117 = vmatpush3.bf16.msra.mxu0 %v8722_v30 }
0x1635   : > { %8139 = vmatpush3.bf16.msra.mxu1 %v8723_v31  ;;  %8118 = vmatprep.subr.bf16.mxu0 %v8724_v32 }
0x1636   : > { %8140 = vmatprep.subr.bf16.mxu1 %v8725_v33 }
0x1638   : > { %8119 = vmatpush3.bf16.msra.mxu0 %v8726_v34 }
0x1639   : > { %8141 = vmatpush3.bf16.msra.mxu1 %v8727_v7  ;;  %8120 = vmatprep.subr.bf16.mxu0 %v8728_v18 }
0x163a   : > { %8142 = vmatprep.subr.bf16.mxu1 %v8729_v49 }
0x163c   : > { %8121 = vmatpush3.bf16.msra.mxu0 %v8730_v4 }
0x163d   : > { %8143 = vmatpush3.bf16.msra.mxu1 %v8731_v3  ;;  %8122 = vmatprep.subr.bf16.mxu0 %v8732_v39 }
0x163e   : > { %8144 = vmatprep.subr.bf16.mxu1 %v8733_v9 }
0x1640   : > { %8123 = vmatpush3.bf16.msra.mxu0 %v8734_v36 }
0x1641   : > { %8145 = vmatpush3.bf16.msra.mxu1 %v8735_v50  ;;  %v8738_v50 = vld [vmem:[%s10676_s18 + $0x4] ss:$16 sps:$4 sm:$0xff]  }
0x1642   : > { %6755 = vmatprep.subr.bf16.mxu0 %v8738_v50  ;;  %6796 = vmatprep.subr.bf16.mxu1 %v8741_v13 }
0x1643   : > { %6620 = vmatmul.mubr.bf16.vlgmr.msra.gmra.mrb[80].mxu0 %v5310_v28  ;;  %v8744_v28 = vld [vmem:[%s10676_s18 + $0x24] ss:$16 sps:$4 sm:$0xff]  }
0x1644   : > { %6660 = vmatmul.mubr.bf16.vlgmr.msra.gmra.mrb[88].mxu1 %v5312_v52  ;;  %6787 = vmatprep.mubr.bf16.mxu0 %v8841_v12  ;;  %v8747_v52 = vld [vmem:[%s10676_s18 + $0x2c] ss:$16 sps:$4 sm:$0xff]  }
0x1645   : > { %6828 = vmatprep.mubr.bf16.mxu1 %v8841_v12  ;;  %6756 = vmatpush1.bf16.msra.mxu0 %v8736_v40 }
0x1646   : > { %6757 = vmatprep.subr.bf16.mxu0 %v8744_v28 }
0x16b6   : > { %v7992_v53 = vpop.f32.mrb[68].mxu0  ;;  %v8014_v43 = vpop.f32.mrb[76].mxu1 }
0x16b7   : > { %v7993_v55 = vpop.f32.mrb[69].mxu0  ;;  %v8015_v56 = vpop.f32.mrb[77].mxu1 }
0x16b8   : > { %v7994_v19 = vadd.f32 %v7993_v55, %v7992_v53  ;;  %v8016_v44 = vadd.f32 %v8015_v56, %v8014_v43  ;;  %v7995_v61 = vpop.f32.mrb[70].mxu0  ;;  %v8017_v14 = vpop.f32.mrb[78].mxu1  ;;  %v8742_v53 = vld [vmem:[%s10676_s18 + $0x20] ss:$16 sps:$4 sm:$0xff]   ;;  %v8745_v43 = vld [vmem:[%s10676_s18 + $0x28] ss:$16 sps:$4 sm:$0xff]  }
0x16b9   : > { %v7996_v62 = vpop.f32.mrb[71].mxu0  ;;  %v8018_v29 = vpop.f32.mrb[79].mxu1  ;;  %6758 = vmatpush1.bf16.msra.mxu0 %v8742_v53  ;;  %v7695_v14 = vld [vmem:[%s10675_s17 + $0x1] ss:$0 sm:$0xff] }
0x16ba   : > { %v6382_v16 = vadd.f32 %v7994_v19, %v7563_v54 }
0x16bc   : > { %v6422_v57 = vadd.f32 %v8016_v44, %v6382_v16  ;;  %v7694_v44 = vld [vmem:[%s10674_s16 + $0x1] ss:$0 sm:$0xff] }
0x16d6   : > { %v8036_v46 = vpop.f32.mrb[72].mxu0  ;;  %v8058_v17 = vpop.f32.mrb[80].mxu1 }
0x16d7   : > { %v8037_v47 = vpop.f32.mrb[73].mxu0  ;;  %v8059_v12 = vpop.f32.mrb[81].mxu1 }
0x16d8   : > { %v8038_v11 = vadd.f32 %v8037_v47, %v8036_v46  ;;  %v8060_v37 = vadd.f32 %v8059_v12, %v8058_v17  ;;  %v8039_v38 = vpop.f32.mrb[74].mxu0  ;;  %v8061_v58 = vpop.f32.mrb[82].mxu1  ;;  %v8842_v17 = vmov 1966171168  }
0x16d9   : > { %v8040_v48 = vpop.f32.mrb[75].mxu0  ;;  %v8062_v51 = vpop.f32.mrb[83].mxu1  ;;  %v6844_v47 = vunpack.c.l.s4 %v8842_v17 }
0x16da   : > { %v6462_v59 = vadd.f32 %v8038_v11, %v6422_v57 }
0x16db   : > { %v6845_v12 = vunpack.c.0.s8 %v6844_v47 }
0x16dc   : > { %v6502_v60 = vadd.f32 %v8060_v37, %v6462_v59 }
0x16dd   : > { %v6848_v38 = vsub.s32 %v6845_v12, %v9424_v42 }
0x16f6   : > { %v8080_v0 = vpop.f32.mrb[76].mxu0 }
0x16f7   : > { %v8102_v1 = vpop.f32.mrb[84].mxu1  ;;  %v8081_v2 = vpop.f32.mrb[77].mxu0 }
0x16f8   : > { %v8082_v5 = vadd.f32 %v8081_v2, %v8080_v0  ;;  %v8103_v6 = vpop.f32.mrb[85].mxu1  ;;  %v8083_v8 = vpop.f32.mrb[78].mxu0 }
0x16f9   : > { %v8104_v20 = vadd.f32 %v8103_v6, %v8102_v1  ;;  %v8105_v15 = vpop.f32.mrb[86].mxu1  ;;  %v8084_v21 = vpop.f32.mrb[79].mxu0 }
0x16fa   : > { %v6542_v22 = vadd.f32 %v8082_v5, %v6502_v60  ;;  %v8106_v23 = vpop.f32.mrb[87].mxu1 }
0x16fc   : > { %v6582_v24 = vadd.f32 %v8104_v20, %v6542_v22 }
0x1716   : > { %v8124_v25 = vpop.f32.mrb[80].mxu0 }
0x1717   : > { %v8146_v26 = vpop.f32.mrb[88].mxu1  ;;  %v8125_v27 = vpop.f32.mrb[81].mxu0 }
0x1718   : > { %v8126_v45 = vadd.f32 %v8125_v27, %v8124_v25  ;;  %v8147_v30 = vpop.f32.mrb[89].mxu1  ;;  %v8127_v31 = vpop.f32.mrb[82].mxu0 }
0x1719   : > { %v8148_v32 = vadd.f32 %v8147_v30, %v8146_v26  ;;  %v8149_v33 = vpop.f32.mrb[90].mxu1  ;;  %v8128_v34 = vpop.f32.mrb[83].mxu0 }
0x171a   : > { %v6622_v35 = vadd.f32 %v8126_v45, %v6582_v24  ;;  %v8150_v7 = vpop.f32.mrb[91].mxu1 }
0x171c   : > { %v6662_v18 = vadd.f32 %v8148_v32, %v6622_v35 }
0x171e   : > { %v6667_v49 = vadd.f32 %v6662_v18, %v10043_v10  ;;  %v8739_v10 = vld [vmem:[%s10676_s18 + $0x8] ss:$16 sps:$4 sm:$0xff]  }
0x171f   : > { %6797 = vmatpush1.bf16.msra.mxu1 %v8739_v10 }
0x1720   : > { %v6672_v4 = vsel %vm626_vm1, %v6667_v49, 0.0  ;;  %6798 = vmatprep.subr.bf16.mxu1 %v8747_v52 }
0x1721   : > { %6673 = vadd.xlane.f32.xlu0 %v6672_v4 }
0x1723   : > { %6799 = vmatpush1.bf16.msra.mxu1 %v8745_v43 }
0x17ae   : > { %v6674_v63 = vpop.xlane.xlu0 %6673 }
0x17af   : > { %v6675_v3 = vmul.f32 0.03125, %v6674_v63 }
0x17b1   : > { %v6676_v39 = vsub.f32 %v6667_v49, %v6675_v3 }
0x17b3   : > { %v6677_v9 = vmul.f32 %v6676_v39, %v6676_v39 }
0x17b5   : > { %v6678_v36 = vsel %vm626_vm1, %v6677_v9, 0.0 }
0x17b6   : > { %6679 = vadd.xlane.f32.xlu1 %v6678_v36 }
0x1843   : > { %v6680_v54 = vpop.xlane.xlu1 %6679 }
0x1844   : > { %v6681_v55 = vmul.f32 0.03125, %v6680_v54 }
0x1846   : > { %v6682_v56 = vadd.f32 1e-05, %v6681_v55 }
0x1848   : > { %8770 = vrsqrt.f32 %v6682_v56 }
0x1852   : > { %v8771_v19 = vpop.eup %8770 }
0x1853   : > { %v6684_v61 = vmul.f32 %v8771_v19, %v6676_v39 }
0x1855   : > { %v6691_v62 = vmul.f32 %v7694_v44, %v6684_v61 }
0x1857   : > { %v6698_v29 = vadd.f32 %v7695_v14, %v6691_v62 }
0x1859   : > { %v6699_v16 = vpack.c.bf16 %v6698_v29, %v6698_v29 }
0x185b   : > { %v6709_v57 = vshrl.u32 %v6699_v16, 16 }
0x185d   : > { %v6711_v46 = vrot.slane %v6709_v57, 3 }
0x185f   : > { %7704 = vmatmul.mubr.msk.bf16.vlgmr.msra.gmra.mrb[84].mxu0 %vm626_vm1, %v6711_v46  ;;  %7705 = vmatmul.mubr.msk.bf16.vlgmr.msra.gmra.mrb[92].mxu1 %vm626_vm1, %v6711_v46 }
0x1932   : > { %v6789_v11 = vpop.f32.mrb[84].mxu0  ;;  %v6830_v37 = vpop.f32.mrb[92].mxu1 }
0x1933   : > { %v6791_v58 = vpop.f32.mrb[85].mxu0  ;;  %v6832_v48 = vpop.f32.mrb[93].mxu1 }
0x1934   : > { %v6841_v51 = vcombine.low %v6789_v11, %v6791_v58  ;;  %v6842_v59 = vcombine.low %v6830_v37, %v6832_v48  ;;  %v6793_v60 = vpop.f32.mrb[86].mxu0  ;;  %v6834_v0 = vpop.f32.mrb[94].mxu1 }
0x1935   : > { %v6794_v1 = vpop.f32.mrb[87].mxu0  ;;  %v6835_v2 = vpop.f32.mrb[95].mxu1 }
0x1936   : > { %v6849_v5 = vrot.slane %v6841_v51, %v6848_v38  ;;  %v6856_v6 = vrot.slane %v6842_v59, %v6848_v38 }
0x1938   : > { %v6857_v8 = vcombine.low %v6849_v5, %v6856_v6 }
0x193a   : > { %v6864_v20 = vrot.slane %v6857_v8, %v6848_v38 }
0x193c   : > { %6870 = vst.msk [vmem:[%s604_s28] sm:$0xf] %vm6868_vm4, %v6864_v20 }
0x193d   : > { %8787 = shalt.err (!%p8784_p3)
}
0x193e   : > { %s8788_s19 = scalar_lea.hbm %s10616_s21, 64  ;;  %s8792_s20 = scalar_lea.hbm %s10706_s24, 128 }
0x193f   : > { %p8789_p4 = scmp.ne.s32.totalorder %s10616_s21, %s8788_s19  ;;  %p8793_p9 = scmp.lt.u32.totalorder %s10616_s21, %s10706_s24 }
0x1940   : > { %p8794_p10 = scmp.lt.u32.totalorder %s8792_s20, %s8788_s19  ;;  %p8796_p12 = scmp.lt.u32.totalorder %s8788_s19, %s10616_s21 }
0x1941   : > { %p8790_p7 = pnand %p8789_p4, %p8982_p5 }
0x1942   : > { %p8795_p11 = por %p8794_p10, %p8793_p9 }
0x1943   : > { %p8791_p8 = pneg %p8790_p7 }
0x1944   : > { %p8797_p13 = por %p8796_p12, %p8795_p11 }
0x1946   : > { %p8798_p0 = pnand %p8797_p13, %p8791_p8 }
0x1948   : > { %8801 = shalt.err (!%p8798_p0)
}
0x1949   : > { %8436 = dma.vmem_to_hbm [thread:$0]  (%p8982_p5), %s10618_s23, 64, %s10616_s21, %s6872_s26  }
0x194a PF: > { %s10707_s2 = sld [smem:[#allocation7_spill]]  ;;  %s10708_s27 = sld [smem:[#allocation5_spill]] }
0x1950   : > { %p8442_p1 = scmp.ge.s32.totalorder %s10707_s2, 2  ;;  %s6898_s22 = sand.u32 1, %s10708_s27  }
0x1951   : > { %s6899_s28 = scalar_lea.sflag [#allocation3], %s6898_s22 }
0x1952   : > { %p8439_p2 = pnand %p8442_p1, %p8986_p6 }
0x1954   : > { %8819 = dma.done.wait (!%p8439_p2), %s6899_s28, 64  }
0x1955   : > { %8821 = vsyncadd (!%p8439_p2), %s6899_s28, 4294967232  ;;  %s10710_s21 = sld [smem:[#allocation8_spill]]  ;;  %s10711_s19 = sld [smem:[#allocation6_spill]] }
0x1956   : > { %s10712_s20 = sld [smem:[#allocation9_spill]]  ;;  %s10713_s0 = smov %s8828_s30 }
0x195b   : > { %p29_p3 = scmp.ge.s32.totalorder %s10710_s21, 4   ;;  %s10714_s30 = smov %s10711_s19 }
0x195d   :  { %31 = sbr.rel (!%p29_p3) target bundleno = 9 (0x9), region = 164 }
0x1964   :  { %6904 = vsyncpa [#allocation3], 1 }
0x1965   :  { %6906 = vsyncpa [#allocation3 + $0x1], 1 }

</bundles_post_ra>
